<compile_context>
chip_gen: v5e
topology: v5e:2x2
jax: 0.10.0
libtpu: 0.0.40
codegen_flags: <defaults>
</compile_context>

<pallas_src>
import jax
import jax.numpy as jnp
from jax.experimental import pallas as pl
from jax.experimental.pallas import tpu as pltpu

# Small shapes consistent with the module's forward.
B = 8    # batch
D = 4    # state dim (e.g. SoC-related states)
H = 32   # hidden dim of ode_func MLP
T = 8    # number of time points

# Dormand-Prince (dopri5) Butcher tableau (5th-order solution weights).
A21 = 1.0 / 5.0
A31, A32 = 3.0 / 40.0, 9.0 / 40.0
A41, A42, A43 = 44.0 / 45.0, -56.0 / 15.0, 32.0 / 9.0
A51, A52, A53, A54 = 19372.0 / 6561.0, -25360.0 / 2187.0, 64448.0 / 6561.0, -212.0 / 729.0
A61, A62, A63, A64, A65 = (9017.0 / 3168.0, -355.0 / 33.0, 46732.0 / 5247.0,
                           49.0 / 176.0, -5103.0 / 18656.0)
BW1, BW3, BW4, BW5, BW6 = (35.0 / 384.0, 500.0 / 1113.0, 125.0 / 192.0,
                           -2187.0 / 6784.0, 11.0 / 84.0)

# Row layout of the single packed parameter array (lane width = H = 32; the two
# (H, .) matrices are placed on 8-sublane-aligned row offsets).
R_W1X = 0            # rows [0, D)     : W1x                      (D, H)
R_W1C = D            # row   D         : w1c                      (1, H)
R_B1 = D + 1         # row   D+1       : b1                       (1, H)
R_W21 = 8            # rows [8, 8+H)   : W21 = W2 @ W1x           (H, H)
R_B21 = R_W21 + H    # row   40        : b21 = b2 @ W1x           (1, H)
R_W2 = 48            # rows [48, 48+H) : W2 (zero-padded lanes)   (H, D)
R_B2 = R_W2 + H      # row   80        : b2 (zero-padded lanes)   (1, D)
P_ROWS = 88          # padded to a multiple of 8 sublanes


def _neural_ode_kernel(t_ref, x0_ref, cur_ref, p_ref, out_ref):
    """Whole integration in one invocation: statically unrolled DOPRI5 steps."""
    # ---- hoisted, loop-invariant loads / broadcasts (done exactly once) ------
    w1x_b = [jnp.broadcast_to(p_ref[R_W1X + d:R_W1X + d + 1, :], (B, H))
             for d in range(D)]                                    # D x (B, H)
    w1c_b = jnp.broadcast_to(p_ref[R_W1C:R_W1C + 1, :], (B, H))
    b1_b = jnp.broadcast_to(p_ref[R_B1:R_B1 + 1, :], (B, H))
    b21_b = jnp.broadcast_to(p_ref[R_B21:R_B21 + 1, :], (B, H))
    b2_b = jnp.broadcast_to(p_ref[R_B2:R_B2 + 1, 0:D], (B, D))
    # MXU operands: explicit bf16 (single MXU pass; accumulation stays f32).
    w21_bf = p_ref[R_W21:R_W21 + H, :].astype(jnp.bfloat16)        # (H, H)
    w2_bf = p_ref[R_W2:R_W2 + H, 0:D].astype(jnp.bfloat16)         # (H, D)

    y = x0_ref[...].astype(jnp.float32)                            # (B, D) state

    def kh(g):
        # k @ W1x expressed directly in H-space: tanh(pre) @ W21 + b21.
        return jnp.dot(g.astype(jnp.bfloat16), w21_bf,
                       preferred_element_type=jnp.float32) + b21_b

    # ---- statically unrolled time loop (all indices compile-time constants) --
    for i in range(T - 1):
        out_ref[:, i * D:(i + 1) * D] = y                          # y(t_i)

        h = t_ref[i + 1] - t_ref[i]                                # sreg step size
        cur = cur_ref[:, i:i + 1]                                  # (B, 1) ZOH current

        # Stage-invariant pre-activation: y @ W1x + I*w1c + b1 (D=4 kept on VPU).
        pre0 = cur * w1c_b + b1_b
        for d in range(D):
            pre0 = pre0 + y[:, d:d + 1] * w1x_b[d]

        # Fold h into the tableau coefficients on the (idle) scalar unit.
        hA21 = h * A21
        hA31, hA32 = h * A31, h * A32
        hA41, hA42, hA43 = h * A41, h * A42, h * A43
        hA51, hA52, hA53, hA54 = h * A51, h * A52, h * A53, h * A54
        hA61, hA62, hA63, hA64, hA65 = h * A61, h * A62, h * A63, h * A64, h * A65
        hB1, hB3, hB4, hB5, hB6 = h * BW1, h * BW3, h * BW4, h * BW5, h * BW6

        # DOPRI5 stages, run entirely in H-space (pre-activation recursion).
        g1 = jnp.tanh(pre0)
        k1 = kh(g1)
        g2 = jnp.tanh(pre0 + hA21 * k1)
        k2 = kh(g2)
        g3 = jnp.tanh(pre0 + hA31 * k1 + hA32 * k2)
        k3 = kh(g3)
        g4 = jnp.tanh(pre0 + hA41 * k1 + hA42 * k2 + hA43 * k3)
        k4 = kh(g4)
        g5 = jnp.tanh(pre0 + hA51 * k1 + hA52 * k2 + hA53 * k3 + hA54 * k4)
        k5 = kh(g5)
        g6 = jnp.tanh(pre0 + hA61 * k1 + hA62 * k2 + hA63 * k3 + hA64 * k4 + hA65 * k5)

        # y update: W2 applied once per step; sum(b_j) == 1 gives the +h*b2 term.
        gc = hB1 * g1 + hB3 * g3 + hB4 * g4 + hB5 * g5 + hB6 * g6
        y = y + jnp.dot(gc.astype(jnp.bfloat16), w2_bf,
                        preferred_element_type=jnp.float32) + h * b2_b

    out_ref[:, (T - 1) * D:T * D] = y                              # y(t_{T-1})


def pack_params(params):
    """One-time param prep: fold W2 into the stage recursion (W21 = W2@W1x,
    b21 = b2@W1x) and pack everything into a single (P_ROWS, H) VMEM block."""
    w1x, w1c, b1, w2, b2 = params
    hi = jax.lax.Precision.HIGHEST
    w21 = jnp.dot(w2, w1x, precision=hi)           # (H, H)
    b21 = jnp.dot(b2, w1x, precision=hi)           # (1, H)
    pack = jnp.zeros((P_ROWS, H), jnp.float32)
    pack = pack.at[R_W1X:R_W1X + D, :].set(w1x)
    pack = pack.at[R_W1C, :].set(w1c[0])
    pack = pack.at[R_B1, :].set(b1[0])
    pack = pack.at[R_W21:R_W21 + H, :].set(w21)
    pack = pack.at[R_B21, :].set(b21[0])
    pack = pack.at[R_W2:R_W2 + H, 0:D].set(w2)
    pack = pack.at[R_B2, 0:D].set(b2[0])
    return pack


def neural_ode_forward(x0, current_profile, t, param_pack):
    """x0: (B, D), current_profile: (B, T), t: (T,) -> (B, T, D)."""
    vmem = pl.BlockSpec(memory_space=pltpu.MemorySpace.VMEM)
    smem = pl.BlockSpec(memory_space=pltpu.MemorySpace.SMEM)

    out_btd = pl.pallas_call(
        _neural_ode_kernel,
        out_shape=jax.ShapeDtypeStruct((B, T * D), jnp.float32),
        in_specs=[
            smem,   # t          (T,)        -> scalar reads for step sizes
            vmem,   # x0         (B, D)
            vmem,   # current    (B, T)
            vmem,   # param pack (P_ROWS, H)
        ],
        out_specs=vmem,
    )(t, x0, current_profile, param_pack)

    # Lane-dense (B, T*D) slab -> (B, T, D): contiguous reshape (free), matching
    # torch's odeint(...).permute(1, 0, 2) layout without a transpose op.
    return out_btd.reshape(B, T, D)


def init_params(key):
    k1, k2, k3, k4, k5 = jax.random.split(key, 5)
    w1x = jax.random.normal(k1, (D, H), jnp.float32) * 0.3
    w1c = jax.random.normal(k2, (1, H), jnp.float32) * 0.3
    b1 = jax.random.normal(k3, (1, H), jnp.float32) * 0.05
    w2 = jax.random.normal(k4, (H, D), jnp.float32) * 0.3
    b2 = jax.random.normal(k5, (1, D), jnp.float32) * 0.05
    return (w1x, w1c, b1, w2, b2)


if __name__ == "__main__":
    key = jax.random.PRNGKey(0)
    kp, kx, kc = jax.random.split(key, 3)

    params = init_params(kp)
    param_pack = jax.block_until_ready(pack_params(params))      # one-time prep

    x0 = jax.random.normal(kx, (B, D), jnp.float32)              # initial state
    current_profile = jax.random.normal(kc, (B, T), jnp.float32) # input current
    t = jnp.linspace(0.0, 1.0, T, dtype=jnp.float32)             # time grid

    out = neural_ode_forward(x0, current_profile, t, param_pack)
    out = jax.block_until_ready(out)
    assert out.shape == (B, T, D), out.shape
    print("KERNEL_OK")
</pallas_src>

<mosaic_0001>
module attributes {stable_mosaic.version = 11 : i64} {
  func.func @_neural_ode_kernel(%arg0: memref<8xf32, #tpu.memory_space<smem>>, %arg1: memref<8x4xf32, #tpu.memory_space<vmem>>, %arg2: memref<8x8xf32, #tpu.memory_space<vmem>>, %arg3: memref<88x32xf32, #tpu.memory_space<vmem>>, %arg4: memref<8x32xf32, #tpu.memory_space<vmem>>) attributes {dimension_semantics = [], scalar_prefetch = 0 : i64, scratch_operands = 0 : i64, tpu.core_type = #tpu.core_type<tc>} {
    %c0 = arith.constant 0 : index
    %c0_0 = arith.constant 0 : index
    %0 = vector.load %arg3[%c0, %c0_0] : memref<88x32xf32, #tpu.memory_space<vmem>>, vector<1x32xf32>
    %1 = vector.shape_cast %0 : vector<1x32xf32> to vector<1x32xf32>
    %2 = vector.broadcast %1 : vector<1x32xf32> to vector<8x32xf32>
    %c1 = arith.constant 1 : index
    %c0_1 = arith.constant 0 : index
    %3 = vector.load %arg3[%c1, %c0_1] : memref<88x32xf32, #tpu.memory_space<vmem>>, vector<1x32xf32>
    %4 = vector.shape_cast %3 : vector<1x32xf32> to vector<1x32xf32>
    %5 = vector.broadcast %4 : vector<1x32xf32> to vector<8x32xf32>
    %c2 = arith.constant 2 : index
    %c0_2 = arith.constant 0 : index
    %6 = vector.load %arg3[%c2, %c0_2] : memref<88x32xf32, #tpu.memory_space<vmem>>, vector<1x32xf32>
    %7 = vector.shape_cast %6 : vector<1x32xf32> to vector<1x32xf32>
    %8 = vector.broadcast %7 : vector<1x32xf32> to vector<8x32xf32>
    %c3 = arith.constant 3 : index
    %c0_3 = arith.constant 0 : index
    %9 = vector.load %arg3[%c3, %c0_3] : memref<88x32xf32, #tpu.memory_space<vmem>>, vector<1x32xf32>
    %10 = vector.shape_cast %9 : vector<1x32xf32> to vector<1x32xf32>
    %11 = vector.broadcast %10 : vector<1x32xf32> to vector<8x32xf32>
    %c4 = arith.constant 4 : index
    %c0_4 = arith.constant 0 : index
    %12 = vector.load %arg3[%c4, %c0_4] : memref<88x32xf32, #tpu.memory_space<vmem>>, vector<1x32xf32>
    %13 = vector.shape_cast %12 : vector<1x32xf32> to vector<1x32xf32>
    %14 = vector.broadcast %13 : vector<1x32xf32> to vector<8x32xf32>
    %c5 = arith.constant 5 : index
    %c0_5 = arith.constant 0 : index
    %15 = vector.load %arg3[%c5, %c0_5] : memref<88x32xf32, #tpu.memory_space<vmem>>, vector<1x32xf32>
    %16 = vector.shape_cast %15 : vector<1x32xf32> to vector<1x32xf32>
    %17 = vector.broadcast %16 : vector<1x32xf32> to vector<8x32xf32>
    %c40 = arith.constant 40 : index
    %c0_6 = arith.constant 0 : index
    %18 = vector.load %arg3[%c40, %c0_6] : memref<88x32xf32, #tpu.memory_space<vmem>>, vector<1x32xf32>
    %19 = vector.shape_cast %18 : vector<1x32xf32> to vector<1x32xf32>
    %20 = vector.broadcast %19 : vector<1x32xf32> to vector<8x32xf32>
    %c80 = arith.constant 80 : index
    %c0_7 = arith.constant 0 : index
    %21 = vector.load %arg3[%c80, %c0_7] : memref<88x32xf32, #tpu.memory_space<vmem>>, vector<1x4xf32>
    %22 = vector.shape_cast %21 : vector<1x4xf32> to vector<1x4xf32>
    %23 = vector.broadcast %22 : vector<1x4xf32> to vector<8x4xf32>
    %c8 = arith.constant 8 : index
    %c0_8 = arith.constant 0 : index
    %24 = vector.load %arg3[%c8, %c0_8] : memref<88x32xf32, #tpu.memory_space<vmem>>, vector<32x32xf32>
    %25 = arith.truncf %24 : vector<32x32xf32> to vector<32x32xbf16>
    %c48 = arith.constant 48 : index
    %c0_9 = arith.constant 0 : index
    %26 = vector.load %arg3[%c48, %c0_9] : memref<88x32xf32, #tpu.memory_space<vmem>>, vector<32x4xf32>
    %27 = arith.truncf %26 : vector<32x4xf32> to vector<32x4xbf16>
    %c0_10 = arith.constant 0 : index
    %c0_11 = arith.constant 0 : index
    %28 = vector.load %arg1[%c0_10, %c0_11] : memref<8x4xf32, #tpu.memory_space<vmem>>, vector<8x4xf32>
    %c0_12 = arith.constant 0 : index
    %c0_13 = arith.constant 0 : index
    %29 = vector.load %arg4[%c0_12, %c0_13] : memref<8x32xf32, #tpu.memory_space<vmem>>, vector<8x4xf32>
    tpu.vector_store %arg4[%c0_12, %c0_13], %28 {strides = array<i32>} : memref<8x32xf32, #tpu.memory_space<vmem>>, vector<8x4xf32>,
    %c1_14 = arith.constant 1 : index
    %30 = memref.load %arg0[%c1_14] : memref<8xf32, #tpu.memory_space<smem>>
    %c0_15 = arith.constant 0 : index
    %31 = memref.load %arg0[%c0_15] : memref<8xf32, #tpu.memory_space<smem>>
    %32 = arith.subf %30, %31 : f32
    %c0_16 = arith.constant 0 : index
    %c0_17 = arith.constant 0 : index
    %33 = vector.load %arg2[%c0_16, %c0_17] : memref<8x8xf32, #tpu.memory_space<vmem>>, vector<8x1xf32>
    %34 = vector.broadcast %33 : vector<8x1xf32> to vector<8x32xf32>
    %35 = arith.mulf %34, %14 : vector<8x32xf32>
    %36 = arith.addf %35, %17 : vector<8x32xf32>
    %37 = vector.extract_strided_slice %28 {offsets = [0, 0], sizes = [8, 1], strides = [1, 1]} : vector<8x4xf32> to vector<8x1xf32>
    %38 = vector.broadcast %37 : vector<8x1xf32> to vector<8x32xf32>
    %39 = arith.mulf %38, %2 : vector<8x32xf32>
    %40 = arith.addf %36, %39 : vector<8x32xf32>
    %41 = vector.extract_strided_slice %28 {offsets = [0, 1], sizes = [8, 1], strides = [1, 1]} : vector<8x4xf32> to vector<8x1xf32>
    %42 = vector.broadcast %41 : vector<8x1xf32> to vector<8x32xf32>
    %43 = arith.mulf %42, %5 : vector<8x32xf32>
    %44 = arith.addf %40, %43 : vector<8x32xf32>
    %45 = vector.extract_strided_slice %28 {offsets = [0, 2], sizes = [8, 1], strides = [1, 1]} : vector<8x4xf32> to vector<8x1xf32>
    %46 = vector.broadcast %45 : vector<8x1xf32> to vector<8x32xf32>
    %47 = arith.mulf %46, %8 : vector<8x32xf32>
    %48 = arith.addf %44, %47 : vector<8x32xf32>
    %49 = vector.extract_strided_slice %28 {offsets = [0, 3], sizes = [8, 1], strides = [1, 1]} : vector<8x4xf32> to vector<8x1xf32>
    %50 = vector.broadcast %49 : vector<8x1xf32> to vector<8x32xf32>
    %51 = arith.mulf %50, %11 : vector<8x32xf32>
    %52 = arith.addf %48, %51 : vector<8x32xf32>
    %cst = arith.constant 2.000000e-01 : f32
    %53 = arith.mulf %32, %cst : f32
    %cst_18 = arith.constant 7.500000e-02 : f32
    %54 = arith.mulf %32, %cst_18 : f32
    %cst_19 = arith.constant 2.250000e-01 : f32
    %55 = arith.mulf %32, %cst_19 : f32
    %cst_20 = arith.constant 0.977777779 : f32
    %56 = arith.mulf %32, %cst_20 : f32
    %cst_21 = arith.constant -3.73333335 : f32
    %57 = arith.mulf %32, %cst_21 : f32
    %cst_22 = arith.constant 3.55555558 : f32
    %58 = arith.mulf %32, %cst_22 : f32
    %cst_23 = arith.constant 2.95259857 : f32
    %59 = arith.mulf %32, %cst_23 : f32
    %cst_24 = arith.constant -11.5957937 : f32
    %60 = arith.mulf %32, %cst_24 : f32
    %cst_25 = arith.constant 9.82289314 : f32
    %61 = arith.mulf %32, %cst_25 : f32
    %cst_26 = arith.constant -0.290809333 : f32
    %62 = arith.mulf %32, %cst_26 : f32
    %cst_27 = arith.constant 2.84627533 : f32
    %63 = arith.mulf %32, %cst_27 : f32
    %cst_28 = arith.constant -10.757576 : f32
    %64 = arith.mulf %32, %cst_28 : f32
    %cst_29 = arith.constant 8.90642261 : f32
    %65 = arith.mulf %32, %cst_29 : f32
    %cst_30 = arith.constant 0.278409094 : f32
    %66 = arith.mulf %32, %cst_30 : f32
    %cst_31 = arith.constant -0.273531318 : f32
    %67 = arith.mulf %32, %cst_31 : f32
    %cst_32 = arith.constant 0.0911458358 : f32
    %68 = arith.mulf %32, %cst_32 : f32
    %cst_33 = arith.constant 0.449236304 : f32
    %69 = arith.mulf %32, %cst_33 : f32
    %cst_34 = arith.constant 0.651041686 : f32
    %70 = arith.mulf %32, %cst_34 : f32
    %cst_35 = arith.constant -0.322376192 : f32
    %71 = arith.mulf %32, %cst_35 : f32
    %cst_36 = arith.constant 0.130952388 : f32
    %72 = arith.mulf %32, %cst_36 : f32
    %73 = math.tanh %52 : vector<8x32xf32>
    %74 = arith.truncf %73 : vector<8x32xf32> to vector<8x32xbf16>
    %cst_37 = arith.constant dense<0.000000e+00> : vector<8x32xf32>
    %75 = tpu.matmul %74, %25, %cst_37 {dimension_numbers = #tpu.dot_dimension_numbers<[1], [0], [0], [1], [0, 0, 1, 1], [], []>} : vector<8x32xbf16>, vector<32x32xbf16>, vector<8x32xf32> -> vector<8x32xf32>
    %76 = arith.addf %75, %20 : vector<8x32xf32>
    %77 = vector.broadcast %53 : f32 to vector<8x32xf32>
    %78 = arith.mulf %77, %76 : vector<8x32xf32>
    %79 = arith.addf %52, %78 : vector<8x32xf32>
    %80 = math.tanh %79 : vector<8x32xf32>
    %81 = arith.truncf %80 : vector<8x32xf32> to vector<8x32xbf16>
    %cst_38 = arith.constant dense<0.000000e+00> : vector<8x32xf32>
    %82 = tpu.matmul %81, %25, %cst_38 {dimension_numbers = #tpu.dot_dimension_numbers<[1], [0], [0], [1], [0, 0, 1, 1], [], []>} : vector<8x32xbf16>, vector<32x32xbf16>, vector<8x32xf32> -> vector<8x32xf32>
    %83 = arith.addf %82, %20 : vector<8x32xf32>
    %84 = vector.broadcast %54 : f32 to vector<8x32xf32>
    %85 = arith.mulf %84, %76 : vector<8x32xf32>
    %86 = arith.addf %52, %85 : vector<8x32xf32>
    %87 = vector.broadcast %55 : f32 to vector<8x32xf32>
    %88 = arith.mulf %87, %83 : vector<8x32xf32>
    %89 = arith.addf %86, %88 : vector<8x32xf32>
    %90 = math.tanh %89 : vector<8x32xf32>
    %91 = arith.truncf %90 : vector<8x32xf32> to vector<8x32xbf16>
    %cst_39 = arith.constant dense<0.000000e+00> : vector<8x32xf32>
    %92 = tpu.matmul %91, %25, %cst_39 {dimension_numbers = #tpu.dot_dimension_numbers<[1], [0], [0], [1], [0, 0, 1, 1], [], []>} : vector<8x32xbf16>, vector<32x32xbf16>, vector<8x32xf32> -> vector<8x32xf32>
    %93 = arith.addf %92, %20 : vector<8x32xf32>
    %94 = vector.broadcast %56 : f32 to vector<8x32xf32>
    %95 = arith.mulf %94, %76 : vector<8x32xf32>
    %96 = arith.addf %52, %95 : vector<8x32xf32>
    %97 = vector.broadcast %57 : f32 to vector<8x32xf32>
    %98 = arith.mulf %97, %83 : vector<8x32xf32>
    %99 = arith.addf %96, %98 : vector<8x32xf32>
    %100 = vector.broadcast %58 : f32 to vector<8x32xf32>
    %101 = arith.mulf %100, %93 : vector<8x32xf32>
    %102 = arith.addf %99, %101 : vector<8x32xf32>
    %103 = math.tanh %102 : vector<8x32xf32>
    %104 = arith.truncf %103 : vector<8x32xf32> to vector<8x32xbf16>
    %cst_40 = arith.constant dense<0.000000e+00> : vector<8x32xf32>
    %105 = tpu.matmul %104, %25, %cst_40 {dimension_numbers = #tpu.dot_dimension_numbers<[1], [0], [0], [1], [0, 0, 1, 1], [], []>} : vector<8x32xbf16>, vector<32x32xbf16>, vector<8x32xf32> -> vector<8x32xf32>
    %106 = arith.addf %105, %20 : vector<8x32xf32>
    %107 = vector.broadcast %59 : f32 to vector<8x32xf32>
    %108 = arith.mulf %107, %76 : vector<8x32xf32>
    %109 = arith.addf %52, %108 : vector<8x32xf32>
    %110 = vector.broadcast %60 : f32 to vector<8x32xf32>
    %111 = arith.mulf %110, %83 : vector<8x32xf32>
    %112 = arith.addf %109, %111 : vector<8x32xf32>
    %113 = vector.broadcast %61 : f32 to vector<8x32xf32>
    %114 = arith.mulf %113, %93 : vector<8x32xf32>
    %115 = arith.addf %112, %114 : vector<8x32xf32>
    %116 = vector.broadcast %62 : f32 to vector<8x32xf32>
    %117 = arith.mulf %116, %106 : vector<8x32xf32>
    %118 = arith.addf %115, %117 : vector<8x32xf32>
    %119 = math.tanh %118 : vector<8x32xf32>
    %120 = arith.truncf %119 : vector<8x32xf32> to vector<8x32xbf16>
    %cst_41 = arith.constant dense<0.000000e+00> : vector<8x32xf32>
    %121 = tpu.matmul %120, %25, %cst_41 {dimension_numbers = #tpu.dot_dimension_numbers<[1], [0], [0], [1], [0, 0, 1, 1], [], []>} : vector<8x32xbf16>, vector<32x32xbf16>, vector<8x32xf32> -> vector<8x32xf32>
    %122 = arith.addf %121, %20 : vector<8x32xf32>
    %123 = vector.broadcast %63 : f32 to vector<8x32xf32>
    %124 = arith.mulf %123, %76 : vector<8x32xf32>
    %125 = arith.addf %52, %124 : vector<8x32xf32>
    %126 = vector.broadcast %64 : f32 to vector<8x32xf32>
    %127 = arith.mulf %126, %83 : vector<8x32xf32>
    %128 = arith.addf %125, %127 : vector<8x32xf32>
    %129 = vector.broadcast %65 : f32 to vector<8x32xf32>
    %130 = arith.mulf %129, %93 : vector<8x32xf32>
    %131 = arith.addf %128, %130 : vector<8x32xf32>
    %132 = vector.broadcast %66 : f32 to vector<8x32xf32>
    %133 = arith.mulf %132, %106 : vector<8x32xf32>
    %134 = arith.addf %131, %133 : vector<8x32xf32>
    %135 = vector.broadcast %67 : f32 to vector<8x32xf32>
    %136 = arith.mulf %135, %122 : vector<8x32xf32>
    %137 = arith.addf %134, %136 : vector<8x32xf32>
    %138 = math.tanh %137 : vector<8x32xf32>
    %139 = vector.broadcast %68 : f32 to vector<8x32xf32>
    %140 = arith.mulf %139, %73 : vector<8x32xf32>
    %141 = vector.broadcast %69 : f32 to vector<8x32xf32>
    %142 = arith.mulf %141, %90 : vector<8x32xf32>
    %143 = arith.addf %140, %142 : vector<8x32xf32>
    %144 = vector.broadcast %70 : f32 to vector<8x32xf32>
    %145 = arith.mulf %144, %103 : vector<8x32xf32>
    %146 = arith.addf %143, %145 : vector<8x32xf32>
    %147 = vector.broadcast %71 : f32 to vector<8x32xf32>
    %148 = arith.mulf %147, %119 : vector<8x32xf32>
    %149 = arith.addf %146, %148 : vector<8x32xf32>
    %150 = vector.broadcast %72 : f32 to vector<8x32xf32>
    %151 = arith.mulf %150, %138 : vector<8x32xf32>
    %152 = arith.addf %149, %151 : vector<8x32xf32>
    %153 = arith.truncf %152 : vector<8x32xf32> to vector<8x32xbf16>
    %cst_42 = arith.constant dense<0.000000e+00> : vector<8x4xf32>
    %154 = tpu.matmul %153, %27, %cst_42 {dimension_numbers = #tpu.dot_dimension_numbers<[1], [0], [0], [1], [0, 0, 1, 1], [], []>} : vector<8x32xbf16>, vector<32x4xbf16>, vector<8x4xf32> -> vector<8x4xf32>
    %155 = arith.addf %28, %154 : vector<8x4xf32>
    %156 = vector.broadcast %32 : f32 to vector<8x4xf32>
    %157 = arith.mulf %156, %23 : vector<8x4xf32>
    %158 = arith.addf %155, %157 : vector<8x4xf32>
    %c0_43 = arith.constant 0 : index
    %c4_44 = arith.constant 4 : index
    %159 = vector.load %arg4[%c0_43, %c4_44] : memref<8x32xf32, #tpu.memory_space<vmem>>, vector<8x4xf32>
    tpu.vector_store %arg4[%c0_43, %c4_44], %158 {strides = array<i32>} : memref<8x32xf32, #tpu.memory_space<vmem>>, vector<8x4xf32>,
    %c2_45 = arith.constant 2 : index
    %160 = memref.load %arg0[%c2_45] : memref<8xf32, #tpu.memory_space<smem>>
    %c1_46 = arith.constant 1 : index
    %161 = memref.load %arg0[%c1_46] : memref<8xf32, #tpu.memory_space<smem>>
    %162 = arith.subf %160, %161 : f32
    %c0_47 = arith.constant 0 : index
    %c1_48 = arith.constant 1 : index
    %163 = vector.load %arg2[%c0_47, %c1_48] : memref<8x8xf32, #tpu.memory_space<vmem>>, vector<8x1xf32>
    %164 = vector.broadcast %163 : vector<8x1xf32> to vector<8x32xf32>
    %165 = arith.mulf %164, %14 : vector<8x32xf32>
    %166 = arith.addf %165, %17 : vector<8x32xf32>
    %167 = vector.extract_strided_slice %158 {offsets = [0, 0], sizes = [8, 1], strides = [1, 1]} : vector<8x4xf32> to vector<8x1xf32>
    %168 = vector.broadcast %167 : vector<8x1xf32> to vector<8x32xf32>
    %169 = arith.mulf %168, %2 : vector<8x32xf32>
    %170 = arith.addf %166, %169 : vector<8x32xf32>
    %171 = vector.extract_strided_slice %158 {offsets = [0, 1], sizes = [8, 1], strides = [1, 1]} : vector<8x4xf32> to vector<8x1xf32>
    %172 = vector.broadcast %171 : vector<8x1xf32> to vector<8x32xf32>
    %173 = arith.mulf %172, %5 : vector<8x32xf32>
    %174 = arith.addf %170, %173 : vector<8x32xf32>
    %175 = vector.extract_strided_slice %158 {offsets = [0, 2], sizes = [8, 1], strides = [1, 1]} : vector<8x4xf32> to vector<8x1xf32>
    %176 = vector.broadcast %175 : vector<8x1xf32> to vector<8x32xf32>
    %177 = arith.mulf %176, %8 : vector<8x32xf32>
    %178 = arith.addf %174, %177 : vector<8x32xf32>
    %179 = vector.extract_strided_slice %158 {offsets = [0, 3], sizes = [8, 1], strides = [1, 1]} : vector<8x4xf32> to vector<8x1xf32>
    %180 = vector.broadcast %179 : vector<8x1xf32> to vector<8x32xf32>
    %181 = arith.mulf %180, %11 : vector<8x32xf32>
    %182 = arith.addf %178, %181 : vector<8x32xf32>
    %cst_49 = arith.constant 2.000000e-01 : f32
    %183 = arith.mulf %162, %cst_49 : f32
    %cst_50 = arith.constant 7.500000e-02 : f32
    %184 = arith.mulf %162, %cst_50 : f32
    %cst_51 = arith.constant 2.250000e-01 : f32
    %185 = arith.mulf %162, %cst_51 : f32
    %cst_52 = arith.constant 0.977777779 : f32
    %186 = arith.mulf %162, %cst_52 : f32
    %cst_53 = arith.constant -3.73333335 : f32
    %187 = arith.mulf %162, %cst_53 : f32
    %cst_54 = arith.constant 3.55555558 : f32
    %188 = arith.mulf %162, %cst_54 : f32
    %cst_55 = arith.constant 2.95259857 : f32
    %189 = arith.mulf %162, %cst_55 : f32
    %cst_56 = arith.constant -11.5957937 : f32
    %190 = arith.mulf %162, %cst_56 : f32
    %cst_57 = arith.constant 9.82289314 : f32
    %191 = arith.mulf %162, %cst_57 : f32
    %cst_58 = arith.constant -0.290809333 : f32
    %192 = arith.mulf %162, %cst_58 : f32
    %cst_59 = arith.constant 2.84627533 : f32
    %193 = arith.mulf %162, %cst_59 : f32
    %cst_60 = arith.constant -10.757576 : f32
    %194 = arith.mulf %162, %cst_60 : f32
    %cst_61 = arith.constant 8.90642261 : f32
    %195 = arith.mulf %162, %cst_61 : f32
    %cst_62 = arith.constant 0.278409094 : f32
    %196 = arith.mulf %162, %cst_62 : f32
    %cst_63 = arith.constant -0.273531318 : f32
    %197 = arith.mulf %162, %cst_63 : f32
    %cst_64 = arith.constant 0.0911458358 : f32
    %198 = arith.mulf %162, %cst_64 : f32
    %cst_65 = arith.constant 0.449236304 : f32
    %199 = arith.mulf %162, %cst_65 : f32
    %cst_66 = arith.constant 0.651041686 : f32
    %200 = arith.mulf %162, %cst_66 : f32
    %cst_67 = arith.constant -0.322376192 : f32
    %201 = arith.mulf %162, %cst_67 : f32
    %cst_68 = arith.constant 0.130952388 : f32
    %202 = arith.mulf %162, %cst_68 : f32
    %203 = math.tanh %182 : vector<8x32xf32>
    %204 = arith.truncf %203 : vector<8x32xf32> to vector<8x32xbf16>
    %cst_69 = arith.constant dense<0.000000e+00> : vector<8x32xf32>
    %205 = tpu.matmul %204, %25, %cst_69 {dimension_numbers = #tpu.dot_dimension_numbers<[1], [0], [0], [1], [0, 0, 1, 1], [], []>} : vector<8x32xbf16>, vector<32x32xbf16>, vector<8x32xf32> -> vector<8x32xf32>
    %206 = arith.addf %205, %20 : vector<8x32xf32>
    %207 = vector.broadcast %183 : f32 to vector<8x32xf32>
    %208 = arith.mulf %207, %206 : vector<8x32xf32>
    %209 = arith.addf %182, %208 : vector<8x32xf32>
    %210 = math.tanh %209 : vector<8x32xf32>
    %211 = arith.truncf %210 : vector<8x32xf32> to vector<8x32xbf16>
    %cst_70 = arith.constant dense<0.000000e+00> : vector<8x32xf32>
    %212 = tpu.matmul %211, %25, %cst_70 {dimension_numbers = #tpu.dot_dimension_numbers<[1], [0], [0], [1], [0, 0, 1, 1], [], []>} : vector<8x32xbf16>, vector<32x32xbf16>, vector<8x32xf32> -> vector<8x32xf32>
    %213 = arith.addf %212, %20 : vector<8x32xf32>
    %214 = vector.broadcast %184 : f32 to vector<8x32xf32>
    %215 = arith.mulf %214, %206 : vector<8x32xf32>
    %216 = arith.addf %182, %215 : vector<8x32xf32>
    %217 = vector.broadcast %185 : f32 to vector<8x32xf32>
    %218 = arith.mulf %217, %213 : vector<8x32xf32>
    %219 = arith.addf %216, %218 : vector<8x32xf32>
    %220 = math.tanh %219 : vector<8x32xf32>
    %221 = arith.truncf %220 : vector<8x32xf32> to vector<8x32xbf16>
    %cst_71 = arith.constant dense<0.000000e+00> : vector<8x32xf32>
    %222 = tpu.matmul %221, %25, %cst_71 {dimension_numbers = #tpu.dot_dimension_numbers<[1], [0], [0], [1], [0, 0, 1, 1], [], []>} : vector<8x32xbf16>, vector<32x32xbf16>, vector<8x32xf32> -> vector<8x32xf32>
    %223 = arith.addf %222, %20 : vector<8x32xf32>
    %224 = vector.broadcast %186 : f32 to vector<8x32xf32>
    %225 = arith.mulf %224, %206 : vector<8x32xf32>
    %226 = arith.addf %182, %225 : vector<8x32xf32>
    %227 = vector.broadcast %187 : f32 to vector<8x32xf32>
    %228 = arith.mulf %227, %213 : vector<8x32xf32>
    %229 = arith.addf %226, %228 : vector<8x32xf32>
    %230 = vector.broadcast %188 : f32 to vector<8x32xf32>
    %231 = arith.mulf %230, %223 : vector<8x32xf32>
    %232 = arith.addf %229, %231 : vector<8x32xf32>
    %233 = math.tanh %232 : vector<8x32xf32>
    %234 = arith.truncf %233 : vector<8x32xf32> to vector<8x32xbf16>
    %cst_72 = arith.constant dense<0.000000e+00> : vector<8x32xf32>
    %235 = tpu.matmul %234, %25, %cst_72 {dimension_numbers = #tpu.dot_dimension_numbers<[1], [0], [0], [1], [0, 0, 1, 1], [], []>} : vector<8x32xbf16>, vector<32x32xbf16>, vector<8x32xf32> -> vector<8x32xf32>
    %236 = arith.addf %235, %20 : vector<8x32xf32>
    %237 = vector.broadcast %189 : f32 to vector<8x32xf32>
    %238 = arith.mulf %237, %206 : vector<8x32xf32>
    %239 = arith.addf %182, %238 : vector<8x32xf32>
    %240 = vector.broadcast %190 : f32 to vector<8x32xf32>
    %241 = arith.mulf %240, %213 : vector<8x32xf32>
    %242 = arith.addf %239, %241 : vector<8x32xf32>
    %243 = vector.broadcast %191 : f32 to vector<8x32xf32>
    %244 = arith.mulf %243, %223 : vector<8x32xf32>
    %245 = arith.addf %242, %244 : vector<8x32xf32>
    %246 = vector.broadcast %192 : f32 to vector<8x32xf32>
    %247 = arith.mulf %246, %236 : vector<8x32xf32>
    %248 = arith.addf %245, %247 : vector<8x32xf32>
    %249 = math.tanh %248 : vector<8x32xf32>
    %250 = arith.truncf %249 : vector<8x32xf32> to vector<8x32xbf16>
    %cst_73 = arith.constant dense<0.000000e+00> : vector<8x32xf32>
    %251 = tpu.matmul %250, %25, %cst_73 {dimension_numbers = #tpu.dot_dimension_numbers<[1], [0], [0], [1], [0, 0, 1, 1], [], []>} : vector<8x32xbf16>, vector<32x32xbf16>, vector<8x32xf32> -> vector<8x32xf32>
    %252 = arith.addf %251, %20 : vector<8x32xf32>
    %253 = vector.broadcast %193 : f32 to vector<8x32xf32>
    %254 = arith.mulf %253, %206 : vector<8x32xf32>
    %255 = arith.addf %182, %254 : vector<8x32xf32>
    %256 = vector.broadcast %194 : f32 to vector<8x32xf32>
    %257 = arith.mulf %256, %213 : vector<8x32xf32>
    %258 = arith.addf %255, %257 : vector<8x32xf32>
    %259 = vector.broadcast %195 : f32 to vector<8x32xf32>
    %260 = arith.mulf %259, %223 : vector<8x32xf32>
    %261 = arith.addf %258, %260 : vector<8x32xf32>
    %262 = vector.broadcast %196 : f32 to vector<8x32xf32>
    %263 = arith.mulf %262, %236 : vector<8x32xf32>
    %264 = arith.addf %261, %263 : vector<8x32xf32>
    %265 = vector.broadcast %197 : f32 to vector<8x32xf32>
    %266 = arith.mulf %265, %252 : vector<8x32xf32>
    %267 = arith.addf %264, %266 : vector<8x32xf32>
    %268 = math.tanh %267 : vector<8x32xf32>
    %269 = vector.broadcast %198 : f32 to vector<8x32xf32>
    %270 = arith.mulf %269, %203 : vector<8x32xf32>
    %271 = vector.broadcast %199 : f32 to vector<8x32xf32>
    %272 = arith.mulf %271, %220 : vector<8x32xf32>
    %273 = arith.addf %270, %272 : vector<8x32xf32>
    %274 = vector.broadcast %200 : f32 to vector<8x32xf32>
    %275 = arith.mulf %274, %233 : vector<8x32xf32>
    %276 = arith.addf %273, %275 : vector<8x32xf32>
    %277 = vector.broadcast %201 : f32 to vector<8x32xf32>
    %278 = arith.mulf %277, %249 : vector<8x32xf32>
    %279 = arith.addf %276, %278 : vector<8x32xf32>
    %280 = vector.broadcast %202 : f32 to vector<8x32xf32>
    %281 = arith.mulf %280, %268 : vector<8x32xf32>
    %282 = arith.addf %279, %281 : vector<8x32xf32>
    %283 = arith.truncf %282 : vector<8x32xf32> to vector<8x32xbf16>
    %cst_74 = arith.constant dense<0.000000e+00> : vector<8x4xf32>
    %284 = tpu.matmul %283, %27, %cst_74 {dimension_numbers = #tpu.dot_dimension_numbers<[1], [0], [0], [1], [0, 0, 1, 1], [], []>} : vector<8x32xbf16>, vector<32x4xbf16>, vector<8x4xf32> -> vector<8x4xf32>
    %285 = arith.addf %158, %284 : vector<8x4xf32>
    %286 = vector.broadcast %162 : f32 to vector<8x4xf32>
    %287 = arith.mulf %286, %23 : vector<8x4xf32>
    %288 = arith.addf %285, %287 : vector<8x4xf32>
    %c0_75 = arith.constant 0 : index
    %c8_76 = arith.constant 8 : index
    %289 = vector.load %arg4[%c0_75, %c8_76] : memref<8x32xf32, #tpu.memory_space<vmem>>, vector<8x4xf32>
    tpu.vector_store %arg4[%c0_75, %c8_76], %288 {strides = array<i32>} : memref<8x32xf32, #tpu.memory_space<vmem>>, vector<8x4xf32>,
    %c3_77 = arith.constant 3 : index
    %290 = memref.load %arg0[%c3_77] : memref<8xf32, #tpu.memory_space<smem>>
    %c2_78 = arith.constant 2 : index
    %291 = memref.load %arg0[%c2_78] : memref<8xf32, #tpu.memory_space<smem>>
    %292 = arith.subf %290, %291 : f32
    %c0_79 = arith.constant 0 : index
    %c2_80 = arith.constant 2 : index
    %293 = vector.load %arg2[%c0_79, %c2_80] : memref<8x8xf32, #tpu.memory_space<vmem>>, vector<8x1xf32>
    %294 = vector.broadcast %293 : vector<8x1xf32> to vector<8x32xf32>
    %295 = arith.mulf %294, %14 : vector<8x32xf32>
    %296 = arith.addf %295, %17 : vector<8x32xf32>
    %297 = vector.extract_strided_slice %288 {offsets = [0, 0], sizes = [8, 1], strides = [1, 1]} : vector<8x4xf32> to vector<8x1xf32>
    %298 = vector.broadcast %297 : vector<8x1xf32> to vector<8x32xf32>
    %299 = arith.mulf %298, %2 : vector<8x32xf32>
    %300 = arith.addf %296, %299 : vector<8x32xf32>
    %301 = vector.extract_strided_slice %288 {offsets = [0, 1], sizes = [8, 1], strides = [1, 1]} : vector<8x4xf32> to vector<8x1xf32>
    %302 = vector.broadcast %301 : vector<8x1xf32> to vector<8x32xf32>
    %303 = arith.mulf %302, %5 : vector<8x32xf32>
    %304 = arith.addf %300, %303 : vector<8x32xf32>
    %305 = vector.extract_strided_slice %288 {offsets = [0, 2], sizes = [8, 1], strides = [1, 1]} : vector<8x4xf32> to vector<8x1xf32>
    %306 = vector.broadcast %305 : vector<8x1xf32> to vector<8x32xf32>
    %307 = arith.mulf %306, %8 : vector<8x32xf32>
    %308 = arith.addf %304, %307 : vector<8x32xf32>
    %309 = vector.extract_strided_slice %288 {offsets = [0, 3], sizes = [8, 1], strides = [1, 1]} : vector<8x4xf32> to vector<8x1xf32>
    %310 = vector.broadcast %309 : vector<8x1xf32> to vector<8x32xf32>
    %311 = arith.mulf %310, %11 : vector<8x32xf32>
    %312 = arith.addf %308, %311 : vector<8x32xf32>
    %cst_81 = arith.constant 2.000000e-01 : f32
    %313 = arith.mulf %292, %cst_81 : f32
    %cst_82 = arith.constant 7.500000e-02 : f32
    %314 = arith.mulf %292, %cst_82 : f32
    %cst_83 = arith.constant 2.250000e-01 : f32
    %315 = arith.mulf %292, %cst_83 : f32
    %cst_84 = arith.constant 0.977777779 : f32
    %316 = arith.mulf %292, %cst_84 : f32
    %cst_85 = arith.constant -3.73333335 : f32
    %317 = arith.mulf %292, %cst_85 : f32
    %cst_86 = arith.constant 3.55555558 : f32
    %318 = arith.mulf %292, %cst_86 : f32
    %cst_87 = arith.constant 2.95259857 : f32
    %319 = arith.mulf %292, %cst_87 : f32
    %cst_88 = arith.constant -11.5957937 : f32
    %320 = arith.mulf %292, %cst_88 : f32
    %cst_89 = arith.constant 9.82289314 : f32
    %321 = arith.mulf %292, %cst_89 : f32
    %cst_90 = arith.constant -0.290809333 : f32
    %322 = arith.mulf %292, %cst_90 : f32
    %cst_91 = arith.constant 2.84627533 : f32
    %323 = arith.mulf %292, %cst_91 : f32
    %cst_92 = arith.constant -10.757576 : f32
    %324 = arith.mulf %292, %cst_92 : f32
    %cst_93 = arith.constant 8.90642261 : f32
    %325 = arith.mulf %292, %cst_93 : f32
    %cst_94 = arith.constant 0.278409094 : f32
    %326 = arith.mulf %292, %cst_94 : f32
    %cst_95 = arith.constant -0.273531318 : f32
    %327 = arith.mulf %292, %cst_95 : f32
    %cst_96 = arith.constant 0.0911458358 : f32
    %328 = arith.mulf %292, %cst_96 : f32
    %cst_97 = arith.constant 0.449236304 : f32
    %329 = arith.mulf %292, %cst_97 : f32
    %cst_98 = arith.constant 0.651041686 : f32
    %330 = arith.mulf %292, %cst_98 : f32
    %cst_99 = arith.constant -0.322376192 : f32
    %331 = arith.mulf %292, %cst_99 : f32
    %cst_100 = arith.constant 0.130952388 : f32
    %332 = arith.mulf %292, %cst_100 : f32
    %333 = math.tanh %312 : vector<8x32xf32>
    %334 = arith.truncf %333 : vector<8x32xf32> to vector<8x32xbf16>
    %cst_101 = arith.constant dense<0.000000e+00> : vector<8x32xf32>
    %335 = tpu.matmul %334, %25, %cst_101 {dimension_numbers = #tpu.dot_dimension_numbers<[1], [0], [0], [1], [0, 0, 1, 1], [], []>} : vector<8x32xbf16>, vector<32x32xbf16>, vector<8x32xf32> -> vector<8x32xf32>
    %336 = arith.addf %335, %20 : vector<8x32xf32>
    %337 = vector.broadcast %313 : f32 to vector<8x32xf32>
    %338 = arith.mulf %337, %336 : vector<8x32xf32>
    %339 = arith.addf %312, %338 : vector<8x32xf32>
    %340 = math.tanh %339 : vector<8x32xf32>
    %341 = arith.truncf %340 : vector<8x32xf32> to vector<8x32xbf16>
    %cst_102 = arith.constant dense<0.000000e+00> : vector<8x32xf32>
    %342 = tpu.matmul %341, %25, %cst_102 {dimension_numbers = #tpu.dot_dimension_numbers<[1], [0], [0], [1], [0, 0, 1, 1], [], []>} : vector<8x32xbf16>, vector<32x32xbf16>, vector<8x32xf32> -> vector<8x32xf32>
    %343 = arith.addf %342, %20 : vector<8x32xf32>
    %344 = vector.broadcast %314 : f32 to vector<8x32xf32>
    %345 = arith.mulf %344, %336 : vector<8x32xf32>
    %346 = arith.addf %312, %345 : vector<8x32xf32>
    %347 = vector.broadcast %315 : f32 to vector<8x32xf32>
    %348 = arith.mulf %347, %343 : vector<8x32xf32>
    %349 = arith.addf %346, %348 : vector<8x32xf32>
    %350 = math.tanh %349 : vector<8x32xf32>
    %351 = arith.truncf %350 : vector<8x32xf32> to vector<8x32xbf16>
    %cst_103 = arith.constant dense<0.000000e+00> : vector<8x32xf32>
    %352 = tpu.matmul %351, %25, %cst_103 {dimension_numbers = #tpu.dot_dimension_numbers<[1], [0], [0], [1], [0, 0, 1, 1], [], []>} : vector<8x32xbf16>, vector<32x32xbf16>, vector<8x32xf32> -> vector<8x32xf32>
    %353 = arith.addf %352, %20 : vector<8x32xf32>
    %354 = vector.broadcast %316 : f32 to vector<8x32xf32>
    %355 = arith.mulf %354, %336 : vector<8x32xf32>
    %356 = arith.addf %312, %355 : vector<8x32xf32>
    %357 = vector.broadcast %317 : f32 to vector<8x32xf32>
    %358 = arith.mulf %357, %343 : vector<8x32xf32>
    %359 = arith.addf %356, %358 : vector<8x32xf32>
    %360 = vector.broadcast %318 : f32 to vector<8x32xf32>
    %361 = arith.mulf %360, %353 : vector<8x32xf32>
    %362 = arith.addf %359, %361 : vector<8x32xf32>
    %363 = math.tanh %362 : vector<8x32xf32>
    %364 = arith.truncf %363 : vector<8x32xf32> to vector<8x32xbf16>
    %cst_104 = arith.constant dense<0.000000e+00> : vector<8x32xf32>
    %365 = tpu.matmul %364, %25, %cst_104 {dimension_numbers = #tpu.dot_dimension_numbers<[1], [0], [0], [1], [0, 0, 1, 1], [], []>} : vector<8x32xbf16>, vector<32x32xbf16>, vector<8x32xf32> -> vector<8x32xf32>
    %366 = arith.addf %365, %20 : vector<8x32xf32>
    %367 = vector.broadcast %319 : f32 to vector<8x32xf32>
    %368 = arith.mulf %367, %336 : vector<8x32xf32>
    %369 = arith.addf %312, %368 : vector<8x32xf32>
    %370 = vector.broadcast %320 : f32 to vector<8x32xf32>
    %371 = arith.mulf %370, %343 : vector<8x32xf32>
    %372 = arith.addf %369, %371 : vector<8x32xf32>
    %373 = vector.broadcast %321 : f32 to vector<8x32xf32>
    %374 = arith.mulf %373, %353 : vector<8x32xf32>
    %375 = arith.addf %372, %374 : vector<8x32xf32>
    %376 = vector.broadcast %322 : f32 to vector<8x32xf32>
    %377 = arith.mulf %376, %366 : vector<8x32xf32>
    %378 = arith.addf %375, %377 : vector<8x32xf32>
    %379 = math.tanh %378 : vector<8x32xf32>
    %380 = arith.truncf %379 : vector<8x32xf32> to vector<8x32xbf16>
    %cst_105 = arith.constant dense<0.000000e+00> : vector<8x32xf32>
    %381 = tpu.matmul %380, %25, %cst_105 {dimension_numbers = #tpu.dot_dimension_numbers<[1], [0], [0], [1], [0, 0, 1, 1], [], []>} : vector<8x32xbf16>, vector<32x32xbf16>, vector<8x32xf32> -> vector<8x32xf32>
    %382 = arith.addf %381, %20 : vector<8x32xf32>
    %383 = vector.broadcast %323 : f32 to vector<8x32xf32>
    %384 = arith.mulf %383, %336 : vector<8x32xf32>
    %385 = arith.addf %312, %384 : vector<8x32xf32>
    %386 = vector.broadcast %324 : f32 to vector<8x32xf32>
    %387 = arith.mulf %386, %343 : vector<8x32xf32>
    %388 = arith.addf %385, %387 : vector<8x32xf32>
    %389 = vector.broadcast %325 : f32 to vector<8x32xf32>
    %390 = arith.mulf %389, %353 : vector<8x32xf32>
    %391 = arith.addf %388, %390 : vector<8x32xf32>
    %392 = vector.broadcast %326 : f32 to vector<8x32xf32>
    %393 = arith.mulf %392, %366 : vector<8x32xf32>
    %394 = arith.addf %391, %393 : vector<8x32xf32>
    %395 = vector.broadcast %327 : f32 to vector<8x32xf32>
    %396 = arith.mulf %395, %382 : vector<8x32xf32>
    %397 = arith.addf %394, %396 : vector<8x32xf32>
    %398 = math.tanh %397 : vector<8x32xf32>
    %399 = vector.broadcast %328 : f32 to vector<8x32xf32>
    %400 = arith.mulf %399, %333 : vector<8x32xf32>
    %401 = vector.broadcast %329 : f32 to vector<8x32xf32>
    %402 = arith.mulf %401, %350 : vector<8x32xf32>
    %403 = arith.addf %400, %402 : vector<8x32xf32>
    %404 = vector.broadcast %330 : f32 to vector<8x32xf32>
    %405 = arith.mulf %404, %363 : vector<8x32xf32>
    %406 = arith.addf %403, %405 : vector<8x32xf32>
    %407 = vector.broadcast %331 : f32 to vector<8x32xf32>
    %408 = arith.mulf %407, %379 : vector<8x32xf32>
    %409 = arith.addf %406, %408 : vector<8x32xf32>
    %410 = vector.broadcast %332 : f32 to vector<8x32xf32>
    %411 = arith.mulf %410, %398 : vector<8x32xf32>
    %412 = arith.addf %409, %411 : vector<8x32xf32>
    %413 = arith.truncf %412 : vector<8x32xf32> to vector<8x32xbf16>
    %cst_106 = arith.constant dense<0.000000e+00> : vector<8x4xf32>
    %414 = tpu.matmul %413, %27, %cst_106 {dimension_numbers = #tpu.dot_dimension_numbers<[1], [0], [0], [1], [0, 0, 1, 1], [], []>} : vector<8x32xbf16>, vector<32x4xbf16>, vector<8x4xf32> -> vector<8x4xf32>
    %415 = arith.addf %288, %414 : vector<8x4xf32>
    %416 = vector.broadcast %292 : f32 to vector<8x4xf32>
    %417 = arith.mulf %416, %23 : vector<8x4xf32>
    %418 = arith.addf %415, %417 : vector<8x4xf32>
    %c0_107 = arith.constant 0 : index
    %c12 = arith.constant 12 : index
    %419 = vector.load %arg4[%c0_107, %c12] : memref<8x32xf32, #tpu.memory_space<vmem>>, vector<8x4xf32>
    tpu.vector_store %arg4[%c0_107, %c12], %418 {strides = array<i32>} : memref<8x32xf32, #tpu.memory_space<vmem>>, vector<8x4xf32>,
    %c4_108 = arith.constant 4 : index
    %420 = memref.load %arg0[%c4_108] : memref<8xf32, #tpu.memory_space<smem>>
    %c3_109 = arith.constant 3 : index
    %421 = memref.load %arg0[%c3_109] : memref<8xf32, #tpu.memory_space<smem>>
    %422 = arith.subf %420, %421 : f32
    %c0_110 = arith.constant 0 : index
    %c3_111 = arith.constant 3 : index
    %423 = vector.load %arg2[%c0_110, %c3_111] : memref<8x8xf32, #tpu.memory_space<vmem>>, vector<8x1xf32>
    %424 = vector.broadcast %423 : vector<8x1xf32> to vector<8x32xf32>
    %425 = arith.mulf %424, %14 : vector<8x32xf32>
    %426 = arith.addf %425, %17 : vector<8x32xf32>
    %427 = vector.extract_strided_slice %418 {offsets = [0, 0], sizes = [8, 1], strides = [1, 1]} : vector<8x4xf32> to vector<8x1xf32>
    %428 = vector.broadcast %427 : vector<8x1xf32> to vector<8x32xf32>
    %429 = arith.mulf %428, %2 : vector<8x32xf32>
    %430 = arith.addf %426, %429 : vector<8x32xf32>
    %431 = vector.extract_strided_slice %418 {offsets = [0, 1], sizes = [8, 1], strides = [1, 1]} : vector<8x4xf32> to vector<8x1xf32>
    %432 = vector.broadcast %431 : vector<8x1xf32> to vector<8x32xf32>
    %433 = arith.mulf %432, %5 : vector<8x32xf32>
    %434 = arith.addf %430, %433 : vector<8x32xf32>
    %435 = vector.extract_strided_slice %418 {offsets = [0, 2], sizes = [8, 1], strides = [1, 1]} : vector<8x4xf32> to vector<8x1xf32>
    %436 = vector.broadcast %435 : vector<8x1xf32> to vector<8x32xf32>
    %437 = arith.mulf %436, %8 : vector<8x32xf32>
    %438 = arith.addf %434, %437 : vector<8x32xf32>
    %439 = vector.extract_strided_slice %418 {offsets = [0, 3], sizes = [8, 1], strides = [1, 1]} : vector<8x4xf32> to vector<8x1xf32>
    %440 = vector.broadcast %439 : vector<8x1xf32> to vector<8x32xf32>
    %441 = arith.mulf %440, %11 : vector<8x32xf32>
    %442 = arith.addf %438, %441 : vector<8x32xf32>
    %cst_112 = arith.constant 2.000000e-01 : f32
    %443 = arith.mulf %422, %cst_112 : f32
    %cst_113 = arith.constant 7.500000e-02 : f32
    %444 = arith.mulf %422, %cst_113 : f32
    %cst_114 = arith.constant 2.250000e-01 : f32
    %445 = arith.mulf %422, %cst_114 : f32
    %cst_115 = arith.constant 0.977777779 : f32
    %446 = arith.mulf %422, %cst_115 : f32
    %cst_116 = arith.constant -3.73333335 : f32
    %447 = arith.mulf %422, %cst_116 : f32
    %cst_117 = arith.constant 3.55555558 : f32
    %448 = arith.mulf %422, %cst_117 : f32
    %cst_118 = arith.constant 2.95259857 : f32
    %449 = arith.mulf %422, %cst_118 : f32
    %cst_119 = arith.constant -11.5957937 : f32
    %450 = arith.mulf %422, %cst_119 : f32
    %cst_120 = arith.constant 9.82289314 : f32
    %451 = arith.mulf %422, %cst_120 : f32
    %cst_121 = arith.constant -0.290809333 : f32
    %452 = arith.mulf %422, %cst_121 : f32
    %cst_122 = arith.constant 2.84627533 : f32
    %453 = arith.mulf %422, %cst_122 : f32
    %cst_123 = arith.constant -10.757576 : f32
    %454 = arith.mulf %422, %cst_123 : f32
    %cst_124 = arith.constant 8.90642261 : f32
    %455 = arith.mulf %422, %cst_124 : f32
    %cst_125 = arith.constant 0.278409094 : f32
    %456 = arith.mulf %422, %cst_125 : f32
    %cst_126 = arith.constant -0.273531318 : f32
    %457 = arith.mulf %422, %cst_126 : f32
    %cst_127 = arith.constant 0.0911458358 : f32
    %458 = arith.mulf %422, %cst_127 : f32
    %cst_128 = arith.constant 0.449236304 : f32
    %459 = arith.mulf %422, %cst_128 : f32
    %cst_129 = arith.constant 0.651041686 : f32
    %460 = arith.mulf %422, %cst_129 : f32
    %cst_130 = arith.constant -0.322376192 : f32
    %461 = arith.mulf %422, %cst_130 : f32
    %cst_131 = arith.constant 0.130952388 : f32
    %462 = arith.mulf %422, %cst_131 : f32
    %463 = math.tanh %442 : vector<8x32xf32>
    %464 = arith.truncf %463 : vector<8x32xf32> to vector<8x32xbf16>
    %cst_132 = arith.constant dense<0.000000e+00> : vector<8x32xf32>
    %465 = tpu.matmul %464, %25, %cst_132 {dimension_numbers = #tpu.dot_dimension_numbers<[1], [0], [0], [1], [0, 0, 1, 1], [], []>} : vector<8x32xbf16>, vector<32x32xbf16>, vector<8x32xf32> -> vector<8x32xf32>
    %466 = arith.addf %465, %20 : vector<8x32xf32>
    %467 = vector.broadcast %443 : f32 to vector<8x32xf32>
    %468 = arith.mulf %467, %466 : vector<8x32xf32>
    %469 = arith.addf %442, %468 : vector<8x32xf32>
    %470 = math.tanh %469 : vector<8x32xf32>
    %471 = arith.truncf %470 : vector<8x32xf32> to vector<8x32xbf16>
    %cst_133 = arith.constant dense<0.000000e+00> : vector<8x32xf32>
    %472 = tpu.matmul %471, %25, %cst_133 {dimension_numbers = #tpu.dot_dimension_numbers<[1], [0], [0], [1], [0, 0, 1, 1], [], []>} : vector<8x32xbf16>, vector<32x32xbf16>, vector<8x32xf32> -> vector<8x32xf32>
    %473 = arith.addf %472, %20 : vector<8x32xf32>
    %474 = vector.broadcast %444 : f32 to vector<8x32xf32>
    %475 = arith.mulf %474, %466 : vector<8x32xf32>
    %476 = arith.addf %442, %475 : vector<8x32xf32>
    %477 = vector.broadcast %445 : f32 to vector<8x32xf32>
    %478 = arith.mulf %477, %473 : vector<8x32xf32>
    %479 = arith.addf %476, %478 : vector<8x32xf32>
    %480 = math.tanh %479 : vector<8x32xf32>
    %481 = arith.truncf %480 : vector<8x32xf32> to vector<8x32xbf16>
    %cst_134 = arith.constant dense<0.000000e+00> : vector<8x32xf32>
    %482 = tpu.matmul %481, %25, %cst_134 {dimension_numbers = #tpu.dot_dimension_numbers<[1], [0], [0], [1], [0, 0, 1, 1], [], []>} : vector<8x32xbf16>, vector<32x32xbf16>, vector<8x32xf32> -> vector<8x32xf32>
    %483 = arith.addf %482, %20 : vector<8x32xf32>
    %484 = vector.broadcast %446 : f32 to vector<8x32xf32>
    %485 = arith.mulf %484, %466 : vector<8x32xf32>
    %486 = arith.addf %442, %485 : vector<8x32xf32>
    %487 = vector.broadcast %447 : f32 to vector<8x32xf32>
    %488 = arith.mulf %487, %473 : vector<8x32xf32>
    %489 = arith.addf %486, %488 : vector<8x32xf32>
    %490 = vector.broadcast %448 : f32 to vector<8x32xf32>
    %491 = arith.mulf %490, %483 : vector<8x32xf32>
    %492 = arith.addf %489, %491 : vector<8x32xf32>
    %493 = math.tanh %492 : vector<8x32xf32>
    %494 = arith.truncf %493 : vector<8x32xf32> to vector<8x32xbf16>
    %cst_135 = arith.constant dense<0.000000e+00> : vector<8x32xf32>
    %495 = tpu.matmul %494, %25, %cst_135 {dimension_numbers = #tpu.dot_dimension_numbers<[1], [0], [0], [1], [0, 0, 1, 1], [], []>} : vector<8x32xbf16>, vector<32x32xbf16>, vector<8x32xf32> -> vector<8x32xf32>
    %496 = arith.addf %495, %20 : vector<8x32xf32>
    %497 = vector.broadcast %449 : f32 to vector<8x32xf32>
    %498 = arith.mulf %497, %466 : vector<8x32xf32>
    %499 = arith.addf %442, %498 : vector<8x32xf32>
    %500 = vector.broadcast %450 : f32 to vector<8x32xf32>
    %501 = arith.mulf %500, %473 : vector<8x32xf32>
    %502 = arith.addf %499, %501 : vector<8x32xf32>
    %503 = vector.broadcast %451 : f32 to vector<8x32xf32>
    %504 = arith.mulf %503, %483 : vector<8x32xf32>
    %505 = arith.addf %502, %504 : vector<8x32xf32>
    %506 = vector.broadcast %452 : f32 to vector<8x32xf32>
    %507 = arith.mulf %506, %496 : vector<8x32xf32>
    %508 = arith.addf %505, %507 : vector<8x32xf32>
    %509 = math.tanh %508 : vector<8x32xf32>
    %510 = arith.truncf %509 : vector<8x32xf32> to vector<8x32xbf16>
    %cst_136 = arith.constant dense<0.000000e+00> : vector<8x32xf32>
    %511 = tpu.matmul %510, %25, %cst_136 {dimension_numbers = #tpu.dot_dimension_numbers<[1], [0], [0], [1], [0, 0, 1, 1], [], []>} : vector<8x32xbf16>, vector<32x32xbf16>, vector<8x32xf32> -> vector<8x32xf32>
    %512 = arith.addf %511, %20 : vector<8x32xf32>
    %513 = vector.broadcast %453 : f32 to vector<8x32xf32>
    %514 = arith.mulf %513, %466 : vector<8x32xf32>
    %515 = arith.addf %442, %514 : vector<8x32xf32>
    %516 = vector.broadcast %454 : f32 to vector<8x32xf32>
    %517 = arith.mulf %516, %473 : vector<8x32xf32>
    %518 = arith.addf %515, %517 : vector<8x32xf32>
    %519 = vector.broadcast %455 : f32 to vector<8x32xf32>
    %520 = arith.mulf %519, %483 : vector<8x32xf32>
    %521 = arith.addf %518, %520 : vector<8x32xf32>
    %522 = vector.broadcast %456 : f32 to vector<8x32xf32>
    %523 = arith.mulf %522, %496 : vector<8x32xf32>
    %524 = arith.addf %521, %523 : vector<8x32xf32>
    %525 = vector.broadcast %457 : f32 to vector<8x32xf32>
    %526 = arith.mulf %525, %512 : vector<8x32xf32>
    %527 = arith.addf %524, %526 : vector<8x32xf32>
    %528 = math.tanh %527 : vector<8x32xf32>
    %529 = vector.broadcast %458 : f32 to vector<8x32xf32>
    %530 = arith.mulf %529, %463 : vector<8x32xf32>
    %531 = vector.broadcast %459 : f32 to vector<8x32xf32>
    %532 = arith.mulf %531, %480 : vector<8x32xf32>
    %533 = arith.addf %530, %532 : vector<8x32xf32>
    %534 = vector.broadcast %460 : f32 to vector<8x32xf32>
    %535 = arith.mulf %534, %493 : vector<8x32xf32>
    %536 = arith.addf %533, %535 : vector<8x32xf32>
    %537 = vector.broadcast %461 : f32 to vector<8x32xf32>
    %538 = arith.mulf %537, %509 : vector<8x32xf32>
    %539 = arith.addf %536, %538 : vector<8x32xf32>
    %540 = vector.broadcast %462 : f32 to vector<8x32xf32>
    %541 = arith.mulf %540, %528 : vector<8x32xf32>
    %542 = arith.addf %539, %541 : vector<8x32xf32>
    %543 = arith.truncf %542 : vector<8x32xf32> to vector<8x32xbf16>
    %cst_137 = arith.constant dense<0.000000e+00> : vector<8x4xf32>
    %544 = tpu.matmul %543, %27, %cst_137 {dimension_numbers = #tpu.dot_dimension_numbers<[1], [0], [0], [1], [0, 0, 1, 1], [], []>} : vector<8x32xbf16>, vector<32x4xbf16>, vector<8x4xf32> -> vector<8x4xf32>
    %545 = arith.addf %418, %544 : vector<8x4xf32>
    %546 = vector.broadcast %422 : f32 to vector<8x4xf32>
    %547 = arith.mulf %546, %23 : vector<8x4xf32>
    %548 = arith.addf %545, %547 : vector<8x4xf32>
    %c0_138 = arith.constant 0 : index
    %c16 = arith.constant 16 : index
    %549 = vector.load %arg4[%c0_138, %c16] : memref<8x32xf32, #tpu.memory_space<vmem>>, vector<8x4xf32>
    tpu.vector_store %arg4[%c0_138, %c16], %548 {strides = array<i32>} : memref<8x32xf32, #tpu.memory_space<vmem>>, vector<8x4xf32>,
    %c5_139 = arith.constant 5 : index
    %550 = memref.load %arg0[%c5_139] : memref<8xf32, #tpu.memory_space<smem>>
    %c4_140 = arith.constant 4 : index
    %551 = memref.load %arg0[%c4_140] : memref<8xf32, #tpu.memory_space<smem>>
    %552 = arith.subf %550, %551 : f32
    %c0_141 = arith.constant 0 : index
    %c4_142 = arith.constant 4 : index
    %553 = vector.load %arg2[%c0_141, %c4_142] : memref<8x8xf32, #tpu.memory_space<vmem>>, vector<8x1xf32>
    %554 = vector.broadcast %553 : vector<8x1xf32> to vector<8x32xf32>
    %555 = arith.mulf %554, %14 : vector<8x32xf32>
    %556 = arith.addf %555, %17 : vector<8x32xf32>
    %557 = vector.extract_strided_slice %548 {offsets = [0, 0], sizes = [8, 1], strides = [1, 1]} : vector<8x4xf32> to vector<8x1xf32>
    %558 = vector.broadcast %557 : vector<8x1xf32> to vector<8x32xf32>
    %559 = arith.mulf %558, %2 : vector<8x32xf32>
    %560 = arith.addf %556, %559 : vector<8x32xf32>
    %561 = vector.extract_strided_slice %548 {offsets = [0, 1], sizes = [8, 1], strides = [1, 1]} : vector<8x4xf32> to vector<8x1xf32>
    %562 = vector.broadcast %561 : vector<8x1xf32> to vector<8x32xf32>
    %563 = arith.mulf %562, %5 : vector<8x32xf32>
    %564 = arith.addf %560, %563 : vector<8x32xf32>
    %565 = vector.extract_strided_slice %548 {offsets = [0, 2], sizes = [8, 1], strides = [1, 1]} : vector<8x4xf32> to vector<8x1xf32>
    %566 = vector.broadcast %565 : vector<8x1xf32> to vector<8x32xf32>
    %567 = arith.mulf %566, %8 : vector<8x32xf32>
    %568 = arith.addf %564, %567 : vector<8x32xf32>
    %569 = vector.extract_strided_slice %548 {offsets = [0, 3], sizes = [8, 1], strides = [1, 1]} : vector<8x4xf32> to vector<8x1xf32>
    %570 = vector.broadcast %569 : vector<8x1xf32> to vector<8x32xf32>
    %571 = arith.mulf %570, %11 : vector<8x32xf32>
    %572 = arith.addf %568, %571 : vector<8x32xf32>
    %cst_143 = arith.constant 2.000000e-01 : f32
    %573 = arith.mulf %552, %cst_143 : f32
    %cst_144 = arith.constant 7.500000e-02 : f32
    %574 = arith.mulf %552, %cst_144 : f32
    %cst_145 = arith.constant 2.250000e-01 : f32
    %575 = arith.mulf %552, %cst_145 : f32
    %cst_146 = arith.constant 0.977777779 : f32
    %576 = arith.mulf %552, %cst_146 : f32
    %cst_147 = arith.constant -3.73333335 : f32
    %577 = arith.mulf %552, %cst_147 : f32
    %cst_148 = arith.constant 3.55555558 : f32
    %578 = arith.mulf %552, %cst_148 : f32
    %cst_149 = arith.constant 2.95259857 : f32
    %579 = arith.mulf %552, %cst_149 : f32
    %cst_150 = arith.constant -11.5957937 : f32
    %580 = arith.mulf %552, %cst_150 : f32
    %cst_151 = arith.constant 9.82289314 : f32
    %581 = arith.mulf %552, %cst_151 : f32
    %cst_152 = arith.constant -0.290809333 : f32
    %582 = arith.mulf %552, %cst_152 : f32
    %cst_153 = arith.constant 2.84627533 : f32
    %583 = arith.mulf %552, %cst_153 : f32
    %cst_154 = arith.constant -10.757576 : f32
    %584 = arith.mulf %552, %cst_154 : f32
    %cst_155 = arith.constant 8.90642261 : f32
    %585 = arith.mulf %552, %cst_155 : f32
    %cst_156 = arith.constant 0.278409094 : f32
    %586 = arith.mulf %552, %cst_156 : f32
    %cst_157 = arith.constant -0.273531318 : f32
    %587 = arith.mulf %552, %cst_157 : f32
    %cst_158 = arith.constant 0.0911458358 : f32
    %588 = arith.mulf %552, %cst_158 : f32
    %cst_159 = arith.constant 0.449236304 : f32
    %589 = arith.mulf %552, %cst_159 : f32
    %cst_160 = arith.constant 0.651041686 : f32
    %590 = arith.mulf %552, %cst_160 : f32
    %cst_161 = arith.constant -0.322376192 : f32
    %591 = arith.mulf %552, %cst_161 : f32
    %cst_162 = arith.constant 0.130952388 : f32
    %592 = arith.mulf %552, %cst_162 : f32
    %593 = math.tanh %572 : vector<8x32xf32>
    %594 = arith.truncf %593 : vector<8x32xf32> to vector<8x32xbf16>
    %cst_163 = arith.constant dense<0.000000e+00> : vector<8x32xf32>
    %595 = tpu.matmul %594, %25, %cst_163 {dimension_numbers = #tpu.dot_dimension_numbers<[1], [0], [0], [1], [0, 0, 1, 1], [], []>} : vector<8x32xbf16>, vector<32x32xbf16>, vector<8x32xf32> -> vector<8x32xf32>
    %596 = arith.addf %595, %20 : vector<8x32xf32>
    %597 = vector.broadcast %573 : f32 to vector<8x32xf32>
    %598 = arith.mulf %597, %596 : vector<8x32xf32>
    %599 = arith.addf %572, %598 : vector<8x32xf32>
    %600 = math.tanh %599 : vector<8x32xf32>
    %601 = arith.truncf %600 : vector<8x32xf32> to vector<8x32xbf16>
    %cst_164 = arith.constant dense<0.000000e+00> : vector<8x32xf32>
    %602 = tpu.matmul %601, %25, %cst_164 {dimension_numbers = #tpu.dot_dimension_numbers<[1], [0], [0], [1], [0, 0, 1, 1], [], []>} : vector<8x32xbf16>, vector<32x32xbf16>, vector<8x32xf32> -> vector<8x32xf32>
    %603 = arith.addf %602, %20 : vector<8x32xf32>
    %604 = vector.broadcast %574 : f32 to vector<8x32xf32>
    %605 = arith.mulf %604, %596 : vector<8x32xf32>
    %606 = arith.addf %572, %605 : vector<8x32xf32>
    %607 = vector.broadcast %575 : f32 to vector<8x32xf32>
    %608 = arith.mulf %607, %603 : vector<8x32xf32>
    %609 = arith.addf %606, %608 : vector<8x32xf32>
    %610 = math.tanh %609 : vector<8x32xf32>
    %611 = arith.truncf %610 : vector<8x32xf32> to vector<8x32xbf16>
    %cst_165 = arith.constant dense<0.000000e+00> : vector<8x32xf32>
    %612 = tpu.matmul %611, %25, %cst_165 {dimension_numbers = #tpu.dot_dimension_numbers<[1], [0], [0], [1], [0, 0, 1, 1], [], []>} : vector<8x32xbf16>, vector<32x32xbf16>, vector<8x32xf32> -> vector<8x32xf32>
    %613 = arith.addf %612, %20 : vector<8x32xf32>
    %614 = vector.broadcast %576 : f32 to vector<8x32xf32>
    %615 = arith.mulf %614, %596 : vector<8x32xf32>
    %616 = arith.addf %572, %615 : vector<8x32xf32>
    %617 = vector.broadcast %577 : f32 to vector<8x32xf32>
    %618 = arith.mulf %617, %603 : vector<8x32xf32>
    %619 = arith.addf %616, %618 : vector<8x32xf32>
    %620 = vector.broadcast %578 : f32 to vector<8x32xf32>
    %621 = arith.mulf %620, %613 : vector<8x32xf32>
    %622 = arith.addf %619, %621 : vector<8x32xf32>
    %623 = math.tanh %622 : vector<8x32xf32>
    %624 = arith.truncf %623 : vector<8x32xf32> to vector<8x32xbf16>
    %cst_166 = arith.constant dense<0.000000e+00> : vector<8x32xf32>
    %625 = tpu.matmul %624, %25, %cst_166 {dimension_numbers = #tpu.dot_dimension_numbers<[1], [0], [0], [1], [0, 0, 1, 1], [], []>} : vector<8x32xbf16>, vector<32x32xbf16>, vector<8x32xf32> -> vector<8x32xf32>
    %626 = arith.addf %625, %20 : vector<8x32xf32>
    %627 = vector.broadcast %579 : f32 to vector<8x32xf32>
    %628 = arith.mulf %627, %596 : vector<8x32xf32>
    %629 = arith.addf %572, %628 : vector<8x32xf32>
    %630 = vector.broadcast %580 : f32 to vector<8x32xf32>
    %631 = arith.mulf %630, %603 : vector<8x32xf32>
    %632 = arith.addf %629, %631 : vector<8x32xf32>
    %633 = vector.broadcast %581 : f32 to vector<8x32xf32>
    %634 = arith.mulf %633, %613 : vector<8x32xf32>
    %635 = arith.addf %632, %634 : vector<8x32xf32>
    %636 = vector.broadcast %582 : f32 to vector<8x32xf32>
    %637 = arith.mulf %636, %626 : vector<8x32xf32>
    %638 = arith.addf %635, %637 : vector<8x32xf32>
    %639 = math.tanh %638 : vector<8x32xf32>
    %640 = arith.truncf %639 : vector<8x32xf32> to vector<8x32xbf16>
    %cst_167 = arith.constant dense<0.000000e+00> : vector<8x32xf32>
    %641 = tpu.matmul %640, %25, %cst_167 {dimension_numbers = #tpu.dot_dimension_numbers<[1], [0], [0], [1], [0, 0, 1, 1], [], []>} : vector<8x32xbf16>, vector<32x32xbf16>, vector<8x32xf32> -> vector<8x32xf32>
    %642 = arith.addf %641, %20 : vector<8x32xf32>
    %643 = vector.broadcast %583 : f32 to vector<8x32xf32>
    %644 = arith.mulf %643, %596 : vector<8x32xf32>
    %645 = arith.addf %572, %644 : vector<8x32xf32>
    %646 = vector.broadcast %584 : f32 to vector<8x32xf32>
    %647 = arith.mulf %646, %603 : vector<8x32xf32>
    %648 = arith.addf %645, %647 : vector<8x32xf32>
    %649 = vector.broadcast %585 : f32 to vector<8x32xf32>
    %650 = arith.mulf %649, %613 : vector<8x32xf32>
    %651 = arith.addf %648, %650 : vector<8x32xf32>
    %652 = vector.broadcast %586 : f32 to vector<8x32xf32>
    %653 = arith.mulf %652, %626 : vector<8x32xf32>
    %654 = arith.addf %651, %653 : vector<8x32xf32>
    %655 = vector.broadcast %587 : f32 to vector<8x32xf32>
    %656 = arith.mulf %655, %642 : vector<8x32xf32>
    %657 = arith.addf %654, %656 : vector<8x32xf32>
    %658 = math.tanh %657 : vector<8x32xf32>
    %659 = vector.broadcast %588 : f32 to vector<8x32xf32>
    %660 = arith.mulf %659, %593 : vector<8x32xf32>
    %661 = vector.broadcast %589 : f32 to vector<8x32xf32>
    %662 = arith.mulf %661, %610 : vector<8x32xf32>
    %663 = arith.addf %660, %662 : vector<8x32xf32>
    %664 = vector.broadcast %590 : f32 to vector<8x32xf32>
    %665 = arith.mulf %664, %623 : vector<8x32xf32>
    %666 = arith.addf %663, %665 : vector<8x32xf32>
    %667 = vector.broadcast %591 : f32 to vector<8x32xf32>
    %668 = arith.mulf %667, %639 : vector<8x32xf32>
    %669 = arith.addf %666, %668 : vector<8x32xf32>
    %670 = vector.broadcast %592 : f32 to vector<8x32xf32>
    %671 = arith.mulf %670, %658 : vector<8x32xf32>
    %672 = arith.addf %669, %671 : vector<8x32xf32>
    %673 = arith.truncf %672 : vector<8x32xf32> to vector<8x32xbf16>
    %cst_168 = arith.constant dense<0.000000e+00> : vector<8x4xf32>
    %674 = tpu.matmul %673, %27, %cst_168 {dimension_numbers = #tpu.dot_dimension_numbers<[1], [0], [0], [1], [0, 0, 1, 1], [], []>} : vector<8x32xbf16>, vector<32x4xbf16>, vector<8x4xf32> -> vector<8x4xf32>
    %675 = arith.addf %548, %674 : vector<8x4xf32>
    %676 = vector.broadcast %552 : f32 to vector<8x4xf32>
    %677 = arith.mulf %676, %23 : vector<8x4xf32>
    %678 = arith.addf %675, %677 : vector<8x4xf32>
    %c0_169 = arith.constant 0 : index
    %c20 = arith.constant 20 : index
    %679 = vector.load %arg4[%c0_169, %c20] : memref<8x32xf32, #tpu.memory_space<vmem>>, vector<8x4xf32>
    tpu.vector_store %arg4[%c0_169, %c20], %678 {strides = array<i32>} : memref<8x32xf32, #tpu.memory_space<vmem>>, vector<8x4xf32>,
    %c6 = arith.constant 6 : index
    %680 = memref.load %arg0[%c6] : memref<8xf32, #tpu.memory_space<smem>>
    %c5_170 = arith.constant 5 : index
    %681 = memref.load %arg0[%c5_170] : memref<8xf32, #tpu.memory_space<smem>>
    %682 = arith.subf %680, %681 : f32
    %c0_171 = arith.constant 0 : index
    %c5_172 = arith.constant 5 : index
    %683 = vector.load %arg2[%c0_171, %c5_172] : memref<8x8xf32, #tpu.memory_space<vmem>>, vector<8x1xf32>
    %684 = vector.broadcast %683 : vector<8x1xf32> to vector<8x32xf32>
    %685 = arith.mulf %684, %14 : vector<8x32xf32>
    %686 = arith.addf %685, %17 : vector<8x32xf32>
    %687 = vector.extract_strided_slice %678 {offsets = [0, 0], sizes = [8, 1], strides = [1, 1]} : vector<8x4xf32> to vector<8x1xf32>
    %688 = vector.broadcast %687 : vector<8x1xf32> to vector<8x32xf32>
    %689 = arith.mulf %688, %2 : vector<8x32xf32>
    %690 = arith.addf %686, %689 : vector<8x32xf32>
    %691 = vector.extract_strided_slice %678 {offsets = [0, 1], sizes = [8, 1], strides = [1, 1]} : vector<8x4xf32> to vector<8x1xf32>
    %692 = vector.broadcast %691 : vector<8x1xf32> to vector<8x32xf32>
    %693 = arith.mulf %692, %5 : vector<8x32xf32>
    %694 = arith.addf %690, %693 : vector<8x32xf32>
    %695 = vector.extract_strided_slice %678 {offsets = [0, 2], sizes = [8, 1], strides = [1, 1]} : vector<8x4xf32> to vector<8x1xf32>
    %696 = vector.broadcast %695 : vector<8x1xf32> to vector<8x32xf32>
    %697 = arith.mulf %696, %8 : vector<8x32xf32>
    %698 = arith.addf %694, %697 : vector<8x32xf32>
    %699 = vector.extract_strided_slice %678 {offsets = [0, 3], sizes = [8, 1], strides = [1, 1]} : vector<8x4xf32> to vector<8x1xf32>
    %700 = vector.broadcast %699 : vector<8x1xf32> to vector<8x32xf32>
    %701 = arith.mulf %700, %11 : vector<8x32xf32>
    %702 = arith.addf %698, %701 : vector<8x32xf32>
    %cst_173 = arith.constant 2.000000e-01 : f32
    %703 = arith.mulf %682, %cst_173 : f32
    %cst_174 = arith.constant 7.500000e-02 : f32
    %704 = arith.mulf %682, %cst_174 : f32
    %cst_175 = arith.constant 2.250000e-01 : f32
    %705 = arith.mulf %682, %cst_175 : f32
    %cst_176 = arith.constant 0.977777779 : f32
    %706 = arith.mulf %682, %cst_176 : f32
    %cst_177 = arith.constant -3.73333335 : f32
    %707 = arith.mulf %682, %cst_177 : f32
    %cst_178 = arith.constant 3.55555558 : f32
    %708 = arith.mulf %682, %cst_178 : f32
    %cst_179 = arith.constant 2.95259857 : f32
    %709 = arith.mulf %682, %cst_179 : f32
    %cst_180 = arith.constant -11.5957937 : f32
    %710 = arith.mulf %682, %cst_180 : f32
    %cst_181 = arith.constant 9.82289314 : f32
    %711 = arith.mulf %682, %cst_181 : f32
    %cst_182 = arith.constant -0.290809333 : f32
    %712 = arith.mulf %682, %cst_182 : f32
    %cst_183 = arith.constant 2.84627533 : f32
    %713 = arith.mulf %682, %cst_183 : f32
    %cst_184 = arith.constant -10.757576 : f32
    %714 = arith.mulf %682, %cst_184 : f32
    %cst_185 = arith.constant 8.90642261 : f32
    %715 = arith.mulf %682, %cst_185 : f32
    %cst_186 = arith.constant 0.278409094 : f32
    %716 = arith.mulf %682, %cst_186 : f32
    %cst_187 = arith.constant -0.273531318 : f32
    %717 = arith.mulf %682, %cst_187 : f32
    %cst_188 = arith.constant 0.0911458358 : f32
    %718 = arith.mulf %682, %cst_188 : f32
    %cst_189 = arith.constant 0.449236304 : f32
    %719 = arith.mulf %682, %cst_189 : f32
    %cst_190 = arith.constant 0.651041686 : f32
    %720 = arith.mulf %682, %cst_190 : f32
    %cst_191 = arith.constant -0.322376192 : f32
    %721 = arith.mulf %682, %cst_191 : f32
    %cst_192 = arith.constant 0.130952388 : f32
    %722 = arith.mulf %682, %cst_192 : f32
    %723 = math.tanh %702 : vector<8x32xf32>
    %724 = arith.truncf %723 : vector<8x32xf32> to vector<8x32xbf16>
    %cst_193 = arith.constant dense<0.000000e+00> : vector<8x32xf32>
    %725 = tpu.matmul %724, %25, %cst_193 {dimension_numbers = #tpu.dot_dimension_numbers<[1], [0], [0], [1], [0, 0, 1, 1], [], []>} : vector<8x32xbf16>, vector<32x32xbf16>, vector<8x32xf32> -> vector<8x32xf32>
    %726 = arith.addf %725, %20 : vector<8x32xf32>
    %727 = vector.broadcast %703 : f32 to vector<8x32xf32>
    %728 = arith.mulf %727, %726 : vector<8x32xf32>
    %729 = arith.addf %702, %728 : vector<8x32xf32>
    %730 = math.tanh %729 : vector<8x32xf32>
    %731 = arith.truncf %730 : vector<8x32xf32> to vector<8x32xbf16>
    %cst_194 = arith.constant dense<0.000000e+00> : vector<8x32xf32>
    %732 = tpu.matmul %731, %25, %cst_194 {dimension_numbers = #tpu.dot_dimension_numbers<[1], [0], [0], [1], [0, 0, 1, 1], [], []>} : vector<8x32xbf16>, vector<32x32xbf16>, vector<8x32xf32> -> vector<8x32xf32>
    %733 = arith.addf %732, %20 : vector<8x32xf32>
    %734 = vector.broadcast %704 : f32 to vector<8x32xf32>
    %735 = arith.mulf %734, %726 : vector<8x32xf32>
    %736 = arith.addf %702, %735 : vector<8x32xf32>
    %737 = vector.broadcast %705 : f32 to vector<8x32xf32>
    %738 = arith.mulf %737, %733 : vector<8x32xf32>
    %739 = arith.addf %736, %738 : vector<8x32xf32>
    %740 = math.tanh %739 : vector<8x32xf32>
    %741 = arith.truncf %740 : vector<8x32xf32> to vector<8x32xbf16>
    %cst_195 = arith.constant dense<0.000000e+00> : vector<8x32xf32>
    %742 = tpu.matmul %741, %25, %cst_195 {dimension_numbers = #tpu.dot_dimension_numbers<[1], [0], [0], [1], [0, 0, 1, 1], [], []>} : vector<8x32xbf16>, vector<32x32xbf16>, vector<8x32xf32> -> vector<8x32xf32>
    %743 = arith.addf %742, %20 : vector<8x32xf32>
    %744 = vector.broadcast %706 : f32 to vector<8x32xf32>
    %745 = arith.mulf %744, %726 : vector<8x32xf32>
    %746 = arith.addf %702, %745 : vector<8x32xf32>
    %747 = vector.broadcast %707 : f32 to vector<8x32xf32>
    %748 = arith.mulf %747, %733 : vector<8x32xf32>
    %749 = arith.addf %746, %748 : vector<8x32xf32>
    %750 = vector.broadcast %708 : f32 to vector<8x32xf32>
    %751 = arith.mulf %750, %743 : vector<8x32xf32>
    %752 = arith.addf %749, %751 : vector<8x32xf32>
    %753 = math.tanh %752 : vector<8x32xf32>
    %754 = arith.truncf %753 : vector<8x32xf32> to vector<8x32xbf16>
    %cst_196 = arith.constant dense<0.000000e+00> : vector<8x32xf32>
    %755 = tpu.matmul %754, %25, %cst_196 {dimension_numbers = #tpu.dot_dimension_numbers<[1], [0], [0], [1], [0, 0, 1, 1], [], []>} : vector<8x32xbf16>, vector<32x32xbf16>, vector<8x32xf32> -> vector<8x32xf32>
    %756 = arith.addf %755, %20 : vector<8x32xf32>
    %757 = vector.broadcast %709 : f32 to vector<8x32xf32>
    %758 = arith.mulf %757, %726 : vector<8x32xf32>
    %759 = arith.addf %702, %758 : vector<8x32xf32>
    %760 = vector.broadcast %710 : f32 to vector<8x32xf32>
    %761 = arith.mulf %760, %733 : vector<8x32xf32>
    %762 = arith.addf %759, %761 : vector<8x32xf32>
    %763 = vector.broadcast %711 : f32 to vector<8x32xf32>
    %764 = arith.mulf %763, %743 : vector<8x32xf32>
    %765 = arith.addf %762, %764 : vector<8x32xf32>
    %766 = vector.broadcast %712 : f32 to vector<8x32xf32>
    %767 = arith.mulf %766, %756 : vector<8x32xf32>
    %768 = arith.addf %765, %767 : vector<8x32xf32>
    %769 = math.tanh %768 : vector<8x32xf32>
    %770 = arith.truncf %769 : vector<8x32xf32> to vector<8x32xbf16>
    %cst_197 = arith.constant dense<0.000000e+00> : vector<8x32xf32>
    %771 = tpu.matmul %770, %25, %cst_197 {dimension_numbers = #tpu.dot_dimension_numbers<[1], [0], [0], [1], [0, 0, 1, 1], [], []>} : vector<8x32xbf16>, vector<32x32xbf16>, vector<8x32xf32> -> vector<8x32xf32>
    %772 = arith.addf %771, %20 : vector<8x32xf32>
    %773 = vector.broadcast %713 : f32 to vector<8x32xf32>
    %774 = arith.mulf %773, %726 : vector<8x32xf32>
    %775 = arith.addf %702, %774 : vector<8x32xf32>
    %776 = vector.broadcast %714 : f32 to vector<8x32xf32>
    %777 = arith.mulf %776, %733 : vector<8x32xf32>
    %778 = arith.addf %775, %777 : vector<8x32xf32>
    %779 = vector.broadcast %715 : f32 to vector<8x32xf32>
    %780 = arith.mulf %779, %743 : vector<8x32xf32>
    %781 = arith.addf %778, %780 : vector<8x32xf32>
    %782 = vector.broadcast %716 : f32 to vector<8x32xf32>
    %783 = arith.mulf %782, %756 : vector<8x32xf32>
    %784 = arith.addf %781, %783 : vector<8x32xf32>
    %785 = vector.broadcast %717 : f32 to vector<8x32xf32>
    %786 = arith.mulf %785, %772 : vector<8x32xf32>
    %787 = arith.addf %784, %786 : vector<8x32xf32>
    %788 = math.tanh %787 : vector<8x32xf32>
    %789 = vector.broadcast %718 : f32 to vector<8x32xf32>
    %790 = arith.mulf %789, %723 : vector<8x32xf32>
    %791 = vector.broadcast %719 : f32 to vector<8x32xf32>
    %792 = arith.mulf %791, %740 : vector<8x32xf32>
    %793 = arith.addf %790, %792 : vector<8x32xf32>
    %794 = vector.broadcast %720 : f32 to vector<8x32xf32>
    %795 = arith.mulf %794, %753 : vector<8x32xf32>
    %796 = arith.addf %793, %795 : vector<8x32xf32>
    %797 = vector.broadcast %721 : f32 to vector<8x32xf32>
    %798 = arith.mulf %797, %769 : vector<8x32xf32>
    %799 = arith.addf %796, %798 : vector<8x32xf32>
    %800 = vector.broadcast %722 : f32 to vector<8x32xf32>
    %801 = arith.mulf %800, %788 : vector<8x32xf32>
    %802 = arith.addf %799, %801 : vector<8x32xf32>
    %803 = arith.truncf %802 : vector<8x32xf32> to vector<8x32xbf16>
    %cst_198 = arith.constant dense<0.000000e+00> : vector<8x4xf32>
    %804 = tpu.matmul %803, %27, %cst_198 {dimension_numbers = #tpu.dot_dimension_numbers<[1], [0], [0], [1], [0, 0, 1, 1], [], []>} : vector<8x32xbf16>, vector<32x4xbf16>, vector<8x4xf32> -> vector<8x4xf32>
    %805 = arith.addf %678, %804 : vector<8x4xf32>
    %806 = vector.broadcast %682 : f32 to vector<8x4xf32>
    %807 = arith.mulf %806, %23 : vector<8x4xf32>
    %808 = arith.addf %805, %807 : vector<8x4xf32>
    %c0_199 = arith.constant 0 : index
    %c24 = arith.constant 24 : index
    %809 = vector.load %arg4[%c0_199, %c24] : memref<8x32xf32, #tpu.memory_space<vmem>>, vector<8x4xf32>
    tpu.vector_store %arg4[%c0_199, %c24], %808 {strides = array<i32>} : memref<8x32xf32, #tpu.memory_space<vmem>>, vector<8x4xf32>,
    %c7 = arith.constant 7 : index
    %810 = memref.load %arg0[%c7] : memref<8xf32, #tpu.memory_space<smem>>
    %c6_200 = arith.constant 6 : index
    %811 = memref.load %arg0[%c6_200] : memref<8xf32, #tpu.memory_space<smem>>
    %812 = arith.subf %810, %811 : f32
    %c0_201 = arith.constant 0 : index
    %c6_202 = arith.constant 6 : index
    %813 = vector.load %arg2[%c0_201, %c6_202] : memref<8x8xf32, #tpu.memory_space<vmem>>, vector<8x1xf32>
    %814 = vector.broadcast %813 : vector<8x1xf32> to vector<8x32xf32>
    %815 = arith.mulf %814, %14 : vector<8x32xf32>
    %816 = arith.addf %815, %17 : vector<8x32xf32>
    %817 = vector.extract_strided_slice %808 {offsets = [0, 0], sizes = [8, 1], strides = [1, 1]} : vector<8x4xf32> to vector<8x1xf32>
    %818 = vector.broadcast %817 : vector<8x1xf32> to vector<8x32xf32>
    %819 = arith.mulf %818, %2 : vector<8x32xf32>
    %820 = arith.addf %816, %819 : vector<8x32xf32>
    %821 = vector.extract_strided_slice %808 {offsets = [0, 1], sizes = [8, 1], strides = [1, 1]} : vector<8x4xf32> to vector<8x1xf32>
    %822 = vector.broadcast %821 : vector<8x1xf32> to vector<8x32xf32>
    %823 = arith.mulf %822, %5 : vector<8x32xf32>
    %824 = arith.addf %820, %823 : vector<8x32xf32>
    %825 = vector.extract_strided_slice %808 {offsets = [0, 2], sizes = [8, 1], strides = [1, 1]} : vector<8x4xf32> to vector<8x1xf32>
    %826 = vector.broadcast %825 : vector<8x1xf32> to vector<8x32xf32>
    %827 = arith.mulf %826, %8 : vector<8x32xf32>
    %828 = arith.addf %824, %827 : vector<8x32xf32>
    %829 = vector.extract_strided_slice %808 {offsets = [0, 3], sizes = [8, 1], strides = [1, 1]} : vector<8x4xf32> to vector<8x1xf32>
    %830 = vector.broadcast %829 : vector<8x1xf32> to vector<8x32xf32>
    %831 = arith.mulf %830, %11 : vector<8x32xf32>
    %832 = arith.addf %828, %831 : vector<8x32xf32>
    %cst_203 = arith.constant 2.000000e-01 : f32
    %833 = arith.mulf %812, %cst_203 : f32
    %cst_204 = arith.constant 7.500000e-02 : f32
    %834 = arith.mulf %812, %cst_204 : f32
    %cst_205 = arith.constant 2.250000e-01 : f32
    %835 = arith.mulf %812, %cst_205 : f32
    %cst_206 = arith.constant 0.977777779 : f32
    %836 = arith.mulf %812, %cst_206 : f32
    %cst_207 = arith.constant -3.73333335 : f32
    %837 = arith.mulf %812, %cst_207 : f32
    %cst_208 = arith.constant 3.55555558 : f32
    %838 = arith.mulf %812, %cst_208 : f32
    %cst_209 = arith.constant 2.95259857 : f32
    %839 = arith.mulf %812, %cst_209 : f32
    %cst_210 = arith.constant -11.5957937 : f32
    %840 = arith.mulf %812, %cst_210 : f32
    %cst_211 = arith.constant 9.82289314 : f32
    %841 = arith.mulf %812, %cst_211 : f32
    %cst_212 = arith.constant -0.290809333 : f32
    %842 = arith.mulf %812, %cst_212 : f32
    %cst_213 = arith.constant 2.84627533 : f32
    %843 = arith.mulf %812, %cst_213 : f32
    %cst_214 = arith.constant -10.757576 : f32
    %844 = arith.mulf %812, %cst_214 : f32
    %cst_215 = arith.constant 8.90642261 : f32
    %845 = arith.mulf %812, %cst_215 : f32
    %cst_216 = arith.constant 0.278409094 : f32
    %846 = arith.mulf %812, %cst_216 : f32
    %cst_217 = arith.constant -0.273531318 : f32
    %847 = arith.mulf %812, %cst_217 : f32
    %cst_218 = arith.constant 0.0911458358 : f32
    %848 = arith.mulf %812, %cst_218 : f32
    %cst_219 = arith.constant 0.449236304 : f32
    %849 = arith.mulf %812, %cst_219 : f32
    %cst_220 = arith.constant 0.651041686 : f32
    %850 = arith.mulf %812, %cst_220 : f32
    %cst_221 = arith.constant -0.322376192 : f32
    %851 = arith.mulf %812, %cst_221 : f32
    %cst_222 = arith.constant 0.130952388 : f32
    %852 = arith.mulf %812, %cst_222 : f32
    %853 = math.tanh %832 : vector<8x32xf32>
    %854 = arith.truncf %853 : vector<8x32xf32> to vector<8x32xbf16>
    %cst_223 = arith.constant dense<0.000000e+00> : vector<8x32xf32>
    %855 = tpu.matmul %854, %25, %cst_223 {dimension_numbers = #tpu.dot_dimension_numbers<[1], [0], [0], [1], [0, 0, 1, 1], [], []>} : vector<8x32xbf16>, vector<32x32xbf16>, vector<8x32xf32> -> vector<8x32xf32>
    %856 = arith.addf %855, %20 : vector<8x32xf32>
    %857 = vector.broadcast %833 : f32 to vector<8x32xf32>
    %858 = arith.mulf %857, %856 : vector<8x32xf32>
    %859 = arith.addf %832, %858 : vector<8x32xf32>
    %860 = math.tanh %859 : vector<8x32xf32>
    %861 = arith.truncf %860 : vector<8x32xf32> to vector<8x32xbf16>
    %cst_224 = arith.constant dense<0.000000e+00> : vector<8x32xf32>
    %862 = tpu.matmul %861, %25, %cst_224 {dimension_numbers = #tpu.dot_dimension_numbers<[1], [0], [0], [1], [0, 0, 1, 1], [], []>} : vector<8x32xbf16>, vector<32x32xbf16>, vector<8x32xf32> -> vector<8x32xf32>
    %863 = arith.addf %862, %20 : vector<8x32xf32>
    %864 = vector.broadcast %834 : f32 to vector<8x32xf32>
    %865 = arith.mulf %864, %856 : vector<8x32xf32>
    %866 = arith.addf %832, %865 : vector<8x32xf32>
    %867 = vector.broadcast %835 : f32 to vector<8x32xf32>
    %868 = arith.mulf %867, %863 : vector<8x32xf32>
    %869 = arith.addf %866, %868 : vector<8x32xf32>
    %870 = math.tanh %869 : vector<8x32xf32>
    %871 = arith.truncf %870 : vector<8x32xf32> to vector<8x32xbf16>
    %cst_225 = arith.constant dense<0.000000e+00> : vector<8x32xf32>
    %872 = tpu.matmul %871, %25, %cst_225 {dimension_numbers = #tpu.dot_dimension_numbers<[1], [0], [0], [1], [0, 0, 1, 1], [], []>} : vector<8x32xbf16>, vector<32x32xbf16>, vector<8x32xf32> -> vector<8x32xf32>
    %873 = arith.addf %872, %20 : vector<8x32xf32>
    %874 = vector.broadcast %836 : f32 to vector<8x32xf32>
    %875 = arith.mulf %874, %856 : vector<8x32xf32>
    %876 = arith.addf %832, %875 : vector<8x32xf32>
    %877 = vector.broadcast %837 : f32 to vector<8x32xf32>
    %878 = arith.mulf %877, %863 : vector<8x32xf32>
    %879 = arith.addf %876, %878 : vector<8x32xf32>
    %880 = vector.broadcast %838 : f32 to vector<8x32xf32>
    %881 = arith.mulf %880, %873 : vector<8x32xf32>
    %882 = arith.addf %879, %881 : vector<8x32xf32>
    %883 = math.tanh %882 : vector<8x32xf32>
    %884 = arith.truncf %883 : vector<8x32xf32> to vector<8x32xbf16>
    %cst_226 = arith.constant dense<0.000000e+00> : vector<8x32xf32>
    %885 = tpu.matmul %884, %25, %cst_226 {dimension_numbers = #tpu.dot_dimension_numbers<[1], [0], [0], [1], [0, 0, 1, 1], [], []>} : vector<8x32xbf16>, vector<32x32xbf16>, vector<8x32xf32> -> vector<8x32xf32>
    %886 = arith.addf %885, %20 : vector<8x32xf32>
    %887 = vector.broadcast %839 : f32 to vector<8x32xf32>
    %888 = arith.mulf %887, %856 : vector<8x32xf32>
    %889 = arith.addf %832, %888 : vector<8x32xf32>
    %890 = vector.broadcast %840 : f32 to vector<8x32xf32>
    %891 = arith.mulf %890, %863 : vector<8x32xf32>
    %892 = arith.addf %889, %891 : vector<8x32xf32>
    %893 = vector.broadcast %841 : f32 to vector<8x32xf32>
    %894 = arith.mulf %893, %873 : vector<8x32xf32>
    %895 = arith.addf %892, %894 : vector<8x32xf32>
    %896 = vector.broadcast %842 : f32 to vector<8x32xf32>
    %897 = arith.mulf %896, %886 : vector<8x32xf32>
    %898 = arith.addf %895, %897 : vector<8x32xf32>
    %899 = math.tanh %898 : vector<8x32xf32>
    %900 = arith.truncf %899 : vector<8x32xf32> to vector<8x32xbf16>
    %cst_227 = arith.constant dense<0.000000e+00> : vector<8x32xf32>
    %901 = tpu.matmul %900, %25, %cst_227 {dimension_numbers = #tpu.dot_dimension_numbers<[1], [0], [0], [1], [0, 0, 1, 1], [], []>} : vector<8x32xbf16>, vector<32x32xbf16>, vector<8x32xf32> -> vector<8x32xf32>
    %902 = arith.addf %901, %20 : vector<8x32xf32>
    %903 = vector.broadcast %843 : f32 to vector<8x32xf32>
    %904 = arith.mulf %903, %856 : vector<8x32xf32>
    %905 = arith.addf %832, %904 : vector<8x32xf32>
    %906 = vector.broadcast %844 : f32 to vector<8x32xf32>
    %907 = arith.mulf %906, %863 : vector<8x32xf32>
    %908 = arith.addf %905, %907 : vector<8x32xf32>
    %909 = vector.broadcast %845 : f32 to vector<8x32xf32>
    %910 = arith.mulf %909, %873 : vector<8x32xf32>
    %911 = arith.addf %908, %910 : vector<8x32xf32>
    %912 = vector.broadcast %846 : f32 to vector<8x32xf32>
    %913 = arith.mulf %912, %886 : vector<8x32xf32>
    %914 = arith.addf %911, %913 : vector<8x32xf32>
    %915 = vector.broadcast %847 : f32 to vector<8x32xf32>
    %916 = arith.mulf %915, %902 : vector<8x32xf32>
    %917 = arith.addf %914, %916 : vector<8x32xf32>
    %918 = math.tanh %917 : vector<8x32xf32>
    %919 = vector.broadcast %848 : f32 to vector<8x32xf32>
    %920 = arith.mulf %919, %853 : vector<8x32xf32>
    %921 = vector.broadcast %849 : f32 to vector<8x32xf32>
    %922 = arith.mulf %921, %870 : vector<8x32xf32>
    %923 = arith.addf %920, %922 : vector<8x32xf32>
    %924 = vector.broadcast %850 : f32 to vector<8x32xf32>
    %925 = arith.mulf %924, %883 : vector<8x32xf32>
    %926 = arith.addf %923, %925 : vector<8x32xf32>
    %927 = vector.broadcast %851 : f32 to vector<8x32xf32>
    %928 = arith.mulf %927, %899 : vector<8x32xf32>
    %929 = arith.addf %926, %928 : vector<8x32xf32>
    %930 = vector.broadcast %852 : f32 to vector<8x32xf32>
    %931 = arith.mulf %930, %918 : vector<8x32xf32>
    %932 = arith.addf %929, %931 : vector<8x32xf32>
    %933 = arith.truncf %932 : vector<8x32xf32> to vector<8x32xbf16>
    %cst_228 = arith.constant dense<0.000000e+00> : vector<8x4xf32>
    %934 = tpu.matmul %933, %27, %cst_228 {dimension_numbers = #tpu.dot_dimension_numbers<[1], [0], [0], [1], [0, 0, 1, 1], [], []>} : vector<8x32xbf16>, vector<32x4xbf16>, vector<8x4xf32> -> vector<8x4xf32>
    %935 = arith.addf %808, %934 : vector<8x4xf32>
    %936 = vector.broadcast %812 : f32 to vector<8x4xf32>
    %937 = arith.mulf %936, %23 : vector<8x4xf32>
    %938 = arith.addf %935, %937 : vector<8x4xf32>
    %c0_229 = arith.constant 0 : index
    %c28 = arith.constant 28 : index
    %939 = vector.load %arg4[%c0_229, %c28] : memref<8x32xf32, #tpu.memory_space<vmem>>, vector<8x4xf32>
    tpu.vector_store %arg4[%c0_229, %c28], %938 {strides = array<i32>} : memref<8x32xf32, #tpu.memory_space<vmem>>, vector<8x4xf32>,
    return
  }
}

</mosaic_0001>

<bundles_post_ra>
// kernel: tpu_custom_call.1
= control target key start
LH: loop header
LB: loop body
LE: loop exit
PB: predicated region body
PF: predicated region fallthrough
CT: control target
= control target key end

     0   :  { %9 = vsyncpa [#allocation4], 0  ;;  %s2650_s0 = inlined_call_operand.vmem [shape: f32[8], index: 0, kind: input, shape index: {}]   ;;  %s2651_s1 = inlined_call_operand.vmem [shape: f32[8,4], index: 1, kind: input, shape index: {}]   ;;  %s2652_s2 = inlined_call_operand.vmem [shape: f32[8,8], index: 2, kind: input, shape index: {}]   ;;  %s2653_s3 = inlined_call_operand.vmem [shape: f32[88,32], index: 3, kind: input, shape index: {}]   ;;  %s2654_s4 = inlined_call_operand.hbm [shape: f32[8,32], index: 4, kind: output, shape index: {}]  }
   0x1   :  { %10 = vsyncpa [#allocation3], 0  ;;  %s16_s17 = sshll.u32 %s2650_s0, 4  ;;  %s1950_s18 = smov [#allocation2]   ;;  %s17_s17 = int_to_ptr.vmem [resolvable:$true] %s16_s17 }
   0x2   :  { %19 = dma.vmem_to_smem %s17_s17, 16, %s1950_s18, [#allocation4]  }
   0x3   :  { %1946 = dma.done.wait [#allocation4], 16  }
   0x4   :  { %1947 = vsyncadd [#allocation4], 4294967280 }
   0x5   :  { %30 = sfence }
   0x6   :  { %v1997_v0 = vld [vmem:[%s2652_s2] sm:$0xff]  ;;  %v1951_v2 = vmov 0   ;;  %v1952_v3 = vmov 1   ;;  %v1953_v4 = vmov 3   ;;  %v1954_v5 = vmov 2   ;;  %v50_v6 = vld [vmem:[%s2653_s3 + $0x18] sm:$0xff] }
   0x7   :  { %v2002_v1 = vld [vmem:[%s2651_s1] sm:$0xff]  ;;  %1777 = vset.pattern.permute.xlu0 %v1951_v2  ;;  %1778 = vset.pattern.permute.xlu1 %v1952_v3  ;;  %v48_v8 = vld [vmem:[%s2653_s3 + $0x8] sm:$0xff]  ;;  %v49_v10 = vld [vmem:[%s2653_s3 + $0x10] sm:$0xff]  ;;  %vm121_vm0 = vcmask 261120   ;;  %s2090_s15 = sld [smem:[#allocation2 + $0x1]]  ;;  %vm61_vm1 = vcmask 31744  }
   0x8   :  { %69 = vperm.xlu0 %1777, %v1997_v0   ;;  %82 = vperm.xlu1 %1778, %v2002_v1   ;;  %v51_v7 = vld [vmem:[%s2653_s3 + $0x20] sm:$0xff]  ;;  %v2032_v11 = vpack.c.bf16 %v49_v10, %v48_v8  ;;  %s64_s16 = sld [smem:[#allocation2]]  ;;  %v2099_v35 = vld [vmem:[%s2653_s3 + $0x28] ss:$0 sm:$0xff]  ;;  %62 = vst.msk [vmem:[#allocation5] sm:$0xff] %vm61_vm1, %v2002_v1  ;;  %vm295_vm2 = vcmask 64544  }
   0x9   :  { %1780 = vset.pattern.permute.xlu2 %v1953_v4  ;;  %v2026_v9 = vpack.c.bf16 %v51_v7, %v50_v6  ;;  %v2050_v14 = vld [vmem:[%s2653_s3 + $0x4] ss:$0 sm:$0xff]  ;;  %v2055_v15 = vld [vmem:[%s2653_s3 + $0x5] ss:$0 sm:$0xff]  ;;  %v2061_v17 = vld [vmem:[%s2653_s3] ss:$0 sm:$0xff] }
   0xa   :  { %94 = vperm.xlu2 %1780, %v2002_v1   ;;  %v2066_v18 = vld [vmem:[%s2653_s3 + $0x1] ss:$0 sm:$0xff]  ;;  %v2071_v19 = vld [vmem:[%s2653_s3 + $0x2] ss:$0 sm:$0xff]  ;;  %v2078_v24 = vld [vmem:[%s2653_s3 + $0x3] ss:$0 sm:$0xff] }
   0xb   :  { %131 = vmatpush.bf16.msra.mxu0 %v2026_v9  ;;  %152 = vmatpush.bf16.msra.mxu1 %v2026_v9  ;;  %vm527_vm3 = vcmask 97344   ;;  %vm759_vm4 = vcmask 130144   ;;  %vm991_vm5 = vcmask 162944   ;;  %vm1223_vm6 = vcmask 195744  }
   0xc   :  { %176 = vmatpush.bf16.msra.mxu2 %v2026_v9  ;;  %203 = vmatpush.bf16.msra.mxu3 %v2026_v9  ;;  %vm1455_vm7 = vcmask 228544   ;;  %vm1687_vm8 = vcmask 261344  }
   0xe   :  { %s2093_s17 = ssub.f32 %s2090_s15, %s64_s16 }
   0xf   :  { %132 = vmatpush.bf16.msra.mxu0 %v2032_v11  ;;  %153 = vmatpush.bf16.msra.mxu1 %v2032_v11 }
  0x10   :  { %76 = vperm.xlu0 %1777, %v2002_v1   ;;  %1779 = vset.pattern.permute.xlu1 %v1954_v5  ;;  %s99_s18 = smul.f32 0.2, %s2093_s17 }
  0x11   :  { %88 = vperm.xlu1 %1779, %v2002_v1   ;;  %177 = vmatpush.bf16.msra.mxu2 %v2032_v11  ;;  %s100_s21 = smul.f32 0.075, %s2093_s17 }
  0x12   :  { %1781 = vset.pattern.permute.xlu2 %v1952_v3  ;;  %204 = vmatpush.bf16.msra.mxu3 %v2032_v11  ;;  %v138_v37 = vstv %s99_s18  ;;  %s102_s22 = smul.f32 0.9777778, %s2093_s17  ;;  %s2266_s18 = sld [smem:[#allocation2 + $0x3]] }
  0x13   :  { %303 = vperm.xlu2 %1781, %v1997_v0   ;;  %233 = vmatpush.bf16.msrb.mxu0 %v2026_v9  ;;  %s105_s0 = smul.f32 2.9525986, %s2093_s17  ;;  %v159_v44 = vstv %s100_s21 }
  0x14   :  { %s109_s1 = smul.f32 2.8462753, %s2093_s17  ;;  %v183_v45 = vstv %s102_s22 }
  0x15   :  { %363 = vmatpush.bf16.msrb.mxu2 %v2026_v9  ;;  %s101_s23 = smul.f32 0.225, %s2093_s17  ;;  %v210_v46 = vstv %s105_s0 }
  0x16   :  { %384 = vmatpush.bf16.msrb.mxu3 %v2026_v9  ;;  %s103_s24 = smul.f32 -3.7333333, %s2093_s17  ;;  %v240_v47 = vstv %s109_s1 }
  0x17   :  { %234 = vmatpush.bf16.msrb.mxu0 %v2032_v11  ;;  %s106_s25 = smul.f32 -11.595794, %s2093_s17  ;;  %v162_v53 = vstv %s101_s23 }
  0x18   :  { %s110_s26 = smul.f32 -10.757576, %s2093_s17  ;;  %v186_v54 = vstv %s103_s24 }
  0x19   :  { %1782 = vset.pattern.permute.xlu1 %v1952_v3  ;;  %364 = vmatpush.bf16.msrb.mxu2 %v2032_v11  ;;  %v213_v55 = vstv %s106_s25  ;;  %s114_s27 = smul.f32 0.091145836, %s2093_s17 }
  0x1a   :  { %385 = vmatpush.bf16.msrb.mxu3 %v2032_v11  ;;  %v243_v56 = vstv %s110_s26  ;;  %s115_s28 = smul.f32 0.4492363, %s2093_s17 }
  0x1b   :  { %1783 = vset.pattern.permute.xlu2 %v1954_v5  ;;  %s104_s29 = smul.f32 3.5555556, %s2093_s17 }
  0x1c   :  { %s107_s30 = smul.f32 9.822893, %s2093_s17 }
  0x1d   :  { %s111_s5 = smul.f32 8.906423, %s2093_s17 }
  0x1e   :  { %s116_s6 = smul.f32 0.6510417, %s2093_s17 }
  0x1f   :  { %s108_s7 = smul.f32 -0.29080933, %s2093_s17 }
  0x20   :  { %s112_s8 = smul.f32 0.2784091, %s2093_s17 }
  0x21   :  { %s117_s9 = smul.f32 -0.3223762, %s2093_s17 }
  0x22   :  { %s113_s20 = smul.f32 -0.27353132, %s2093_s17 }
  0x23   :  { %s118_s21 = smul.f32 0.13095239, %s2093_s17 }
  0x64   :  { %v95_v25 = vpop.permute.xlu2 %94 }
  0x65   :  { %v97_v30 = vmul.f32 %v2078_v24, %v95_v25 }
  0x7a   :  { %v70_v12 = vpop.permute.xlu0 %69  ;;  %v83_v13 = vpop.permute.xlu1 %82 }
  0x7b   :  { %v72_v16 = vmul.f32 %v2050_v14, %v70_v12  ;;  %v85_v26 = vmul.f32 %v2066_v18, %v83_v13 }
  0x7d   :  { %v73_v21 = vadd.f32 %v2055_v15, %v72_v16 }
  0x82   :  { %v77_v20 = vpop.permute.xlu0 %76 }
  0x83   :  { %v79_v22 = vmul.f32 %v2061_v17, %v77_v20  ;;  %v89_v23 = vpop.permute.xlu1 %88  ;;  %v256_v20 = vstv %s114_s27 }
  0x84   :  { %v91_v28 = vmul.f32 %v2071_v19, %v89_v23 }
  0x85   :  { %v80_v27 = vadd.f32 %v79_v22, %v73_v21  ;;  %v258_v21 = vstv %s115_s28 }
  0x87   :  { %v86_v29 = vadd.f32 %v85_v26, %v80_v27 }
  0x89   :  { %v92_v31 = vadd.f32 %v91_v28, %v86_v29  ;;  %v189_v29 = vstv %s104_s29 }
  0x8b   :  { %v98_v32 = vadd.f32 %v97_v30, %v92_v31  ;;  %v216_v30 = vstv %s107_s30  ;;  %v246_v31 = vstv %s111_s5 }
  0x8d   :  { %1817 = vtanh.f32 %v98_v32 }
  0x93   :  { %v2083_v33 = vpop.eup %1817 }
  0x94   :  { %v120_v34 = vpack.c.bf16 %v2083_v33, %v2083_v33  ;;  %v257_v25 = vmul.f32 %v2083_v33, %v256_v20 }
  0x96   :  { %1707 = vmatmul.msk.bf16.vlgmr.msra.gmra.mxu0 %vm121_vm0, %v120_v34 }
  0x97   :  { %408 = vmatpush.bf16.msra.mxu0 %v2026_v9 }
  0x9b   :  { %409 = vmatpush.bf16.msra.mxu0 %v2032_v11 }
 0x113   :  { %v134_v36 = vpop.f32.mrf.mxu0 }
 0x114   :  { %v135_v38 = vadd.f32 %v2099_v35, %v134_v36 }
 0x116   :  { %v139_v39 = vmul.f32 %v138_v37, %v135_v38  ;;  %v160_v48 = vmul.f32 %v159_v44, %v135_v38  ;;  %v184_v49 = vmul.f32 %v183_v45, %v135_v38  ;;  %v211_v50 = vmul.f32 %v210_v46, %v135_v38 }
 0x117   :  { %v241_v51 = vmul.f32 %v240_v47, %v135_v38  ;;  %v219_v47 = vstv %s108_s7 }
 0x118   :  { %v140_v40 = vadd.f32 %v139_v39, %v98_v32  ;;  %v161_v58 = vadd.f32 %v160_v48, %v98_v32  ;;  %v185_v59 = vadd.f32 %v184_v49, %v98_v32  ;;  %v212_v60 = vadd.f32 %v211_v50, %v98_v32 }
 0x119   :  { %v242_v61 = vadd.f32 %v241_v51, %v98_v32  ;;  %v249_v48 = vstv %s112_s8 }
 0x11a   :  { %1819 = vtanh.f32 %v140_v40 }
 0x11b   :  { %v136_v41 = vpop.f32.mrf.mxu0 }
 0x11c   :  { %v261_v41 = vstv %s116_s6 }
 0x120   :  { %v1820_v42 = vpop.eup %1819 }
 0x121   :  { %v142_v43 = vpack.c.bf16 %v1820_v42, %v1820_v42 }
 0x123   :  { %1708 = vmatmul.msk.bf16.vlgmr.msra.gmra.mxu1 %vm121_vm0, %v142_v43 }
 0x1a0   :  { %v155_v52 = vpop.f32.mrf.mxu1 }
 0x1a1   :  { %v156_v57 = vadd.f32 %v2099_v35, %v155_v52 }
 0x1a3   :  { %v163_v62 = vmul.f32 %v162_v53, %v156_v57  ;;  %v187_v63 = vmul.f32 %v186_v54, %v156_v57  ;;  %v214_v6 = vmul.f32 %v213_v55, %v156_v57  ;;  %v244_v7 = vmul.f32 %v243_v56, %v156_v57 }
 0x1a4   :  { %v264_v55 = vstv %s117_s9 }
 0x1a5   :  { %v164_v8 = vadd.f32 %v163_v62, %v161_v58  ;;  %v188_v10 = vadd.f32 %v187_v63, %v185_v59  ;;  %v215_v12 = vadd.f32 %v214_v6, %v212_v60  ;;  %v245_v13 = vadd.f32 %v244_v7, %v242_v61  ;;  %v56_v60 = vld [vmem:[%s2653_s3 + $0x40] sm:$0xff]  ;;  %v57_v61 = vld [vmem:[%s2653_s3 + $0x48] sm:$0xff]  ;;  %v54_v63 = vld [vmem:[%s2653_s3 + $0x30] sm:$0xff] }
 0x1a6   :  { %v2137_v62 = vpack.c.bf16 %v57_v61, %v56_v60  ;;  %v55_v6 = vld [vmem:[%s2653_s3 + $0x38] sm:$0xff] }
 0x1a7   :  { %1821 = vtanh.f32 %v164_v8  ;;  %v2146_v7 = vpack.c.bf16 %v55_v6, %v54_v63 }
 0x1a8   :  { %v157_v16 = vpop.f32.mrf.mxu1  ;;  %280 = vmatpush.bf16.msrb.mxu1 %v2137_v62 }
 0x1ac   :  { %281 = vmatpush.bf16.msrb.mxu1 %v2146_v7 }
 0x1ad   :  { %v1822_v22 = vpop.eup %1821 }
 0x1ae   :  { %v166_v23 = vpack.c.bf16 %v1822_v22, %v1822_v22  ;;  %v259_v26 = vmul.f32 %v1822_v22, %v258_v21  ;;  %v267_v21 = vstv %s118_s21 }
 0x1b0   :  { %1709 = vmatmul.msk.bf16.vlgmr.msra.gmra.mxu2 %vm121_vm0, %v166_v23  ;;  %v260_v27 = vadd.f32 %v259_v26, %v257_v25  ;;  %435 = vmatpush.bf16.msra.mxu1 %v2026_v9 }
 0x1b1   :  { %465 = vmatpush.bf16.msra.mxu2 %v2026_v9 }
 0x1b4   :  { %436 = vmatpush.bf16.msra.mxu1 %v2032_v11 }
 0x1b5   :  { %466 = vmatpush.bf16.msra.mxu2 %v2032_v11 }
 0x233   :  { %v179_v28 = vpop.f32.mrf.mxu2 }
 0x234   :  { %v180_v32 = vadd.f32 %v2099_v35, %v179_v28  ;;  %v288_v28 = vstv %s2093_s17  ;;  %s2191_s17 = sld [smem:[#allocation2 + $0x2]] }
 0x236   :  { %v190_v33 = vmul.f32 %v189_v29, %v180_v32  ;;  %v217_v34 = vmul.f32 %v216_v30, %v180_v32  ;;  %v247_v36 = vmul.f32 %v246_v31, %v180_v32 }
 0x238   :  { %v191_v37 = vadd.f32 %v190_v33, %v188_v10  ;;  %v218_v38 = vadd.f32 %v217_v34, %v215_v12  ;;  %v248_v39 = vadd.f32 %v247_v36, %v245_v13  ;;  %v252_v10 = vstv %s113_s20  ;;  %v304_v34 = vpop.permute.xlu2 %303 }
 0x239   :  { %v306_v36 = vmul.f32 %v2050_v14, %v304_v34 }
 0x23a   :  { %1823 = vtanh.f32 %v191_v37  ;;  %s2195_s1 = ssub.f32 %s2191_s17, %s2090_s15 }
 0x23b   :  { %v181_v40 = vpop.f32.mrf.mxu2  ;;  %v307_v37 = vadd.f32 %v2055_v15, %v306_v36  ;;  %s2270_s19 = ssub.f32 %s2266_s18, %s2191_s17 }
 0x23c   :  { %s332_s23 = smul.f32 0.2, %s2195_s1 }
 0x23d   :  { %s333_s15 = smul.f32 0.075, %s2195_s1 }
 0x23e   :  { %s335_s24 = smul.f32 0.9777778, %s2195_s1 }
 0x23f   :  { %s338_s25 = smul.f32 2.9525986, %s2195_s1  ;;  %v391_v60 = vstv %s333_s15 }
 0x240   :  { %v1824_v42 = vpop.eup %1823  ;;  %s342_s26 = smul.f32 2.8462753, %s2195_s1  ;;  %v415_v61 = vstv %s335_s24 }
 0x241   :  { %v193_v43 = vpack.c.bf16 %v1824_v42, %v1824_v42  ;;  %v262_v44 = vmul.f32 %v1824_v42, %v261_v41  ;;  %s334_s27 = smul.f32 0.225, %s2195_s1  ;;  %v442_v63 = vstv %s338_s25 }
 0x242   :  { %s336_s28 = smul.f32 -3.7333333, %s2195_s1  ;;  %v472_v6 = vstv %s342_s26 }
 0x243   :  { %1710 = vmatmul.msk.bf16.vlgmr.msra.gmra.mxu3 %vm121_vm0, %v193_v43  ;;  %v263_v45 = vadd.f32 %v262_v44, %v260_v27  ;;  %v2162_v27 = vld [vmem:[%s2653_s3 + $0x50] ss:$0 sm:$0xff]  ;;  %s339_s29 = smul.f32 -11.595794, %s2195_s1 }
 0x244   :  { %512 = vmatpush.bf16.msra.mxu3 %v2137_v62  ;;  %v289_v29 = vmul.f32 %v2162_v27, %v288_v28  ;;  %s343_s30 = smul.f32 -10.757576, %s2195_s1 }
 0x245   :  { %s347_s5 = smul.f32 0.091145836, %s2195_s1 }
 0x246   :  { %s348_s6 = smul.f32 0.4492363, %s2195_s1 }
 0x247   :  { %s337_s7 = smul.f32 3.5555556, %s2195_s1 }
 0x248   :  { %513 = vmatpush.bf16.msra.mxu3 %v2146_v7  ;;  %s340_s8 = smul.f32 9.822893, %s2195_s1 }
 0x249   :  { %s344_s9 = smul.f32 8.906423, %s2195_s1 }
 0x24a   :  { %s349_s10 = smul.f32 0.6510417, %s2195_s1 }
 0x24b   :  { %s341_s11 = smul.f32 -0.29080933, %s2195_s1 }
 0x24c   :  { %s345_s12 = smul.f32 0.2784091, %s2195_s1 }
 0x24d   :  { %s350_s13 = smul.f32 -0.3223762, %s2195_s1 }
 0x24e   :  { %s346_s14 = smul.f32 -0.27353132, %s2195_s1 }
 0x24f   :  { %s351_s16 = smul.f32 0.13095239, %s2195_s1 }
 0x250   :  { %s564_s20 = smul.f32 0.2, %s2270_s19 }
 0x251   :  { %s565_s21 = smul.f32 0.075, %s2270_s19 }
 0x252   :  { %s567_s22 = smul.f32 0.9777778, %s2270_s19 }
 0x253   :  { %s570_s0 = smul.f32 2.9525986, %s2270_s19 }
 0x254   :  { %s574_s17 = smul.f32 2.8462753, %s2270_s19 }
 0x255   :  { %s571_s15 = smul.f32 -11.595794, %s2270_s19 }
 0x256   :  { %s575_s24 = smul.f32 -10.757576, %s2270_s19 }
 0x257   :  { %s579_s25 = smul.f32 0.091145836, %s2270_s19 }
 0x258   :  { %s580_s26 = smul.f32 0.4492363, %s2270_s19 }
 0x2c6   :  { %v206_v46 = vpop.f32.mrf.mxu3 }
 0x2c7   :  { %v207_v49 = vadd.f32 %v2099_v35, %v206_v46 }
 0x2c9   :  { %v220_v50 = vmul.f32 %v219_v47, %v207_v49  ;;  %v250_v51 = vmul.f32 %v249_v48, %v207_v49 }
 0x2cb   :  { %v221_v52 = vadd.f32 %v220_v50, %v218_v38  ;;  %v251_v53 = vadd.f32 %v250_v51, %v248_v39 }
 0x2cd   :  { %1825 = vtanh.f32 %v221_v52 }
 0x2ce   :  { %v208_v54 = vpop.f32.mrf.mxu3 }
 0x2d3   :  { %v1826_v56 = vpop.eup %1825 }
 0x2d4   :  { %v223_v57 = vpack.c.bf16 %v1826_v56, %v1826_v56  ;;  %v265_v58 = vmul.f32 %v1826_v56, %v264_v55 }
 0x2d6   :  { %1711 = vmatmul.msk.bf16.vlgmr.msrb.gmra.mxu0 %vm121_vm0, %v223_v57  ;;  %v266_v59 = vadd.f32 %v265_v58, %v263_v45 }
 0x2d7   :  { %595 = vmatpush.bf16.msrb.mxu0 %v2026_v9 }
 0x2db   :  { %596 = vmatpush.bf16.msrb.mxu0 %v2032_v11 }
 0x353   :  { %v236_v8 = vpop.f32.mrf.mxu0 }
 0x354   :  { %v237_v12 = vadd.f32 %v2099_v35, %v236_v8 }
 0x356   :  { %v253_v13 = vmul.f32 %v252_v10, %v237_v12 }
 0x358   :  { %v254_v16 = vadd.f32 %v253_v13, %v251_v53  ;;  %v370_v53 = vstv %s332_s23  ;;  %s568_s23 = smul.f32 -3.7333333, %s2270_s19 }
 0x35a   :  { %1827 = vtanh.f32 %v254_v16 }
 0x35b   :  { %v238_v20 = vpop.f32.mrf.mxu0 }
 0x35c   :  { %v394_v20 = vstv %s334_s27  ;;  %s569_s27 = smul.f32 3.5555556, %s2270_s19 }
 0x360   :  { %v1828_v22 = vpop.eup %1827 }
 0x361   :  { %v268_v23 = vmul.f32 %v1828_v22, %v267_v21  ;;  %v418_v21 = vstv %s336_s28  ;;  %v445_v22 = vstv %s339_s29  ;;  %s572_s28 = smul.f32 9.822893, %s2270_s19 }
 0x362   :  { %s576_s29 = smul.f32 8.906423, %s2270_s19 }
 0x363   :  { %v269_v25 = vadd.f32 %v268_v23, %v266_v59  ;;  %v475_v23 = vstv %s343_s30  ;;  %s581_s30 = smul.f32 0.6510417, %s2270_s19 }
 0x365   :  { %v270_v26 = vpack.c.bf16 %v269_v25, %v269_v25 }
 0x367   :  { %1712 = vmatmul.msk.bf16.vlgmr.msrb.gmra.mxu1 %vm121_vm0, %v270_v26 }
 0x368   :  { %616 = vmatpush.bf16.msrb.mxu1 %v2026_v9 }
 0x36c   :  { %617 = vmatpush.bf16.msrb.mxu1 %v2032_v11 }
 0x3e4   :  { %v283_v30 = vpop.f32.mrf.mxu1 }
 0x3e5   :  { %v287_v31 = vadd.f32 %v283_v30, %v2002_v1 }
 0x3e7   :  { %v2167_v32 = vadd.f32 %v289_v29, %v287_v31 }
 0x3e9   :  { %321 = vperm.xlu2 %1783, %v2167_v32   ;;  %315 = vperm.xlu1 %1782, %v2167_v32  }
 0x3ea   :  { %309 = vperm.xlu0 %1777, %v2167_v32  }
 0x3ec   :  { %v285_v33 = vpop.f32.mrf.mxu1 }
 0x3f1   :  { %1785 = vset.pattern.permute.xlu1 %v1954_v5  ;;  %1786 = vset.pattern.permute.xlu2 %v1951_v2 }
 0x3f2   :  { %1784 = vset.pattern.permute.xlu0 %v1953_v4  ;;  %535 = vperm.xlu1 %1785, %v1997_v0  }
 0x3f3   :  { %327 = vperm.xlu0 %1784, %v2167_v32  }
 0x3fa   :  { %1787 = vset.pattern.permute.xlu1 %v1952_v3 }
 0x443   :  { %v322_v43 = vpop.permute.xlu2 %321 }
 0x444   :  { %v324_v45 = vmul.f32 %v2071_v19, %v322_v43  ;;  %v488_v43 = vstv %s347_s5  ;;  %s573_s5 = smul.f32 -0.29080933, %s2270_s19 }
 0x45b   :  { %v316_v39 = vpop.permute.xlu1 %315 }
 0x45c   :  { %v310_v38 = vpop.permute.xlu0 %309  ;;  %v318_v42 = vmul.f32 %v2066_v18, %v316_v39 }
 0x45d   :  { %v312_v40 = vmul.f32 %v2061_v17, %v310_v38 }
 0x45f   :  { %v313_v41 = vadd.f32 %v312_v40, %v307_v37 }
 0x461   :  { %v319_v44 = vadd.f32 %v318_v42, %v313_v41  ;;  %v490_v42 = vstv %s348_s6  ;;  %s577_s6 = smul.f32 0.2784091, %s2270_s19 }
 0x463   :  { %v325_v47 = vadd.f32 %v324_v45, %v319_v44 }
 0x465   :  { %v328_v46 = vpop.permute.xlu0 %327 }
 0x466   :  { %v330_v48 = vmul.f32 %v2078_v24, %v328_v46 }
 0x468   :  { %v331_v49 = vadd.f32 %v330_v48, %v325_v47 }
 0x46a   :  { %1829 = vtanh.f32 %v331_v49 }
 0x470   :  { %v2184_v50 = vpop.eup %1829 }
 0x471   :  { %v353_v51 = vpack.c.bf16 %v2184_v50, %v2184_v50  ;;  %v489_v47 = vmul.f32 %v2184_v50, %v488_v43 }
 0x473   :  { %1715 = vmatmul.msk.bf16.vlgmr.msrb.gmra.mxu2 %vm121_vm0, %v353_v51  ;;  %v421_v51 = vstv %s337_s7  ;;  %s582_s7 = smul.f32 -0.3223762, %s2270_s19 }
 0x474   :  { %640 = vmatpush.bf16.msrb.mxu2 %v2026_v9 }
 0x478   :  { %641 = vmatpush.bf16.msrb.mxu2 %v2032_v11 }
 0x4f6   :  { %v366_v52 = vpop.f32.mrf.mxu2 }
 0x4f7   :  { %v367_v54 = vadd.f32 %v2099_v35, %v366_v52  ;;  %v448_v52 = vstv %s340_s8  ;;  %s578_s8 = smul.f32 -0.27353132, %s2270_s19 }
 0x4f9   :  { %v371_v55 = vmul.f32 %v370_v53, %v367_v54  ;;  %v392_v8 = vmul.f32 %v391_v60, %v367_v54  ;;  %v416_v10 = vmul.f32 %v415_v61, %v367_v54  ;;  %v443_v12 = vmul.f32 %v442_v63, %v367_v54 }
 0x4fa   :  { %v473_v13 = vmul.f32 %v472_v6, %v367_v54  ;;  %v478_v53 = vstv %s344_s9  ;;  %v493_v61 = vstv %s349_s10  ;;  %s583_s9 = smul.f32 0.13095239, %s2270_s19  ;;  %s2337_s10 = sld [smem:[#allocation2 + $0x4]] }
 0x4fb   :  { %v372_v56 = vadd.f32 %v371_v55, %v331_v49  ;;  %v393_v26 = vadd.f32 %v392_v8, %v331_v49  ;;  %v417_v28 = vadd.f32 %v416_v10, %v331_v49  ;;  %v444_v29 = vadd.f32 %v443_v12, %v331_v49 }
 0x4fc   :  { %v474_v30 = vadd.f32 %v473_v13, %v331_v49  ;;  %v451_v13 = vstv %s341_s11 }
 0x4fd   :  { %1831 = vtanh.f32 %v372_v56 }
 0x4fe   :  { %v368_v57 = vpop.f32.mrf.mxu2 }
 0x500   :  { %s2341_s11 = ssub.f32 %s2337_s10, %s2266_s18 }
 0x502   :  { %s806_s18 = smul.f32 2.8462753, %s2341_s11 }
 0x503   :  { %v1832_v58 = vpop.eup %1831 }
 0x504   :  { %v374_v59 = vpack.c.bf16 %v1832_v58, %v1832_v58 }
 0x506   :  { %1716 = vmatmul.msk.bf16.vlgmr.msrb.gmra.mxu3 %vm121_vm0, %v374_v59 }
 0x507   :  { %667 = vmatpush.bf16.msrb.mxu3 %v2026_v9 }
 0x50b   :  { %668 = vmatpush.bf16.msrb.mxu3 %v2032_v11 }
 0x589   :  { %v387_v16 = vpop.f32.mrf.mxu3 }
 0x58a   :  { %v388_v25 = vadd.f32 %v2099_v35, %v387_v16  ;;  %v481_v16 = vstv %s345_s12  ;;  %s796_s12 = smul.f32 0.2, %s2341_s11 }
 0x58c   :  { %v395_v31 = vmul.f32 %v394_v20, %v388_v25  ;;  %v419_v33 = vmul.f32 %v418_v21, %v388_v25  ;;  %v446_v34 = vmul.f32 %v445_v22, %v388_v25  ;;  %v476_v36 = vmul.f32 %v475_v23, %v388_v25 }
 0x58e   :  { %v396_v37 = vadd.f32 %v395_v31, %v393_v26  ;;  %v420_v38 = vadd.f32 %v419_v33, %v417_v28  ;;  %v447_v39 = vadd.f32 %v446_v34, %v444_v29  ;;  %v477_v40 = vadd.f32 %v476_v36, %v474_v30 }
 0x58f   :  { %v496_v28 = vstv %s350_s13  ;;  %v484_v36 = vstv %s346_s14  ;;  %s797_s13 = smul.f32 0.075, %s2341_s11 }
 0x590   :  { %1833 = vtanh.f32 %v396_v37  ;;  %s799_s14 = smul.f32 0.9777778, %s2341_s11 }
 0x591   :  { %v389_v41 = vpop.f32.mrf.mxu3 }
 0x592   :  { %v499_v41 = vstv %s351_s16  ;;  %s802_s16 = smul.f32 2.9525986, %s2341_s11 }
 0x596   :  { %v1834_v44 = vpop.eup %1833 }
 0x597   :  { %v491_v45 = vmul.f32 %v1834_v44, %v490_v42  ;;  %v398_v46 = vpack.c.bf16 %v1834_v44, %v1834_v44 }
 0x599   :  { %1717 = vmatmul.msk.bf16.vlgmr.msra.gmra.mxu0 %vm121_vm0, %v398_v46  ;;  %v492_v48 = vadd.f32 %v491_v45, %v489_v47  ;;  %v520_v46 = vstv %s2195_s1  ;;  %s566_s1 = smul.f32 0.225, %s2270_s19 }
 0x59a   :  { %697 = vmatpush.bf16.msra.mxu0 %v2026_v9  ;;  %v521_v47 = vmul.f32 %v2162_v27, %v520_v46 }
 0x59e   :  { %698 = vmatpush.bf16.msra.mxu0 %v2032_v11 }
 0x616   :  { %v411_v49 = vpop.f32.mrf.mxu0 }
 0x617   :  { %v412_v54 = vadd.f32 %v2099_v35, %v411_v49 }
 0x619   :  { %v422_v55 = vmul.f32 %v421_v51, %v412_v54  ;;  %v449_v56 = vmul.f32 %v448_v52, %v412_v54  ;;  %v479_v50 = vmul.f32 %v478_v53, %v412_v54  ;;  %v536_v53 = vpop.permute.xlu1 %535 }
 0x61b   :  { %v423_v57 = vadd.f32 %v422_v55, %v420_v38  ;;  %v450_v58 = vadd.f32 %v449_v56, %v447_v39  ;;  %v480_v59 = vadd.f32 %v479_v50, %v477_v40  ;;  %v538_v55 = vmul.f32 %v2050_v14, %v536_v53 }
 0x61d   :  { %1835 = vtanh.f32 %v423_v57  ;;  %v539_v56 = vadd.f32 %v2055_v15, %v538_v55 }
 0x61e   :  { %v413_v60 = vpop.f32.mrf.mxu0 }
 0x623   :  { %v1836_v63 = vpop.eup %1835 }
 0x624   :  { %v494_v6 = vmul.f32 %v1836_v63, %v493_v61  ;;  %v425_v8 = vpack.c.bf16 %v1836_v63, %v1836_v63 }
 0x626   :  { %1718 = vmatmul.msk.bf16.vlgmr.msra.gmra.mxu1 %vm121_vm0, %v425_v8  ;;  %v495_v10 = vadd.f32 %v494_v6, %v492_v48 }
 0x627   :  { %744 = vmatpush.bf16.msra.mxu1 %v2137_v62 }
 0x62b   :  { %745 = vmatpush.bf16.msra.mxu1 %v2146_v7 }
 0x6a3   :  { %v438_v12 = vpop.f32.mrf.mxu1 }
 0x6a4   :  { %v439_v20 = vadd.f32 %v2099_v35, %v438_v12 }
 0x6a6   :  { %v452_v21 = vmul.f32 %v451_v13, %v439_v20  ;;  %v482_v22 = vmul.f32 %v481_v16, %v439_v20  ;;  %v602_v20 = vstv %s564_s20  ;;  %s800_s20 = smul.f32 -3.7333333, %s2341_s11 }
 0x6a8   :  { %v453_v23 = vadd.f32 %v452_v21, %v450_v58  ;;  %v483_v25 = vadd.f32 %v482_v22, %v480_v59 }
 0x6aa   :  { %1837 = vtanh.f32 %v453_v23 }
 0x6ab   :  { %v440_v26 = vpop.f32.mrf.mxu1 }
 0x6b0   :  { %v1838_v29 = vpop.eup %1837 }
 0x6b1   :  { %v497_v30 = vmul.f32 %v1838_v29, %v496_v28  ;;  %v455_v31 = vpack.c.bf16 %v1838_v29, %v1838_v29  ;;  %v623_v29 = vstv %s565_s21  ;;  %s803_s21 = smul.f32 -11.595794, %s2341_s11 }
 0x6b3   :  { %v498_v33 = vadd.f32 %v497_v30, %v495_v10  ;;  %1719 = vmatmul.msk.bf16.vlgmr.msra.gmra.mxu2 %vm121_vm0, %v455_v31  ;;  %v647_v30 = vstv %s567_s22  ;;  %v674_v31 = vstv %s570_s0  ;;  %s807_s22 = smul.f32 -10.757576, %s2341_s11 }
 0x6b4   :  { %827 = vmatpush.bf16.msra.mxu2 %v2026_v9 }
 0x6b8   :  { %828 = vmatpush.bf16.msra.mxu2 %v2032_v11 }
 0x736   :  { %v468_v34 = vpop.f32.mrf.mxu2 }
 0x737   :  { %v469_v37 = vadd.f32 %v2099_v35, %v468_v34 }
 0x739   :  { %v485_v38 = vmul.f32 %v484_v36, %v469_v37 }
 0x73b   :  { %v486_v39 = vadd.f32 %v485_v38, %v483_v25 }
 0x73d   :  { %1839 = vtanh.f32 %v486_v39 }
 0x73e   :  { %v470_v40 = vpop.f32.mrf.mxu2 }
 0x73f   :  { %v626_v40 = vstv %s566_s1  ;;  %s811_s1 = smul.f32 0.091145836, %s2341_s11 }
 0x743   :  { %v1840_v42 = vpop.eup %1839 }
 0x744   :  { %v500_v43 = vmul.f32 %v1840_v42, %v499_v41  ;;  %v650_v41 = vstv %s568_s23  ;;  %v677_v42 = vstv %s571_s15  ;;  %s812_s23 = smul.f32 0.4492363, %s2341_s11 }
 0x745   :  { %s801_s15 = smul.f32 3.5555556, %s2341_s11 }
 0x746   :  { %v501_v44 = vadd.f32 %v500_v43, %v498_v33  ;;  %v704_v33 = vstv %s574_s17  ;;  %v707_v43 = vstv %s575_s24  ;;  %s804_s24 = smul.f32 9.822893, %s2341_s11  ;;  %s2456_s17 = sld [smem:[#allocation2 + $0x5]] }
 0x748   :  { %v502_v45 = vpack.c.bf16 %v501_v44, %v501_v44 }
 0x74a   :  { %1720 = vmatmul.msk.bf16.vlgmr.msra.gmra.mxu3 %vm121_vm0, %v502_v45 }
 0x74b   :  { %848 = vmatpush.bf16.msra.mxu3 %v2026_v9 }
 0x74f   :  { %849 = vmatpush.bf16.msra.mxu3 %v2032_v11 }
 0x7cd   :  { %v515_v48 = vpop.f32.mrf.mxu3 }
 0x7ce   :  { %v519_v49 = vadd.f32 %v515_v48, %v2167_v32 }
 0x7d0   :  { %v2241_v51 = vadd.f32 %v521_v47, %v519_v49 }
 0x7d2   :  { %559 = vperm.xlu0 %1784, %v2241_v51   ;;  %547 = vperm.xlu1 %1787, %v2241_v51  }
 0x7d3   :  { %541 = vperm.xlu2 %1786, %v2241_v51  }
 0x7d5   :  { %v517_v52 = vpop.f32.mrf.mxu3 }
 0x7da   :  { %1789 = vset.pattern.permute.xlu1 %v1953_v4  ;;  %1791 = vset.pattern.permute.xlu0 %v1952_v3 }
 0x7db   :  { %1788 = vset.pattern.permute.xlu2 %v1954_v5  ;;  %767 = vperm.xlu1 %1789, %v1997_v0  }
 0x7dc   :  { %553 = vperm.xlu2 %1788, %v2241_v51  }
 0x7e3   :  { %1792 = vset.pattern.permute.xlu1 %v1954_v5 }
 0x7e4   :  { %1790 = vset.pattern.permute.xlu2 %v1951_v2 }
 0x82d   :  { %v542_v54 = vpop.permute.xlu2 %541 }
 0x82e   :  { %v544_v50 = vmul.f32 %v2061_v17, %v542_v54 }
 0x830   :  { %v545_v59 = vadd.f32 %v544_v50, %v539_v56 }
 0x836   :  { %v554_v57 = vpop.permute.xlu2 %553 }
 0x837   :  { %v556_v61 = vmul.f32 %v2071_v19, %v554_v57 }
 0x844   :  { %v548_v58 = vpop.permute.xlu1 %547  ;;  %v560_v60 = vpop.permute.xlu0 %559 }
 0x845   :  { %v550_v0 = vmul.f32 %v2066_v18, %v548_v58  ;;  %v562_v6 = vmul.f32 %v2078_v24, %v560_v60 }
 0x847   :  { %v551_v63 = vadd.f32 %v550_v0, %v545_v59  ;;  %v722_v59 = vstv %s580_s26  ;;  %v720_v0 = vstv %s579_s25  ;;  %s808_s25 = smul.f32 8.906423, %s2341_s11 }
 0x848   :  { %s813_s26 = smul.f32 0.6510417, %s2341_s11 }
 0x849   :  { %v557_v8 = vadd.f32 %v556_v61, %v551_v63 }
 0x84b   :  { %v563_v10 = vadd.f32 %v562_v6, %v557_v8 }
 0x84d   :  { %1841 = vtanh.f32 %v563_v10 }
 0x853   :  { %v2259_v12 = vpop.eup %1841 }
 0x854   :  { %v585_v13 = vpack.c.bf16 %v2259_v12, %v2259_v12  ;;  %v721_v6 = vmul.f32 %v2259_v12, %v720_v0 }
 0x856   :  { %1723 = vmatmul.msk.bf16.vlgmr.msrb.gmra.mxu0 %vm121_vm0, %v585_v13  ;;  %v653_v13 = vstv %s569_s27  ;;  %s805_s27 = smul.f32 -0.29080933, %s2341_s11 }
 0x857   :  { %872 = vmatpush.bf16.msrb.mxu0 %v2026_v9 }
 0x85b   :  { %873 = vmatpush.bf16.msrb.mxu0 %v2032_v11 }
 0x8d3   :  { %v598_v16 = vpop.f32.mrf.mxu0 }
 0x8d4   :  { %v599_v21 = vadd.f32 %v2099_v35, %v598_v16  ;;  %v680_v16 = vstv %s572_s28  ;;  %s809_s28 = smul.f32 0.2784091, %s2341_s11 }
 0x8d6   :  { %v603_v22 = vmul.f32 %v602_v20, %v599_v21  ;;  %v624_v34 = vmul.f32 %v623_v29, %v599_v21  ;;  %v648_v36 = vmul.f32 %v647_v30, %v599_v21  ;;  %v675_v37 = vmul.f32 %v674_v31, %v599_v21 }
 0x8d7   :  { %v705_v38 = vmul.f32 %v704_v33, %v599_v21  ;;  %v710_v20 = vstv %s576_s29  ;;  %v725_v30 = vstv %s581_s30  ;;  %s814_s29 = smul.f32 -0.3223762, %s2341_s11 }
 0x8d8   :  { %v604_v23 = vadd.f32 %v603_v22, %v563_v10  ;;  %v625_v45 = vadd.f32 %v624_v34, %v563_v10  ;;  %v649_v46 = vadd.f32 %v648_v36, %v563_v10  ;;  %v676_v47 = vadd.f32 %v675_v37, %v563_v10 }
 0x8d9   :  { %v706_v48 = vadd.f32 %v705_v38, %v563_v10  ;;  %v683_v38 = vstv %s573_s5 }
 0x8da   :  { %1843 = vtanh.f32 %v604_v23 }
 0x8db   :  { %v600_v25 = vpop.f32.mrf.mxu0 }
 0x8e0   :  { %v1844_v26 = vpop.eup %1843 }
 0x8e1   :  { %v606_v28 = vpack.c.bf16 %v1844_v26, %v1844_v26 }
 0x8e3   :  { %1724 = vmatmul.msk.bf16.vlgmr.msrb.gmra.mxu1 %vm121_vm0, %v606_v28 }
 0x8e4   :  { %899 = vmatpush.bf16.msrb.mxu1 %v2026_v9 }
 0x8e8   :  { %900 = vmatpush.bf16.msrb.mxu1 %v2032_v11 }
 0x960   :  { %v619_v39 = vpop.f32.mrf.mxu1 }
 0x961   :  { %v620_v44 = vadd.f32 %v2099_v35, %v619_v39  ;;  %v713_v39 = vstv %s577_s6  ;;  %s810_s6 = smul.f32 -0.27353132, %s2341_s11 }
 0x963   :  { %v627_v49 = vmul.f32 %v626_v40, %v620_v44  ;;  %v651_v52 = vmul.f32 %v650_v41, %v620_v44  ;;  %v678_v53 = vmul.f32 %v677_v42, %v620_v44  ;;  %v708_v54 = vmul.f32 %v707_v43, %v620_v44 }
 0x965   :  { %v628_v55 = vadd.f32 %v627_v49, %v625_v45  ;;  %v652_v56 = vadd.f32 %v651_v52, %v649_v46  ;;  %v679_v50 = vadd.f32 %v678_v53, %v676_v47  ;;  %v709_v57 = vadd.f32 %v708_v54, %v706_v48 }
 0x966   :  { %v728_v46 = vstv %s582_s7  ;;  %v716_v54 = vstv %s578_s8  ;;  %s815_s7 = smul.f32 0.13095239, %s2341_s11  ;;  %s1959_s8 = smov 16  }
 0x967   :  { %1845 = vtanh.f32 %v628_v55 }
 0x968   :  { %v621_v58 = vpop.f32.mrf.mxu1 }
 0x969   :  { %v731_v58 = vstv %s583_s9 }
 0x96d   :  { %v1846_v60 = vpop.eup %1845 }
 0x96e   :  { %v723_v61 = vmul.f32 %v1846_v60, %v722_v59  ;;  %v630_v63 = vpack.c.bf16 %v1846_v60, %v1846_v60 }
 0x970   :  { %1725 = vmatmul.msk.bf16.vlgmr.msrb.gmra.mxu2 %vm121_vm0, %v630_v63  ;;  %v724_v8 = vadd.f32 %v723_v61, %v721_v6  ;;  %v752_v63 = vstv %s2270_s19  ;;  %s798_s19 = smul.f32 0.225, %s2341_s11 }
 0x971   :  { %929 = vmatpush.bf16.msrb.mxu2 %v2026_v9  ;;  %v753_v6 = vmul.f32 %v2162_v27, %v752_v63 }
 0x975   :  { %930 = vmatpush.bf16.msrb.mxu2 %v2032_v11 }
 0x9f3   :  { %v643_v10 = vpop.f32.mrf.mxu2 }
 0x9f4   :  { %v644_v21 = vadd.f32 %v2099_v35, %v643_v10 }
 0x9f6   :  { %v654_v22 = vmul.f32 %v653_v13, %v644_v21  ;;  %v681_v23 = vmul.f32 %v680_v16, %v644_v21  ;;  %v711_v12 = vmul.f32 %v710_v20, %v644_v21  ;;  %v768_v20 = vpop.permute.xlu1 %767 }
 0x9f8   :  { %v655_v25 = vadd.f32 %v654_v22, %v652_v56  ;;  %v682_v26 = vadd.f32 %v681_v23, %v679_v50  ;;  %v712_v28 = vadd.f32 %v711_v12, %v709_v57  ;;  %v770_v22 = vmul.f32 %v2050_v14, %v768_v20 }
 0x9fa   :  { %1847 = vtanh.f32 %v655_v25  ;;  %v771_v23 = vadd.f32 %v2055_v15, %v770_v22  ;;  %v954_v22 = vstv %s812_s23 }
 0x9fb   :  { %v645_v29 = vpop.f32.mrf.mxu2 }
 0xa00   :  { %v1848_v31 = vpop.eup %1847 }
 0xa01   :  { %v726_v33 = vmul.f32 %v1848_v31, %v725_v30  ;;  %v657_v34 = vpack.c.bf16 %v1848_v31, %v1848_v31 }
 0xa03   :  { %1726 = vmatmul.msk.bf16.vlgmr.msrb.gmra.mxu3 %vm121_vm0, %v657_v34  ;;  %v727_v36 = vadd.f32 %v726_v33, %v724_v8 }
 0xa04   :  { %976 = vmatpush.bf16.msrb.mxu3 %v2137_v62 }
 0xa08   :  { %977 = vmatpush.bf16.msrb.mxu3 %v2146_v7 }
 0xa86   :  { %v670_v37 = vpop.f32.mrf.mxu3 }
 0xa87   :  { %v671_v40 = vadd.f32 %v2099_v35, %v670_v37 }
 0xa89   :  { %v684_v41 = vmul.f32 %v683_v38, %v671_v40  ;;  %v714_v42 = vmul.f32 %v713_v39, %v671_v40 }
 0xa8b   :  { %v685_v43 = vadd.f32 %v684_v41, %v682_v26  ;;  %v715_v44 = vadd.f32 %v714_v42, %v712_v28  ;;  %v879_v42 = vstv %s799_s14 }
 0xa8d   :  { %1849 = vtanh.f32 %v685_v43  ;;  %v906_v43 = vstv %s802_s16 }
 0xa8e   :  { %v672_v45 = vpop.f32.mrf.mxu3 }
 0xa93   :  { %v1850_v47 = vpop.eup %1849 }
 0xa94   :  { %v729_v48 = vmul.f32 %v1850_v47, %v728_v46  ;;  %v687_v49 = vpack.c.bf16 %v1850_v47, %v1850_v47 }
 0xa96   :  { %v730_v52 = vadd.f32 %v729_v48, %v727_v36  ;;  %1727 = vmatmul.msk.bf16.vlgmr.msra.gmra.mxu0 %vm121_vm0, %v687_v49 }
 0xa97   :  { %1059 = vmatpush.bf16.msra.mxu0 %v2026_v9 }
 0xa9b   :  { %1060 = vmatpush.bf16.msra.mxu0 %v2032_v11 }
 0xb13   :  { %v700_v53 = vpop.f32.mrf.mxu0 }
 0xb14   :  { %v701_v55 = vadd.f32 %v2099_v35, %v700_v53  ;;  %v882_v53 = vstv %s800_s20 }
 0xb16   :  { %v717_v56 = vmul.f32 %v716_v54, %v701_v55  ;;  %v909_v54 = vstv %s803_s21  ;;  %v939_v55 = vstv %s807_s22 }
 0xb18   :  { %v718_v50 = vadd.f32 %v717_v56, %v715_v44  ;;  %v936_v44 = vstv %s806_s18  ;;  %v2359_v56 = vld [vmem:[%s2653_s3 + $0x28] ss:$0 sm:$0xff] }
 0xb1a   :  { %1851 = vtanh.f32 %v718_v50 }
 0xb1b   :  { %v702_v57 = vpop.f32.mrf.mxu0 }
 0xb20   :  { %v1852_v59 = vpop.eup %1851 }
 0xb21   :  { %v732_v0 = vmul.f32 %v1852_v59, %v731_v58 }
 0xb23   :  { %v733_v60 = vadd.f32 %v732_v0, %v730_v52  ;;  %v858_v52 = vstv %s798_s19  ;;  %s2535_s19 = sld [smem:[#allocation2 + $0x6]] }
 0xb25   :  { %v734_v61 = vpack.c.bf16 %v733_v60, %v733_v60 }
 0xb27   :  { %1728 = vmatmul.msk.bf16.vlgmr.msra.gmra.mxu1 %vm121_vm0, %v734_v61 }
 0xb28   :  { %1080 = vmatpush.bf16.msra.mxu1 %v2026_v9 }
 0xb29   :  { %s2539_s20 = ssub.f32 %s2535_s19, %s2456_s17 }
 0xb2b   :  { %s1260_s21 = smul.f32 0.2, %s2539_s20 }
 0xb2c   :  { %1081 = vmatpush.bf16.msra.mxu1 %v2032_v11  ;;  %s1261_s22 = smul.f32 0.075, %s2539_s20 }
 0xb2d   :  { %s1263_s0 = smul.f32 0.9777778, %s2539_s20 }
 0xba4   :  { %v747_v8 = vpop.f32.mrf.mxu1 }
 0xba5   :  { %v751_v10 = vadd.f32 %v747_v8, %v2241_v51 }
 0xba7   :  { %v2316_v13 = vadd.f32 %v753_v6, %v751_v10 }
 0xba9   :  { %785 = vperm.xlu1 %1792, %v2316_v13   ;;  %779 = vperm.xlu0 %1791, %v2316_v13  }
 0xbaa   :  { %773 = vperm.xlu2 %1790, %v2316_v13  }
 0xbac   :  { %v749_v16 = vpop.f32.mrf.mxu1 }
 0xbb2   :  { %1793 = vset.pattern.permute.xlu2 %v1953_v4 }
 0xbb3   :  { %791 = vperm.xlu2 %1793, %v2316_v13  }
 0xbbb   :  { %1795 = vset.pattern.permute.xlu2 %v1951_v2 }
 0xc04   :  { %v774_v21 = vpop.permute.xlu2 %773 }
 0xc05   :  { %v776_v12 = vmul.f32 %v2061_v17, %v774_v21 }
 0xc07   :  { %v777_v28 = vadd.f32 %v776_v12, %v771_v23  ;;  %v952_v23 = vstv %s811_s1  ;;  %s2460_s1 = ssub.f32 %s2456_s17, %s2337_s10  ;;  %s1266_s17 = smul.f32 2.9525986, %s2539_s20 }
 0xc09   :  { %s1028_s23 = smul.f32 0.2, %s2460_s1 }
 0xc0a   :  { %s1029_s10 = smul.f32 0.075, %s2460_s1 }
 0xc0b   :  { %s1043_s30 = smul.f32 0.091145836, %s2460_s1 }
 0xc0c   :  { %s1044_s5 = smul.f32 0.4492363, %s2460_s1 }
 0xc0d   :  { %v792_v30 = vpop.permute.xlu2 %791  ;;  %s1037_s9 = smul.f32 -0.29080933, %s2460_s1 }
 0xc0e   :  { %v794_v34 = vmul.f32 %v2078_v24, %v792_v30  ;;  %s1047_s14 = smul.f32 0.13095239, %s2460_s1 }
 0xc1b   :  { %v786_v25 = vpop.permute.xlu1 %785  ;;  %v780_v26 = vpop.permute.xlu0 %779 }
 0xc1c   :  { %v782_v29 = vmul.f32 %v2066_v18, %v780_v26  ;;  %v788_v31 = vmul.f32 %v2071_v19, %v786_v25  ;;  %v834_v18 = vstv %s796_s12  ;;  %s1046_s12 = smul.f32 -0.3223762, %s2460_s1 }
 0xc1e   :  { %v783_v33 = vadd.f32 %v782_v29, %v777_v28 }
 0xc20   :  { %v789_v36 = vadd.f32 %v788_v31, %v783_v33  ;;  %v885_v31 = vstv %s801_s15  ;;  %v912_v33 = vstv %s804_s24  ;;  %s1031_s15 = smul.f32 0.9777778, %s2460_s1 }
 0xc21   :  { %s1034_s24 = smul.f32 2.9525986, %s2460_s1 }
 0xc22   :  { %v795_v37 = vadd.f32 %v794_v34, %v789_v36  ;;  %v942_v34 = vstv %s808_s25  ;;  %s1038_s25 = smul.f32 2.8462753, %s2460_s1 }
 0xc24   :  { %1853 = vtanh.f32 %v795_v37 }
 0xc2a   :  { %v2330_v14 = vpop.eup %1853 }
 0xc2b   :  { %v817_v15 = vpack.c.bf16 %v2330_v14, %v2330_v14  ;;  %v953_v28 = vmul.f32 %v2330_v14, %v952_v23  ;;  %v984_v23 = vstv %s2341_s11  ;;  %s1041_s11 = smul.f32 0.2784091, %s2460_s1 }
 0xc2d   :  { %1731 = vmatmul.msk.bf16.vlgmr.msra.gmra.mxu2 %vm121_vm0, %v817_v15 }
 0xc2e   :  { %1104 = vmatpush.bf16.msra.mxu2 %v2026_v9 }
 0xc32   :  { %1105 = vmatpush.bf16.msra.mxu2 %v2032_v11 }
 0xcb0   :  { %v830_v17 = vpop.f32.mrf.mxu2 }
 0xcb1   :  { %v831_v19 = vadd.f32 %v2099_v35, %v830_v17  ;;  %v855_v35 = vstv %s797_s13  ;;  %s1042_s13 = smul.f32 -0.27353132, %s2460_s1 }
 0xcb3   :  { %v835_v24 = vmul.f32 %v834_v18, %v831_v19  ;;  %v856_v45 = vmul.f32 %v855_v35, %v831_v19  ;;  %v880_v46 = vmul.f32 %v879_v42, %v831_v19  ;;  %v907_v47 = vmul.f32 %v906_v43, %v831_v19 }
 0xcb4   :  { %v937_v48 = vmul.f32 %v936_v44, %v831_v19  ;;  %v915_v43 = vstv %s805_s27  ;;  %v945_v44 = vstv %s809_s28  ;;  %s1032_s27 = smul.f32 -3.7333333, %s2460_s1 }
 0xcb5   :  { %v836_v38 = vadd.f32 %v835_v24, %v795_v37  ;;  %v857_v57 = vadd.f32 %v856_v45, %v795_v37  ;;  %v881_v58 = vadd.f32 %v880_v46, %v795_v37  ;;  %v908_v59 = vadd.f32 %v907_v47, %v795_v37  ;;  %s1035_s28 = smul.f32 -11.595794, %s2460_s1 }
 0xcb6   :  { %v938_v0 = vadd.f32 %v937_v48, %v795_v37 }
 0xcb7   :  { %1855 = vtanh.f32 %v836_v38  ;;  %v957_v38 = vstv %s813_s26  ;;  %s1030_s26 = smul.f32 0.225, %s2460_s1 }
 0xcb8   :  { %v832_v39 = vpop.f32.mrf.mxu2 }
 0xcbd   :  { %v1856_v40 = vpop.eup %1855 }
 0xcbe   :  { %v838_v41 = vpack.c.bf16 %v1856_v40, %v1856_v40 }
 0xcc0   :  { %1732 = vmatmul.msk.bf16.vlgmr.msra.gmra.mxu3 %vm121_vm0, %v838_v41 }
 0xcc1   :  { %1131 = vmatpush.bf16.msra.mxu3 %v2026_v9 }
 0xcc5   :  { %1132 = vmatpush.bf16.msra.mxu3 %v2032_v11 }
 0xd43   :  { %v851_v49 = vpop.f32.mrf.mxu3 }
 0xd44   :  { %v852_v50 = vadd.f32 %v2359_v56, %v851_v49 }
 0xd46   :  { %v859_v60 = vmul.f32 %v858_v52, %v852_v50  ;;  %v883_v61 = vmul.f32 %v882_v53, %v852_v50  ;;  %v910_v63 = vmul.f32 %v909_v54, %v852_v50  ;;  %v940_v6 = vmul.f32 %v939_v55, %v852_v50 }
 0xd47   :  { %v960_v53 = vstv %s814_s29  ;;  %s1039_s29 = smul.f32 -10.757576, %s2460_s1 }
 0xd48   :  { %v860_v8 = vadd.f32 %v859_v60, %v857_v57  ;;  %v884_v10 = vadd.f32 %v883_v61, %v881_v58  ;;  %v911_v16 = vadd.f32 %v910_v63, %v908_v59  ;;  %v941_v20 = vadd.f32 %v940_v6, %v938_v0  ;;  %v996_v58 = vld [vmem:[%s2652_s2] sm:$0xff]  ;;  %s1958_s2 = smov 4  }
 0xd49   :  { %v1955_v59 = vmov 4   ;;  %v948_v60 = vstv %s810_s6  ;;  %s1033_s6 = smul.f32 3.5555556, %s2460_s1 }
 0xd4a   :  { %1857 = vtanh.f32 %v860_v8  ;;  %1794 = vset.pattern.permute.xlu1 %v1955_v59 }
 0xd4b   :  { %v853_v21 = vpop.f32.mrf.mxu3  ;;  %999 = vperm.xlu1 %1794, %v996_v58  }
 0xd50   :  { %v1858_v12 = vpop.eup %1857 }
 0xd51   :  { %v955_v25 = vmul.f32 %v1858_v12, %v954_v22  ;;  %v862_v26 = vpack.c.bf16 %v1858_v12, %v1858_v12  ;;  %v985_v12 = vmul.f32 %v2162_v27, %v984_v23  ;;  %v1957_v27 = vmov 6  }
 0xd52   :  { %v1141_v23 = vstv %s1035_s28  ;;  %s1268_s28 = smul.f32 9.822893, %s2539_s20 }
 0xd53   :  { %1733 = vmatmul.msk.bf16.vlgmr.msrb.gmra.mxu0 %vm121_vm0, %v862_v26  ;;  %v956_v29 = vadd.f32 %v955_v25, %v953_v28  ;;  %1796 = vset.pattern.permute.xlu1 %v1954_v5 }
 0xd54   :  { %1161 = vmatpush.bf16.msrb.mxu0 %v2026_v9 }
 0xd58   :  { %1162 = vmatpush.bf16.msrb.mxu0 %v2032_v11 }
 0xdd0   :  { %v875_v30 = vpop.f32.mrf.mxu0 }
 0xdd1   :  { %v876_v36 = vadd.f32 %v2359_v56, %v875_v30  ;;  %v1956_v30 = vmov 5  }
 0xdd3   :  { %v886_v37 = vmul.f32 %v885_v31, %v876_v36  ;;  %v913_v15 = vmul.f32 %v912_v33, %v876_v36  ;;  %v943_v14 = vmul.f32 %v942_v34, %v876_v36  ;;  %v1000_v31 = vpop.permute.xlu1 %999  ;;  %v2412_v34 = vld [vmem:[%s2653_s3 + $0x4] ss:$0 sm:$0xff] }
 0xdd4   :  { %v1002_v36 = vmul.f32 %v2412_v34, %v1000_v31 }
 0xdd5   :  { %v887_v17 = vadd.f32 %v886_v37, %v884_v10  ;;  %v914_v18 = vadd.f32 %v913_v15, %v911_v16  ;;  %v944_v19 = vadd.f32 %v943_v14, %v941_v20  ;;  %v963_v10 = vstv %s815_s7  ;;  %v2424_v15 = vld [vmem:[%s2653_s3] ss:$0 sm:$0xff]  ;;  %s1036_s7 = smul.f32 9.822893, %s2460_s1 }
 0xdd7   :  { %1859 = vtanh.f32 %v887_v17 }
 0xdd8   :  { %v877_v24 = vpop.f32.mrf.mxu0 }
 0xddd   :  { %v1860_v39 = vpop.eup %1859 }
 0xdde   :  { %v958_v40 = vmul.f32 %v1860_v39, %v957_v38  ;;  %v889_v41 = vpack.c.bf16 %v1860_v39, %v1860_v39  ;;  %v2436_v39 = vld [vmem:[%s2653_s3 + $0x2] ss:$0 sm:$0xff] }
 0xde0   :  { %1734 = vmatmul.msk.bf16.vlgmr.msrb.gmra.mxu1 %vm121_vm0, %v889_v41  ;;  %v959_v35 = vadd.f32 %v958_v40, %v956_v29 }
 0xde1   :  { %1208 = vmatpush.bf16.msrb.mxu1 %v2137_v62 }
 0xde5   :  { %1209 = vmatpush.bf16.msrb.mxu1 %v2146_v7 }
 0xe5d   :  { %v902_v42 = vpop.f32.mrf.mxu1 }
 0xe5e   :  { %v903_v45 = vadd.f32 %v2359_v56, %v902_v42 }
 0xe60   :  { %v916_v46 = vmul.f32 %v915_v43, %v903_v45  ;;  %v946_v47 = vmul.f32 %v945_v44, %v903_v45 }
 0xe62   :  { %v917_v48 = vadd.f32 %v916_v46, %v914_v18  ;;  %v947_v49 = vadd.f32 %v946_v47, %v944_v19  ;;  %v2430_v19 = vld [vmem:[%s2653_s3 + $0x1] ss:$0 sm:$0xff] }
 0xe64   :  { %1861 = vtanh.f32 %v917_v48 }
 0xe65   :  { %v904_v52 = vpop.f32.mrf.mxu1 }
 0xe6a   :  { %v1862_v54 = vpop.eup %1861 }
 0xe6b   :  { %v961_v55 = vmul.f32 %v1862_v54, %v960_v53  ;;  %v919_v50 = vpack.c.bf16 %v1862_v54, %v1862_v54  ;;  %v1066_v53 = vstv %s1028_s23  ;;  %s1262_s23 = smul.f32 0.225, %s2539_s20 }
 0xe6d   :  { %v962_v57 = vadd.f32 %v961_v55, %v959_v35  ;;  %1735 = vmatmul.msk.bf16.vlgmr.msrb.gmra.mxu2 %vm121_vm0, %v919_v50  ;;  %v2442_v35 = vld [vmem:[%s2653_s3 + $0x3] ss:$0 sm:$0xff] }
 0xe6e   :  { %1291 = vmatpush.bf16.msrb.mxu2 %v2026_v9 }
 0xe72   :  { %1292 = vmatpush.bf16.msrb.mxu2 %v2032_v11 }
 0xef0   :  { %v932_v0 = vpop.f32.mrf.mxu2 }
 0xef1   :  { %v933_v61 = vadd.f32 %v2359_v56, %v932_v0  ;;  %v1087_v0 = vstv %s1029_s10  ;;  %s1264_s10 = smul.f32 -3.7333333, %s2539_s20 }
 0xef3   :  { %v949_v63 = vmul.f32 %v948_v60, %v933_v61  ;;  %v1111_v60 = vstv %s1031_s15  ;;  %v1138_v61 = vstv %s1034_s24  ;;  %s1267_s15 = smul.f32 -11.595794, %s2539_s20 }
 0xef4   :  { %s1271_s24 = smul.f32 -10.757576, %s2539_s20 }
 0xef5   :  { %v950_v6 = vadd.f32 %v949_v63, %v947_v49  ;;  %v1168_v63 = vstv %s1038_s25  ;;  %s1275_s25 = smul.f32 0.091145836, %s2539_s20 }
 0xef7   :  { %1863 = vtanh.f32 %v950_v6 }
 0xef8   :  { %v934_v8 = vpop.f32.mrf.mxu2 }
 0xefd   :  { %v1864_v16 = vpop.eup %1863 }
 0xefe   :  { %v964_v20 = vmul.f32 %v1864_v16, %v963_v10 }
 0xf00   :  { %v965_v21 = vadd.f32 %v964_v20, %v962_v57 }
 0xf02   :  { %v966_v22 = vpack.c.bf16 %v965_v21, %v965_v21  ;;  %v1090_v21 = vstv %s1030_s26  ;;  %s1276_s26 = smul.f32 0.4492363, %s2539_s20 }
 0xf04   :  { %1736 = vmatmul.msk.bf16.vlgmr.msrb.gmra.mxu3 %vm121_vm0, %v966_v22  ;;  %v1114_v22 = vstv %s1032_s27  ;;  %s1265_s27 = smul.f32 3.5555556, %s2539_s20 }
 0xf05   :  { %1312 = vmatpush.bf16.msrb.mxu3 %v2026_v9 }
 0xf09   :  { %1313 = vmatpush.bf16.msrb.mxu3 %v2032_v11 }
 0xf87   :  { %v979_v25 = vpop.f32.mrf.mxu3 }
 0xf88   :  { %v983_v26 = vadd.f32 %v979_v25, %v2316_v13 }
 0xf8a   :  { %v2396_v28 = vadd.f32 %v985_v12, %v983_v26  ;;  %v1171_v12 = vstv %s1039_s29  ;;  %s1272_s29 = smul.f32 8.906423, %s2539_s20 }
 0xf8c   :  { %1017 = vperm.xlu1 %1796, %v2396_v28   ;;  %1011 = vperm.xlu0 %1791, %v2396_v28  }
 0xf8d   :  { %1005 = vperm.xlu2 %1795, %v2396_v28  }
 0xf8f   :  { %v981_v29 = vpop.f32.mrf.mxu3 }
 0xf94   :  { %1798 = vset.pattern.permute.xlu0 %v1956_v30  ;;  %1799 = vset.pattern.permute.xlu1 %v1951_v2 }
 0xf95   :  { %1797 = vset.pattern.permute.xlu2 %v1953_v4  ;;  %1231 = vperm.xlu0 %1798, %v996_v58  }
 0xf96   :  { %1023 = vperm.xlu2 %1797, %v2396_v28  }
 0xf9d   :  { %1803 = vset.pattern.permute.xlu0 %v1957_v27 }
 0xf9e   :  { %1463 = vperm.xlu0 %1803, %v996_v58   ;;  %1800 = vset.pattern.permute.xlu2 %v1952_v3 }
 0xfa6   :  { %292 = vrot.lane.b32.xlu0 %v2167_v32, %s1958_s2  ;;  %v2418_v32 = vld [vmem:[%s2653_s3 + $0x5] ss:$0 sm:$0xff]  ;;  %s1040_s2 = smul.f32 8.906423, %s2460_s1 }
 0xfa7   :  { %1808 = vset.pattern.permute.xlu0 %v1953_v4  ;;  %v1003_v37 = vadd.f32 %v2418_v32, %v1002_v36 }
 0xfae   :  { %988 = vrot.lane.b32.xlu0 %v2396_v28, %s1959_s8  ;;  %s1045_s8 = smul.f32 0.6510417, %s2460_s1 }
 0xfe7   :  { %v1006_v33 = vpop.permute.xlu2 %1005 }
 0xfe8   :  { %v1008_v1 = vmul.f32 %v2424_v15, %v1006_v33 }
 0xfea   :  { %v1009_v18 = vadd.f32 %v1008_v1, %v1003_v37 }
 0xff0   :  { %v1024_v38 = vpop.permute.xlu2 %1023 }
 0xff1   :  { %v1026_v42 = vmul.f32 %v2442_v35, %v1024_v38  ;;  %v1186_v38 = vstv %s1044_s5  ;;  %s1269_s5 = smul.f32 -0.29080933, %s2539_s20 }
 0xffe   :  { %v1018_v14 = vpop.permute.xlu1 %1017  ;;  %v1012_v17 = vpop.permute.xlu0 %1011 }
 0xfff   :  { %v1014_v24 = vmul.f32 %v2430_v19, %v1012_v17  ;;  %v1020_v40 = vmul.f32 %v2436_v39, %v1018_v14 }
0x1001   :  { %v1015_v41 = vadd.f32 %v1014_v24, %v1009_v18 }
0x1003   :  { %v1021_v43 = vadd.f32 %v1020_v40, %v1015_v41  ;;  %v1184_v40 = vstv %s1043_s30  ;;  %s1277_s30 = smul.f32 0.6510417, %s2539_s20 }
0x1005   :  { %v1027_v44 = vadd.f32 %v1026_v42, %v1021_v43 }
0x1007   :  { %v2445_v45 = vpop.permute.xlu0 %1231  ;;  %1865 = vtanh.f32 %v1027_v44 }
0x100d   :  { %v2447_v46 = vpop.eup %1865 }
0x100e   :  { %v1049_v47 = vpack.c.bf16 %v2447_v46, %v2447_v46 }
0x1010   :  { %v2451_v48 = vpop.permute.xlu0 %1463  ;;  %1739 = vmatmul.msk.bf16.vlgmr.msra.gmra.mxu0 %vm121_vm0, %v1049_v47 }
0x1011   :  { %1336 = vmatpush.bf16.msra.mxu0 %v2026_v9 }
0x1015   :  { %1337 = vmatpush.bf16.msra.mxu0 %v2032_v11 }
0x1018   :  { %v293_v49 = vpop.permute.xlu0 %292 }
0x1019   :  { %296 = vst.msk [vmem:[#allocation5] sm:$0xff] %vm295_vm2, %v293_v49 }
0x108d   :  { %v1062_v52 = vpop.f32.mrf.mxu0 }
0x108e   :  { %v1063_v54 = vadd.f32 %v2359_v56, %v1062_v52  ;;  %v1117_v52 = vstv %s1033_s6  ;;  %s1273_s6 = smul.f32 0.2784091, %s2539_s20 }
0x1090   :  { %v1067_v55 = vmul.f32 %v1066_v53, %v1063_v54  ;;  %v1088_v6 = vmul.f32 %v1087_v0, %v1063_v54  ;;  %v1112_v8 = vmul.f32 %v1111_v60, %v1063_v54  ;;  %v1139_v10 = vmul.f32 %v1138_v61, %v1063_v54 }
0x1091   :  { %v1169_v16 = vmul.f32 %v1168_v63, %v1063_v54  ;;  %v1144_v53 = vstv %s1036_s7  ;;  %v1174_v54 = vstv %s1040_s2  ;;  %v1189_v61 = vstv %s1045_s8  ;;  %s1278_s7 = smul.f32 -0.3223762, %s2539_s20 }
0x1092   :  { %v1068_v50 = vadd.f32 %v1067_v55, %v1027_v44  ;;  %v1089_v26 = vadd.f32 %v1088_v6, %v1027_v44  ;;  %v1113_v29 = vadd.f32 %v1112_v8, %v1027_v44  ;;  %v1140_v30 = vadd.f32 %v1139_v10, %v1027_v44  ;;  %s1274_s2 = smul.f32 -0.27353132, %s2539_s20 }
0x1093   :  { %v1170_v27 = vadd.f32 %v1169_v16, %v1027_v44  ;;  %v1185_v44 = vmul.f32 %v2447_v46, %v1184_v40  ;;  %s1279_s8 = smul.f32 0.13095239, %s2539_s20 }
0x1094   :  { %1867 = vtanh.f32 %v1068_v50 }
0x1095   :  { %v1064_v57 = vpop.f32.mrf.mxu0 }
0x109a   :  { %v1868_v58 = vpop.eup %1867 }
0x109b   :  { %v1070_v59 = vpack.c.bf16 %v1868_v58, %v1868_v58 }
0x109d   :  { %1740 = vmatmul.msk.bf16.vlgmr.msra.gmra.mxu1 %vm121_vm0, %v1070_v59 }
0x109e   :  { %1363 = vmatpush.bf16.msra.mxu1 %v2026_v9 }
0x10a2   :  { %1364 = vmatpush.bf16.msra.mxu1 %v2032_v11 }
0x111a   :  { %v1083_v20 = vpop.f32.mrf.mxu1 }
0x111b   :  { %v1084_v25 = vadd.f32 %v2359_v56, %v1083_v20  ;;  %v1147_v20 = vstv %s1037_s9  ;;  %s1960_s9 = smov 12  }
0x111d   :  { %v1091_v31 = vmul.f32 %v1090_v21, %v1084_v25  ;;  %v1115_v33 = vmul.f32 %v1114_v22, %v1084_v25  ;;  %v1142_v36 = vmul.f32 %v1141_v23, %v1084_v25  ;;  %v1172_v37 = vmul.f32 %v1171_v12, %v1084_v25 }
0x111e   :  { %v1177_v21 = vstv %s1041_s11  ;;  %s1961_s11 = smov 8  }
0x111f   :  { %v1092_v1 = vadd.f32 %v1091_v31, %v1089_v26  ;;  %v1116_v14 = vadd.f32 %v1115_v33, %v1113_v29  ;;  %v1143_v17 = vadd.f32 %v1142_v36, %v1140_v30  ;;  %v1173_v18 = vadd.f32 %v1172_v37, %v1170_v27 }
0x1120   :  { %v1192_v30 = vstv %s1046_s12  ;;  %s1962_s12 = smov 24  }
0x1121   :  { %1869 = vtanh.f32 %v1092_v1  ;;  %v1180_v1 = vstv %s1042_s13  ;;  %s1963_s13 = smov 20  }
0x1122   :  { %v1085_v24 = vpop.f32.mrf.mxu1 }
0x1127   :  { %v1870_v41 = vpop.eup %1869 }
0x1128   :  { %v1187_v42 = vmul.f32 %v1870_v41, %v1186_v38  ;;  %v1094_v43 = vpack.c.bf16 %v1870_v41, %v1870_v41  ;;  %v1195_v38 = vstv %s1047_s14  ;;  %s1753_s14 = sld [smem:[#allocation2 + $0x7]] }
0x112a   :  { %1741 = vmatmul.msk.bf16.vlgmr.msra.gmra.mxu2 %vm121_vm0, %v1094_v43  ;;  %v1188_v47 = vadd.f32 %v1187_v42, %v1185_v44  ;;  %v1216_v44 = vstv %s2460_s1  ;;  %s1270_s1 = smul.f32 2.8462753, %s2539_s20 }
0x112b   :  { %1393 = vmatpush.bf16.msra.mxu2 %v2026_v9 }
0x112e   :  { %s2606_s16 = ssub.f32 %s1753_s14, %s2535_s19 }
0x112f   :  { %1394 = vmatpush.bf16.msra.mxu2 %v2032_v11 }
0x1130   :  { %s1492_s18 = smul.f32 0.2, %s2606_s16 }
0x1131   :  { %s1493_s19 = smul.f32 0.075, %s2606_s16 }
0x11ad   :  { %v1107_v49 = vpop.f32.mrf.mxu2 }
0x11ae   :  { %v1108_v55 = vadd.f32 %v2359_v56, %v1107_v49 }
0x11b0   :  { %v1118_v50 = vmul.f32 %v1117_v52, %v1108_v55  ;;  %v1145_v57 = vmul.f32 %v1144_v53, %v1108_v55  ;;  %v1175_v46 = vmul.f32 %v1174_v54, %v1108_v55 }
0x11b2   :  { %v1119_v58 = vadd.f32 %v1118_v50, %v1116_v14  ;;  %v1146_v59 = vadd.f32 %v1145_v57, %v1143_v17  ;;  %v1176_v0 = vadd.f32 %v1175_v46, %v1173_v18 }
0x11b4   :  { %1871 = vtanh.f32 %v1119_v58 }
0x11b5   :  { %v1109_v60 = vpop.f32.mrf.mxu2 }
0x11ba   :  { %v1872_v63 = vpop.eup %1871 }
0x11bb   :  { %v1190_v6 = vmul.f32 %v1872_v63, %v1189_v61  ;;  %v1121_v8 = vpack.c.bf16 %v1872_v63, %v1872_v63 }
0x11bd   :  { %1742 = vmatmul.msk.bf16.vlgmr.msra.gmra.mxu3 %vm121_vm0, %v1121_v8  ;;  %v1191_v10 = vadd.f32 %v1190_v6, %v1188_v47  ;;  %v2507_v47 = vld [vmem:[%s2653_s3 + $0x50] ss:$0 sm:$0xff] }
0x11be   :  { %1440 = vmatpush.bf16.msra.mxu3 %v2137_v62  ;;  %v1217_v49 = vmul.f32 %v2507_v47, %v1216_v44 }
0x11c2   :  { %1441 = vmatpush.bf16.msra.mxu3 %v2146_v7 }
0x1240   :  { %v1134_v16 = vpop.f32.mrf.mxu3 }
0x1241   :  { %v1135_v22 = vadd.f32 %v2359_v56, %v1134_v16 }
0x1243   :  { %v1148_v23 = vmul.f32 %v1147_v20, %v1135_v22  ;;  %v1178_v12 = vmul.f32 %v1177_v21, %v1135_v22  ;;  %v1298_v20 = vstv %s1260_s21  ;;  %s1498_s21 = smul.f32 2.9525986, %s2606_s16 }
0x1245   :  { %v1149_v25 = vadd.f32 %v1148_v23, %v1146_v59  ;;  %v1179_v26 = vadd.f32 %v1178_v12, %v1176_v0 }
0x1247   :  { %1873 = vtanh.f32 %v1149_v25 }
0x1248   :  { %v1136_v29 = vpop.f32.mrf.mxu3 }
0x1249   :  { %v1319_v29 = vstv %s1261_s22  ;;  %s1502_s22 = smul.f32 2.8462753, %s2606_s16 }
0x124d   :  { %v1874_v27 = vpop.eup %1873 }
0x124e   :  { %v1193_v31 = vmul.f32 %v1874_v27, %v1192_v30  ;;  %v1151_v33 = vpack.c.bf16 %v1874_v27, %v1874_v27  ;;  %v1343_v30 = vstv %s1263_s0  ;;  %v1370_v27 = vstv %s1266_s17  ;;  %s1494_s0 = smul.f32 0.225, %s2606_s16 }
0x124f   :  { %s1496_s17 = smul.f32 -3.7333333, %s2606_s16 }
0x1250   :  { %v1194_v36 = vadd.f32 %v1193_v31, %v1191_v10  ;;  %1743 = vmatmul.msk.bf16.vlgmr.msrb.gmra.mxu0 %vm121_vm0, %v1151_v33  ;;  %v1400_v31 = vstv %s1270_s1  ;;  %s1499_s1 = smul.f32 -11.595794, %s2606_s16 }
0x1251   :  { %1523 = vmatpush.bf16.msrb.mxu0 %v2026_v9 }
0x1255   :  { %1524 = vmatpush.bf16.msrb.mxu0 %v2032_v11 }
0x12cd   :  { %v1164_v37 = vpop.f32.mrf.mxu0 }
0x12ce   :  { %v1165_v14 = vadd.f32 %v2359_v56, %v1164_v37 }
0x12d0   :  { %v1181_v17 = vmul.f32 %v1180_v1, %v1165_v14 }
0x12d2   :  { %v1182_v18 = vadd.f32 %v1181_v17, %v1179_v26  ;;  %v1322_v17 = vstv %s1262_s23  ;;  %s1503_s23 = smul.f32 -10.757576, %s2606_s16 }
0x12d4   :  { %1875 = vtanh.f32 %v1182_v18  ;;  %v1346_v18 = vstv %s1264_s10 }
0x12d5   :  { %v1166_v24 = vpop.f32.mrf.mxu0 }
0x12d6   :  { %v1373_v24 = vstv %s1267_s15 }
0x12da   :  { %v1876_v40 = vpop.eup %1875 }
0x12db   :  { %v1196_v41 = vmul.f32 %v1876_v40, %v1195_v38  ;;  %v1403_v38 = vstv %s1271_s24  ;;  %s1507_s24 = smul.f32 0.091145836, %s2606_s16 }
0x12dd   :  { %v1197_v42 = vadd.f32 %v1196_v41, %v1194_v36 }
0x12df   :  { %v1198_v43 = vpack.c.bf16 %v1197_v42, %v1197_v42 }
0x12e1   :  { %1744 = vmatmul.msk.bf16.vlgmr.msrb.gmra.mxu1 %vm121_vm0, %v1198_v43 }
0x12e2   :  { %1544 = vmatpush.bf16.msrb.mxu1 %v2026_v9 }
0x12e6   :  { %1545 = vmatpush.bf16.msrb.mxu1 %v2032_v11 }
0x135e   :  { %v1211_v52 = vpop.f32.mrf.mxu1 }
0x135f   :  { %v1215_v53 = vadd.f32 %v1211_v52, %v2396_v28  ;;  %v1234_v28 = vmul.f32 %v2412_v34, %v2445_v45 }
0x1361   :  { %v2511_v54 = vadd.f32 %v1217_v49, %v1215_v53  ;;  %v1235_v46 = vadd.f32 %v2418_v32, %v1234_v28 }
0x1363   :  { %1243 = vperm.xlu2 %1800, %v2511_v54   ;;  %1237 = vperm.xlu1 %1799, %v2511_v54  }
0x1366   :  { %v1213_v55 = vpop.f32.mrf.mxu1 }
0x136b   :  { %1802 = vset.pattern.permute.xlu2 %v1953_v4  ;;  %1801 = vset.pattern.permute.xlu1 %v1954_v5 }
0x136c   :  { %1255 = vperm.xlu2 %1802, %v2511_v54   ;;  %1249 = vperm.xlu1 %1801, %v2511_v54  }
0x1374   :  { %1805 = vset.pattern.permute.xlu2 %v1952_v3  ;;  %1804 = vset.pattern.permute.xlu1 %v1951_v2 }
0x13bd   :  { %v1244_v50 = vpop.permute.xlu2 %1243 }
0x13be   :  { %v1246_v0 = vmul.f32 %v2430_v19, %v1244_v50 }
0x13c6   :  { %v1256_v60 = vpop.permute.xlu2 %1255 }
0x13c7   :  { %v1258_v2 = vmul.f32 %v2442_v35, %v1256_v60 }
0x13d5   :  { %v1238_v57 = vpop.permute.xlu1 %1237 }
0x13d6   :  { %v1240_v58 = vmul.f32 %v2424_v15, %v1238_v57 }
0x13d8   :  { %v1241_v59 = vadd.f32 %v1240_v58, %v1235_v46 }
0x13da   :  { %v1247_v63 = vadd.f32 %v1246_v0, %v1241_v59  ;;  %v1418_v59 = vstv %s1276_s26  ;;  %v1416_v0 = vstv %s1275_s25  ;;  %s1497_s25 = smul.f32 3.5555556, %s2606_s16 }
0x13db   :  { %s1500_s26 = smul.f32 9.822893, %s2606_s16 }
0x13de   :  { %v1250_v61 = vpop.permute.xlu1 %1249 }
0x13df   :  { %v1252_v3 = vmul.f32 %v2436_v39, %v1250_v61 }
0x13e1   :  { %v1253_v6 = vadd.f32 %v1252_v3, %v1247_v63 }
0x13e3   :  { %v1259_v8 = vadd.f32 %v1258_v2, %v1253_v6 }
0x13e5   :  { %1877 = vtanh.f32 %v1259_v8 }
0x13eb   :  { %v2528_v45 = vpop.eup %1877 }
0x13ec   :  { %v1281_v10 = vpack.c.bf16 %v2528_v45, %v2528_v45  ;;  %v1417_v3 = vmul.f32 %v2528_v45, %v1416_v0 }
0x13ee   :  { %1747 = vmatmul.msk.bf16.vlgmr.msrb.gmra.mxu2 %vm121_vm0, %v1281_v10  ;;  %v1376_v10 = vstv %s1268_s28  ;;  %s1509_s28 = smul.f32 0.6510417, %s2606_s16 }
0x13ef   :  { %1568 = vmatpush.bf16.msrb.mxu2 %v2026_v9 }
0x13f3   :  { %1569 = vmatpush.bf16.msrb.mxu2 %v2032_v11 }
0x1471   :  { %v1294_v16 = vpop.f32.mrf.mxu2 }
0x1472   :  { %v1295_v21 = vadd.f32 %v2359_v56, %v1294_v16  ;;  %v1406_v16 = vstv %s1272_s29  ;;  %s1501_s29 = smul.f32 -0.29080933, %s2606_s16 }
0x1474   :  { %v1299_v22 = vmul.f32 %v1298_v20, %v1295_v21  ;;  %v1320_v33 = vmul.f32 %v1319_v29, %v1295_v21  ;;  %v1344_v36 = vmul.f32 %v1343_v30, %v1295_v21  ;;  %v1371_v37 = vmul.f32 %v1370_v27, %v1295_v21 }
0x1475   :  { %v1401_v1 = vmul.f32 %v1400_v31, %v1295_v21 }
0x1476   :  { %v1300_v23 = vadd.f32 %v1299_v22, %v1259_v8  ;;  %v1321_v41 = vadd.f32 %v1320_v33, %v1259_v8  ;;  %v1345_v42 = vadd.f32 %v1344_v36, %v1259_v8  ;;  %v1372_v43 = vadd.f32 %v1371_v37, %v1259_v8 }
0x1477   :  { %v1402_v44 = vadd.f32 %v1401_v1, %v1259_v8  ;;  %v1349_v8 = vstv %s1265_s27  ;;  %v1379_v33 = vstv %s1269_s5  ;;  %v1409_v36 = vstv %s1273_s6  ;;  %s1504_s27 = smul.f32 8.906423, %s2606_s16 }
0x1478   :  { %1879 = vtanh.f32 %v1300_v23  ;;  %s1510_s5 = smul.f32 -0.3223762, %s2606_s16 }
0x1479   :  { %v1296_v12 = vpop.f32.mrf.mxu2  ;;  %s1506_s6 = smul.f32 -0.27353132, %s2606_s16 }
0x147e   :  { %v1880_v25 = vpop.eup %1879 }
0x147f   :  { %v1302_v26 = vpack.c.bf16 %v1880_v25, %v1880_v25  ;;  %v1421_v25 = vstv %s1277_s30  ;;  %s1505_s30 = smul.f32 0.2784091, %s2606_s16 }
0x1481   :  { %1748 = vmatmul.msk.bf16.vlgmr.msrb.gmra.mxu3 %vm121_vm0, %v1302_v26 }
0x1482   :  { %1595 = vmatpush.bf16.msrb.mxu3 %v2026_v9 }
0x1486   :  { %1596 = vmatpush.bf16.msrb.mxu3 %v2032_v11 }
0x1504   :  { %v1315_v14 = vpop.f32.mrf.mxu3 }
0x1505   :  { %v1316_v40 = vadd.f32 %v2359_v56, %v1315_v14 }
0x1507   :  { %v1323_v49 = vmul.f32 %v1322_v17, %v1316_v40  ;;  %v1347_v52 = vmul.f32 %v1346_v18, %v1316_v40  ;;  %v1374_v53 = vmul.f32 %v1373_v24, %v1316_v40  ;;  %v1404_v55 = vmul.f32 %v1403_v38, %v1316_v40 }
0x1508   :  { %v1424_v38 = vstv %s1278_s7  ;;  %s1511_s7 = smul.f32 0.13095239, %s2606_s16 }
0x1509   :  { %v1324_v28 = vadd.f32 %v1323_v49, %v1321_v41  ;;  %v1348_v50 = vadd.f32 %v1347_v52, %v1345_v42  ;;  %v1375_v57 = vadd.f32 %v1374_v53, %v1372_v43  ;;  %v1405_v46 = vadd.f32 %v1404_v55, %v1402_v44 }
0x150a   :  { %v1412_v43 = vstv %s1274_s2  ;;  %v1427_v55 = vstv %s1279_s8  ;;  %s1964_s2 = smov 28   ;;  %s1965_s8 = smov [#allocation5]  }
0x150b   :  { %1881 = vtanh.f32 %v1324_v28 }
0x150c   :  { %v1317_v58 = vpop.f32.mrf.mxu3 }
0x150d   :  { %v1448_v58 = vstv %s2539_s20  ;;  %s1495_s20 = smul.f32 0.9777778, %s2606_s16 }
0x1511   :  { %v1882_v60 = vpop.eup %1881 }
0x1512   :  { %v1419_v61 = vmul.f32 %v1882_v60, %v1418_v59  ;;  %v1326_v63 = vpack.c.bf16 %v1882_v60, %v1882_v60  ;;  %v1449_v59 = vmul.f32 %v2507_v47, %v1448_v58 }
0x1514   :  { %1749 = vmatmul.msk.bf16.vlgmr.msra.gmra.mxu0 %vm121_vm0, %v1326_v63  ;;  %v1420_v2 = vadd.f32 %v1419_v61, %v1417_v3 }
0x1515   :  { %1625 = vmatpush.bf16.msra.mxu0 %v2026_v9 }
0x1519   :  { %1626 = vmatpush.bf16.msra.mxu0 %v2032_v11 }
0x1591   :  { %v1339_v6 = vpop.f32.mrf.mxu0 }
0x1592   :  { %v1340_v20 = vadd.f32 %v2359_v56, %v1339_v6 }
0x1594   :  { %v1350_v21 = vmul.f32 %v1349_v8, %v1340_v20  ;;  %v1377_v22 = vmul.f32 %v1376_v10, %v1340_v20  ;;  %v1407_v45 = vmul.f32 %v1406_v16, %v1340_v20 }
0x1596   :  { %v1351_v23 = vadd.f32 %v1350_v21, %v1348_v50  ;;  %v1378_v12 = vadd.f32 %v1377_v22, %v1375_v57  ;;  %v1408_v9 = vadd.f32 %v1407_v45, %v1405_v46 }
0x1598   :  { %1883 = vtanh.f32 %v1351_v23  ;;  %v1530_v23 = vstv %s1492_s18 }
0x1599   :  { %v1341_v11 = vpop.f32.mrf.mxu0 }
0x159e   :  { %v1884_v26 = vpop.eup %1883 }
0x159f   :  { %v1422_v29 = vmul.f32 %v1884_v26, %v1421_v25  ;;  %v1353_v30 = vpack.c.bf16 %v1884_v26, %v1884_v26 }
0x15a1   :  { %1750 = vmatmul.msk.bf16.vlgmr.msra.gmra.mxu1 %vm121_vm0, %v1353_v30  ;;  %v1423_v27 = vadd.f32 %v1422_v29, %v1420_v2  ;;  %v1551_v30 = vstv %s1493_s19 }
0x15a2   :  { %1672 = vmatpush.bf16.msra.mxu1 %v2137_v62 }
0x15a6   :  { %1673 = vmatpush.bf16.msra.mxu1 %v2146_v7 }
0x161e   :  { %v1366_v31 = vpop.f32.mrf.mxu1 }
0x161f   :  { %v1367_v37 = vadd.f32 %v2359_v56, %v1366_v31  ;;  %v1602_v31 = vstv %s1498_s21 }
0x1621   :  { %v1380_v1 = vmul.f32 %v1379_v33, %v1367_v37  ;;  %v1410_v14 = vmul.f32 %v1409_v36, %v1367_v37 }
0x1623   :  { %v1381_v17 = vadd.f32 %v1380_v1, %v1378_v12  ;;  %v1411_v18 = vadd.f32 %v1410_v14, %v1408_v9 }
0x1625   :  { %1885 = vtanh.f32 %v1381_v17  ;;  %v1554_v17 = vstv %s1494_s0 }
0x1626   :  { %v1368_v24 = vpop.f32.mrf.mxu1 }
0x1627   :  { %v1605_v24 = vstv %s1499_s1 }
0x162b   :  { %v1886_v62 = vpop.eup %1885 }
0x162c   :  { %v1425_v40 = vmul.f32 %v1886_v62, %v1424_v38  ;;  %v1383_v7 = vpack.c.bf16 %v1886_v62, %v1886_v62  ;;  %v1635_v38 = vstv %s1503_s23  ;;  %v2622_v62 = vld [vmem:[%s2653_s3 + $0x28] ss:$0 sm:$0xff]  ;;  %s1508_s3 = smul.f32 0.4492363, %s2606_s16 }
0x162e   :  { %v1426_v41 = vadd.f32 %v1425_v40, %v1423_v27  ;;  %1751 = vmatmul.msk.bf16.vlgmr.msra.gmra.mxu2 %vm121_vm0, %v1383_v7  ;;  %v1575_v27 = vstv %s1495_s20  ;;  %v1650_v58 = vstv %s1508_s3 }
0x16b1   :  { %v1396_v42 = vpop.f32.mrf.mxu2 }
0x16b2   :  { %v1397_v44 = vadd.f32 %v2359_v56, %v1396_v42 }
0x16b4   :  { %v1413_v49 = vmul.f32 %v1412_v43, %v1397_v44 }
0x16b6   :  { %v1414_v52 = vadd.f32 %v1413_v49, %v1411_v18  ;;  %v1578_v18 = vstv %s1496_s17 }
0x16b8   :  { %1887 = vtanh.f32 %v1414_v52 }
0x16b9   :  { %v1398_v53 = vpop.f32.mrf.mxu2 }
0x16be   :  { %v1888_v28 = vpop.eup %1887 }
0x16bf   :  { %v1428_v50 = vmul.f32 %v1888_v28, %v1427_v55 }
0x16c1   :  { %v1429_v57 = vadd.f32 %v1428_v50, %v1426_v41 }
0x16c3   :  { %v1430_v46 = vpack.c.bf16 %v1429_v57, %v1429_v57 }
0x16c5   :  { %1752 = vmatmul.msk.bf16.vlgmr.msra.gmra.mxu3 %vm121_vm0, %v1430_v46 }
0x1748   :  { %v1443_v0 = vpop.f32.mrf.mxu3 }
0x1749   :  { %v1447_v60 = vadd.f32 %v1443_v0, %v2511_v54 }
0x174b   :  { %v2581_v61 = vadd.f32 %v1449_v59, %v1447_v60  ;;  %v1648_v59 = vstv %s1507_s24 }
0x174d   :  { %1475 = vperm.xlu2 %1805, %v2581_v61   ;;  %1469 = vperm.xlu1 %1804, %v2581_v61  }
0x1750   :  { %v1445_v63 = vpop.f32.mrf.mxu3 }
0x1755   :  { %1807 = vset.pattern.permute.xlu2 %v1953_v4  ;;  %1806 = vset.pattern.permute.xlu1 %v1954_v5  ;;  %v1466_v4 = vmul.f32 %v2412_v34, %v2451_v48 }
0x1756   :  { %1487 = vperm.xlu2 %1807, %v2581_v61   ;;  %1481 = vperm.xlu1 %1806, %v2581_v61  }
0x1757   :  { %v1467_v2 = vadd.f32 %v2418_v32, %v1466_v4  ;;  %v989_v32 = vpop.permute.xlu0 %988 }
0x175e   :  { %756 = vrot.lane.b32.xlu2 %v2316_v13, %s1960_s9  ;;  %524 = vrot.lane.b32.xlu1 %v2241_v51, %s1961_s11  ;;  %s1694_s9 = sshll.u32 %s1965_s8, 4  ;;  %s1695_s9 = int_to_ptr.vmem [resolvable:$true] %s1694_s9 }
0x1766   :  { %1452 = vrot.lane.b32.xlu2 %v2581_v61, %s1962_s12  ;;  %1220 = vrot.lane.b32.xlu1 %v2511_v54, %s1963_s13  ;;  %s1696_s13 = sshll.u32 %s2654_s4, 4  ;;  %s1697_s13 = int_to_ptr.hbm [resolvable:$true] %s1696_s13 }
0x17a7   :  { %v1476_v3 = vpop.permute.xlu2 %1475 }
0x17a8   :  { %v1478_v10 = vmul.f32 %v2430_v19, %v1476_v3 }
0x17b0   :  { %v1488_v8 = vpop.permute.xlu2 %1487 }
0x17b1   :  { %v1490_v21 = vmul.f32 %v2442_v35, %v1488_v8  ;;  %v1638_v8 = vstv %s1504_s27 }
0x17b8   :  { %v757_v45 = vpop.permute.xlu2 %756 }
0x17bf   :  { %v1470_v5 = vpop.permute.xlu1 %1469 }
0x17c0   :  { %v1472_v6 = vmul.f32 %v2424_v15, %v1470_v5  ;;  %v1453_v35 = vpop.permute.xlu2 %1452 }
0x17c2   :  { %v1473_v13 = vadd.f32 %v1472_v6, %v1467_v2  ;;  %v1581_v2 = vstv %s1497_s25  ;;  %v1608_v6 = vstv %s1500_s26 }
0x17c4   :  { %v1479_v16 = vadd.f32 %v1478_v10, %v1473_v13 }
0x17c8   :  { %v1482_v51 = vpop.permute.xlu1 %1481 }
0x17c9   :  { %v1484_v20 = vmul.f32 %v2436_v39, %v1482_v51 }
0x17cb   :  { %v1485_v54 = vadd.f32 %v1484_v20, %v1479_v16 }
0x17cd   :  { %v1491_v22 = vadd.f32 %v1490_v21, %v1485_v54 }
0x17cf   :  { %1889 = vtanh.f32 %v1491_v22 }
0x17d0   :  { %v525_v34 = vpop.permute.xlu1 %524 }
0x17d1   :  { %528 = vst.msk [vmem:[#allocation5] sm:$0xff] %vm527_vm3, %v525_v34 }
0x17d2   :  { %760 = vst.msk [vmem:[#allocation5] sm:$0xff] %vm759_vm4, %v757_v45  ;;  %v1653_v45 = vstv %s1509_s28 }
0x17d3   :  { %992 = vst.msk [vmem:[#allocation5] sm:$0xff] %vm991_vm5, %v989_v32 }
0x17d5   :  { %v2600_v15 = vpop.eup %1889 }
0x17d6   :  { %v1513_v19 = vpack.c.bf16 %v2600_v15, %v2600_v15  ;;  %v1649_v3 = vmul.f32 %v2600_v15, %v1648_v59 }
0x17d8   :  { %1755 = vmatmul.msk.bf16.vlgmr.msrb.gmra.mxu0 %vm121_vm0, %v1513_v19  ;;  %v1221_v39 = vpop.permute.xlu1 %1220 }
0x17d9   :  { %1224 = vst.msk [vmem:[#allocation5] sm:$0xff] %vm1223_vm6, %v1221_v39 }
0x17da   :  { %1456 = vst.msk [vmem:[#allocation5] sm:$0xff] %vm1455_vm7, %v1453_v35  ;;  %v1611_v35 = vstv %s1501_s29 }
0x1855   :  { %v1526_v48 = vpop.f32.mrf.mxu0 }
0x1856   :  { %v1527_v12 = vadd.f32 %v2359_v56, %v1526_v48  ;;  %v1632_v56 = vstv %s1502_s22  ;;  %v1641_v48 = vstv %s1505_s30 }
0x1858   :  { %v1531_v9 = vmul.f32 %v1530_v23, %v1527_v12  ;;  %v1552_v33 = vmul.f32 %v1551_v30, %v1527_v12  ;;  %v1576_v36 = vmul.f32 %v1575_v27, %v1527_v12  ;;  %v1603_v37 = vmul.f32 %v1602_v31, %v1527_v12 }
0x1859   :  { %v1633_v1 = vmul.f32 %v1632_v56, %v1527_v12 }
0x185a   :  { %v1532_v11 = vadd.f32 %v1531_v9, %v1491_v22  ;;  %v1553_v7 = vadd.f32 %v1552_v33, %v1491_v22  ;;  %v1577_v41 = vadd.f32 %v1576_v36, %v1491_v22  ;;  %v1604_v42 = vadd.f32 %v1603_v37, %v1491_v22 }
0x185b   :  { %v1634_v43 = vadd.f32 %v1633_v1, %v1491_v22  ;;  %v1644_v36 = vstv %s1506_s6 }
0x185c   :  { %1891 = vtanh.f32 %v1532_v11 }
0x185d   :  { %v1528_v25 = vpop.f32.mrf.mxu0 }
0x1862   :  { %v1892_v26 = vpop.eup %1891 }
0x1863   :  { %v1534_v29 = vpack.c.bf16 %v1892_v26, %v1892_v26 }
0x1865   :  { %1756 = vmatmul.msk.bf16.vlgmr.msrb.gmra.mxu1 %vm121_vm0, %v1534_v29  ;;  %v1656_v29 = vstv %s1510_s5 }
0x18e2   :  { %v1547_v14 = vpop.f32.mrf.mxu1 }
0x18e3   :  { %v1548_v40 = vadd.f32 %v2622_v62, %v1547_v14 }
0x18e5   :  { %v1555_v44 = vmul.f32 %v1554_v17, %v1548_v40  ;;  %v1579_v49 = vmul.f32 %v1578_v18, %v1548_v40  ;;  %v1606_v52 = vmul.f32 %v1605_v24, %v1548_v40  ;;  %v1636_v53 = vmul.f32 %v1635_v38, %v1548_v40 }
0x18e6   :  { %v1659_v18 = vstv %s1511_s7 }
0x18e7   :  { %v1556_v55 = vadd.f32 %v1555_v44, %v1553_v7  ;;  %v1580_v28 = vadd.f32 %v1579_v49, %v1577_v41  ;;  %v1607_v50 = vadd.f32 %v1606_v52, %v1604_v42  ;;  %v1637_v57 = vadd.f32 %v1636_v53, %v1634_v43 }
0x18e8   :  { %v1680_v41 = vstv %s2606_s16 }
0x18e9   :  { %1893 = vtanh.f32 %v1556_v55  ;;  %v1681_v42 = vmul.f32 %v2507_v47, %v1680_v41 }
0x18ea   :  { %v1549_v46 = vpop.f32.mrf.mxu1 }
0x18ef   :  { %v1894_v0 = vpop.eup %1893 }
0x18f0   :  { %v1651_v60 = vmul.f32 %v1894_v0, %v1650_v58  ;;  %v1558_v63 = vpack.c.bf16 %v1894_v0, %v1894_v0 }
0x18f2   :  { %1757 = vmatmul.msk.bf16.vlgmr.msrb.gmra.mxu2 %vm121_vm0, %v1558_v63  ;;  %v1652_v4 = vadd.f32 %v1651_v60, %v1649_v3 }
0x1975   :  { %v1571_v5 = vpop.f32.mrf.mxu2 }
0x1976   :  { %v1572_v13 = vadd.f32 %v2622_v62, %v1571_v5 }
0x1978   :  { %v1582_v10 = vmul.f32 %v1581_v2, %v1572_v13  ;;  %v1609_v51 = vmul.f32 %v1608_v6, %v1572_v13  ;;  %v1639_v16 = vmul.f32 %v1638_v8, %v1572_v13 }
0x197a   :  { %v1583_v20 = vadd.f32 %v1582_v10, %v1580_v28  ;;  %v1610_v21 = vadd.f32 %v1609_v51, %v1607_v50  ;;  %v1640_v54 = vadd.f32 %v1639_v16, %v1637_v57 }
0x197c   :  { %1895 = vtanh.f32 %v1583_v20 }
0x197d   :  { %v1573_v22 = vpop.f32.mrf.mxu2 }
0x1982   :  { %v1896_v34 = vpop.eup %1895 }
0x1983   :  { %v1654_v32 = vmul.f32 %v1896_v34, %v1653_v45  ;;  %v1585_v15 = vpack.c.bf16 %v1896_v34, %v1896_v34 }
0x1985   :  { %1758 = vmatmul.msk.bf16.vlgmr.msrb.gmra.mxu3 %vm121_vm0, %v1585_v15  ;;  %v1655_v19 = vadd.f32 %v1654_v32, %v1652_v4 }
0x1a08   :  { %v1598_v39 = vpop.f32.mrf.mxu3 }
0x1a09   :  { %v1599_v23 = vadd.f32 %v2622_v62, %v1598_v39 }
0x1a0b   :  { %v1612_v12 = vmul.f32 %v1611_v35, %v1599_v23  ;;  %v1642_v9 = vmul.f32 %v1641_v48, %v1599_v23 }
0x1a0d   :  { %v1613_v11 = vadd.f32 %v1612_v12, %v1610_v21  ;;  %v1643_v25 = vadd.f32 %v1642_v9, %v1640_v54 }
0x1a0f   :  { %1897 = vtanh.f32 %v1613_v11 }
0x1a10   :  { %v1600_v26 = vpop.f32.mrf.mxu3 }
0x1a15   :  { %v1898_v30 = vpop.eup %1897 }
0x1a16   :  { %v1657_v27 = vmul.f32 %v1898_v30, %v1656_v29  ;;  %v1615_v31 = vpack.c.bf16 %v1898_v30, %v1898_v30 }
0x1a18   :  { %v1658_v56 = vadd.f32 %v1657_v27, %v1655_v19  ;;  %1759 = vmatmul.msk.bf16.vlgmr.msra.gmra.mxu0 %vm121_vm0, %v1615_v31 }
0x1a95   :  { %v1628_v33 = vpop.f32.mrf.mxu0 }
0x1a96   :  { %v1629_v37 = vadd.f32 %v2622_v62, %v1628_v33 }
0x1a98   :  { %v1645_v1 = vmul.f32 %v1644_v36, %v1629_v37 }
0x1a9a   :  { %v1646_v14 = vadd.f32 %v1645_v1, %v1643_v25 }
0x1a9c   :  { %1899 = vtanh.f32 %v1646_v14 }
0x1a9d   :  { %v1630_v17 = vpop.f32.mrf.mxu0 }
0x1aa2   :  { %v1900_v24 = vpop.eup %1899 }
0x1aa3   :  { %v1660_v38 = vmul.f32 %v1900_v24, %v1659_v18 }
0x1aa5   :  { %v1661_v40 = vadd.f32 %v1660_v38, %v1658_v56 }
0x1aa7   :  { %v1662_v7 = vpack.c.bf16 %v1661_v40, %v1661_v40 }
0x1aa9   :  { %1760 = vmatmul.msk.bf16.vlgmr.msra.gmra.mxu1 %vm121_vm0, %v1662_v7 }
0x1b26   :  { %v1675_v43 = vpop.f32.mrf.mxu1 }
0x1b27   :  { %v1679_v44 = vadd.f32 %v1675_v43, %v2581_v61 }
0x1b29   :  { %v1682_v49 = vadd.f32 %v1681_v42, %v1679_v44 }
0x1b2b   :  { %1684 = vrot.lane.b32.xlu0 %v1682_v49, %s1964_s2 }
0x1b2e   :  { %v1677_v62 = vpop.f32.mrf.mxu1 }
0x1b9d   :  { %v1685_v52 = vpop.permute.xlu0 %1684 }
0x1b9e   :  { %1688 = vst.msk [vmem:[#allocation5] sm:$0xff] %vm1687_vm8, %v1685_v52 }
0x1b9f   :  { %1699 = dma.vmem_to_hbm [thread:$0]  %s1695_s9, 128, %s1697_s13, [#allocation3]  }
0x1ba0   :  { %1948 = dma.done.wait [#allocation3], 128  }
0x1ba1   :  { %1949 = vsyncadd [#allocation3], 4294967168 }
0x1ba2   :  { %1704 = vsyncpa [#allocation3], 1 }
0x1ba3   :  { %1705 = vsyncpa [#allocation4], 1 }

</bundles_post_ra>
